<compile_context>
chip_gen: v5e
topology: v5e:2x2
jax: 0.10.0
libtpu: 0.0.40
codegen_flags: <defaults>
</compile_context>

<pallas_src>
import functools

import jax
import jax.numpy as jnp
from jax.experimental import pallas as pl
from jax.experimental.pallas import tpu as pltpu


def _round_up(x, m):
    return (x + m - 1) // m * m


# ----------------------------------------------------------------------------
# Generation-aware sizing helpers
# ----------------------------------------------------------------------------
def _device_kind():
    try:
        return jax.devices()[0].device_kind.lower()
    except Exception:
        return ""


def _vmem_budget(kind):
    """(tile-picker working-set budget, scoped-VMEM limit handed to Mosaic)."""
    cap = 64 * 1024 * 1024 if "7" in kind else 128 * 1024 * 1024   # v7x: 64 MiB/TC
    budget = int(0.60 * cap)
    limit = min(int(0.82 * cap), 100 * 1024 * 1024)
    return budget, limit


def _mxu_depth_256(kind):
    """True on v6e / v7x (256-deep MXU); v2-v5 MXUs are 128 deep."""
    return not any(v in kind for v in ("v2", "v3", "v4", "v5"))


def _tile_vmem_bytes(th, W, Wpad, Cp, in_item, out_item):
    """Approximate VMEM working set for a row tile of `th` original rows."""
    w_item = 2                                       # bf16 phase-folded weights
    in_blk = th * Wpad * Cp * in_item                # main row block
    halo_blk = 2 * Wpad * Cp * in_item               # two 1-row halo blocks
    out_blk = 4 * th * W * Cp * out_item             # (2,2,th,W,Cp) output block
    w_blk = 2 * 2 * Cp * 4 * Cp * w_item             # phase-folded weights
    b_blk = Cp * 4                                   # bias
    tail = (min(th, 2) + 2) * Wpad * Cp * in_item    # boundary-row scratch
    # in-kernel temporaries: f32 product + bf16 operand (concat/taps) + epilogue
    temps = (th * Wpad * 4 * Cp * 4) + (th * Wpad * 2 * Cp * in_item) + (2 * th * W * Cp * 4)
    # x2: BlockSpec double-buffering (the constant-index weight/bias blocks
    # still get 2 buffers; single-buffering them via pl.Buffered(1) is a
    # possible follow-up, so we account conservatively here).
    return 2 * (in_blk + halo_blk + out_blk + w_blk + b_blk) + tail + temps


def _pick_row_tile(H, W, Wpad, Cp, in_item, out_item, budget_bytes, min_tiles=1):
    """Largest row tile dividing H that fits the VMEM budget (>=min_tiles tiles)."""
    divs = [d for d in range(1, H + 1) if H % d == 0]
    cand = [d for d in divs if H // d >= min_tiles] or divs
    fits = [d for d in cand
            if _tile_vmem_bytes(d, W, Wpad, Cp, in_item, out_item) <= budget_bytes]
    # TODO(synk): support a ragged last tile (pl.cdiv grid + row masking) so a
    # non-composite H does not degrade to tiny row tiles.
    return max(fits) if fits else min(cand)


# ----------------------------------------------------------------------------
# Weight folding: nearest-2x upsample folded into the 3x3 conv
# ----------------------------------------------------------------------------
def _phase_weights(weight, Cp):
    """Fold nearest-2x upsampling into the 3x3 conv weights.

    Returns bf16 (2, 2, Cp, 4*Cp):
      dim0 = output row phase pi, dim1 = row tap a (original row y-1+pi+a... ),
      K rows = Cin, N columns = blocks k = 2*pj + b (col phase, col tap), Cp wide.
    """
    c_out, c_in, _, _ = weight.shape
    m = jnp.transpose(weight, (2, 3, 1, 0)).astype(jnp.float32)     # (3,3,Cin,Cout)
    m = jnp.pad(m, ((0, 0), (0, 0), (0, Cp - c_in), (0, Cp - c_out)))
    # Which original 3x3 taps collapse onto each (phase, tap) pair for nearest-2x.
    sel = (((0,), (1, 2)), ((0, 1), (2,)))           # [phase][tap] -> kernel rows/cols
    per_pi = []
    for pi in range(2):
        taps = []
        for a in range(2):
            blocks = []
            for pj in range(2):
                for b in range(2):                   # column block k = 2*pj + b
                    v = jnp.zeros((Cp, Cp), jnp.float32)
                    for ky in sel[pi][a]:
                        for kx in sel[pj][b]:
                            v = v + m[ky, kx]
                    blocks.append(v)
            taps.append(jnp.concatenate(blocks, axis=1))            # (Cp, 4Cp)
        per_pi.append(jnp.stack(taps, axis=0))                      # (2, Cp, 4Cp)
    # Fold in f32 (single rounding), then cast once to bf16 for the MXU.
    return jnp.stack(per_pi, axis=0).astype(jnp.bfloat16)           # (2, 2, Cp, 4Cp)


# ----------------------------------------------------------------------------
# Kernel
# ----------------------------------------------------------------------------
def _upsample_conv_kernel(xm_ref, xh0_ref, xh1_ref, w_ref, b_ref, o_ref, tw_ref,
                          *, fuse_k):
    """Fused nearest-2x upsample + 3x3 'same' conv for one (batch, row-tile) block.

    xm_ref : (1, TH, Wpad, Cp)   bf16 padded original-res rows [t*TH, t*TH+TH)
    xh0_ref: (1, 1,  Wpad, Cp)   bf16 halo row t*TH+TH
    xh1_ref: (1, 1,  Wpad, Cp)   bf16 halo row t*TH+TH+1
    w_ref  : (2, 2, Cp, 4*Cp)    bf16 phase-folded weights (constant block)
    b_ref  : (1, Cp)             f32 bias
    o_ref  : (1, 2, 2, TH, W, Cp) phase-separated output
    tw_ref : (min(TH,2)+2, Wpad, Cp) VMEM scratch: boundary rows only
    """
    TH, Wpad, Cp = xm_ref.shape[1], xm_ref.shape[2], xm_ref.shape[3]
    W = o_ref.shape[4]
    S = max(TH - 2, 0)                      # first padded-window row staged in tw

    # Stage ONLY the boundary rows (<=2 bottom rows of the main block + the two
    # halo rows); the bulk operands are free row-offset slices of xm_ref.
    tw_ref[0:TH - S] = xm_ref[0, S:TH]
    tw_ref[TH - S] = xh0_ref[0, 0]
    tw_ref[TH - S + 1] = xh1_ref[0, 0]

    bias = b_ref[0].astype(jnp.float32)                              # (Cp,)

    def emit(prod, pi, r0):
        # prod: (nrows, Wpad, 4Cp) f32 -> four lane-dense (nrows, W, Cp) blocks.
        nrows = prod.shape[0]
        for pj in range(2):
            k0, k1 = 2 * pj, 2 * pj + 1
            c0 = prod[:, pj:pj + W, k0 * Cp:(k0 + 1) * Cp]           # col tap b=0
            c1 = prod[:, pj + 1:pj + 1 + W, k1 * Cp:(k1 + 1) * Cp]   # col tap b=1
            o_ref[0, pi, pj, r0:r0 + nrows] = (c0 + c1 + bias).astype(o_ref.dtype)

    for pi in range(2):                                              # output row phase
        rb = max(TH - 1 - pi, 0)                                     # first boundary row

        # ---- bulk rows [0, rb): both row taps live inside the main block ----
        if rb > 0:
            t0 = xm_ref[0, pi:pi + rb]                               # (rb, Wpad, Cp) bf16
            t1 = xm_ref[0, pi + 1:pi + 1 + rb]
            if fuse_k:
                # K = 2*Cp fused matmul: fills a 256-deep MXU when Cp == 128.
                cat = jnp.concatenate([t0, t1], axis=-1).reshape(rb * Wpad, 2 * Cp)
                prod = jnp.dot(cat, w_ref[pi].reshape(2 * Cp, 4 * Cp),
                               preferred_element_type=jnp.float32)
            else:
                # Two accumulating K = Cp matmuls: no lane-concat copy.
                prod = jnp.dot(t0.reshape(rb * Wpad, Cp), w_ref[pi, 0],
                               preferred_element_type=jnp.float32)
                prod = prod + jnp.dot(t1.reshape(rb * Wpad, Cp), w_ref[pi, 1],
                                      preferred_element_type=jnp.float32)
            emit(prod.reshape(rb, Wpad, 4 * Cp), pi, 0)

        # ---- boundary rows [rb, TH): need the bottom halo (tiny matmuls) ----
        nb = TH - rb
        a0 = rb + pi - S
        bt0 = tw_ref[a0:a0 + nb]
        bt1 = tw_ref[a0 + 1:a0 + 1 + nb]
        prodb = jnp.dot(bt0.reshape(nb * Wpad, Cp), w_ref[pi, 0],
                        preferred_element_type=jnp.float32)
        prodb = prodb + jnp.dot(bt1.reshape(nb * Wpad, Cp), w_ref[pi, 1],
                                preferred_element_type=jnp.float32)
        emit(prodb.reshape(nb, Wpad, 4 * Cp), pi, rb)


# ----------------------------------------------------------------------------
# Wrapper (matches Upsample.forward semantics)
# ----------------------------------------------------------------------------
def upsample_forward(x_nchw, weight, bias, with_conv=True, row_tile=None):
    """F.interpolate(scale=2, mode='nearest') then (optionally) conv3x3(pad=1)."""
    B, C, H, W = x_nchw.shape
    if not with_conv:
        # Pure nearest-neighbor 2x repeat; trivial data movement, no kernel needed.
        return jnp.repeat(jnp.repeat(x_nchw, 2, axis=2), 2, axis=3)

    out_dtype = x_nchw.dtype
    Cp = _round_up(max(C, 128), 128)            # lane-dense channels
    Wpad = _round_up(W + 2, 8)                  # sublane-clean padded width

    kind = _device_kind()
    budget, vmem_limit = _vmem_budget(kind)
    in_item = 2                                 # bf16 activations on the MXU path
    out_item = jnp.dtype(out_dtype).itemsize

    # Keep >= 2 grid steps when B == 1 so both v7x TensorCores get work.
    min_tiles = 2 if B < 2 else 1
    if row_tile is None:
        TH = _pick_row_tile(H, W, Wpad, Cp, in_item, out_item, budget, min_tiles)
    else:
        if H % row_tile:
            raise ValueError("row_tile must divide H")
        TH = row_tile
    nt = H // TH

    # K=2Cp fusion only pays on a 256-deep MXU (v6e/v7x) at Cp == 128; otherwise
    # two accumulating K=Cp matmuls (no concat copy) are strictly better.
    fuse_k = (Cp == 128) and _mxu_depth_256(kind)

    # NCHW -> NHWC (PyTorch-boundary transpose), bf16 MXU operands, and a
    # 1-pixel zero pad at ORIGINAL resolution (exactly equivalent to 'same'
    # padding on the nearest-2x upsampled map).
    x = jnp.transpose(x_nchw, (0, 2, 3, 1)).astype(jnp.bfloat16)
    xpad = jnp.pad(x, ((0, 0), (1, 1), (1, Wpad - (W + 1)), (0, Cp - C)))

    wphase = _phase_weights(weight, Cp)                             # (2,2,Cp,4Cp) bf16
    bpad = jnp.pad(bias.astype(jnp.float32), (0, Cp - C)).reshape(1, Cp)

    kernel = functools.partial(_upsample_conv_kernel, fuse_k=fuse_k)

    out6 = pl.pallas_call(
        kernel,
        out_shape=jax.ShapeDtypeStruct((B, 2, 2, H, W, Cp), out_dtype),
        grid_spec=pltpu.PrefetchScalarGridSpec(
            num_scalar_prefetch=0,
            grid=(B, nt),
            in_specs=[
                # main row block of the padded original-resolution input
                pl.BlockSpec((1, TH, Wpad, Cp), lambda b, t: (b, t, 0, 0)),
                # two 1-row bottom-halo blocks (same array; size-1 row block makes
                # the block index an element index)
                pl.BlockSpec((1, 1, Wpad, Cp), lambda b, t: (b, (t + 1) * TH, 0, 0)),
                pl.BlockSpec((1, 1, Wpad, Cp), lambda b, t: (b, (t + 1) * TH + 1, 0, 0)),
                # phase-folded weights & bias: constant index -> stay resident.
                # TODO(synk): single-buffer these with pipeline_mode=pl.Buffered(1)
                # once guaranteed supported; the tile picker accounts 2 buffers.
                pl.BlockSpec((2, 2, Cp, 4 * Cp), lambda b, t: (0, 0, 0, 0)),
                pl.BlockSpec((1, Cp), lambda b, t: (0, 0)),
            ],
            out_specs=pl.BlockSpec((1, 2, 2, TH, W, Cp),
                                   lambda b, t: (b, 0, 0, t, 0, 0)),
            scratch_shapes=[pltpu.VMEM((min(TH, 2) + 2, Wpad, Cp), jnp.bfloat16)],
        ),
        compiler_params=pltpu.CompilerParams(
            dimension_semantics=("parallel", "parallel"),
            vmem_limit_bytes=int(vmem_limit)),
    )(xpad, xpad, xpad, wphase, bpad)

    # Drop the lane padding BEFORE un-phasing; the single transpose both
    # un-phases the (2,2) subpixels and converts NHWC -> NCHW.
    y = jnp.transpose(out6[..., :C], (0, 5, 3, 1, 4, 2))
    return y.reshape(B, C, 2 * H, 2 * W)


# ----------------------------------------------------------------------------
# Pure-JAX reference + self-test
# ----------------------------------------------------------------------------
def _reference(x_nchw, weight, bias):
    xu = jnp.repeat(jnp.repeat(x_nchw, 2, axis=2), 2, axis=3)
    y = jax.lax.conv_general_dilated(
        xu, weight, window_strides=(1, 1), padding=((1, 1), (1, 1)),
        dimension_numbers=("NCHW", "OIHW", "NCHW"))
    return y + bias[None, :, None, None]


if __name__ == "__main__":
    key = jax.random.PRNGKey(0)
    kx, kw, kb = jax.random.split(key, 3)

    B, C, H, W = 2, 4, 16, 16
    x = jax.random.normal(kx, (B, C, H, W), dtype=jnp.float32)

    # Deterministic synthetic Conv2d(in=C, out=C, k=3) params (kaiming-uniform-ish bound).
    fan_in = C * 3 * 3
    bound = 1.0 / (fan_in ** 0.5)
    weight = jax.random.uniform(kw, (C, C, 3, 3), jnp.float32, -bound, bound)
    bias = jax.random.uniform(kb, (C,), jnp.float32, -bound, bound)

    ref = _reference(x, weight, bias)
    tol = dict(atol=3e-2, rtol=3e-2)        # bf16 MXU operands, f32 accumulation

    # Multi-row-tile path (grid = (2,2): exercises the halo / boundary split) ...
    out_tiled = jax.block_until_ready(
        upsample_forward(x, weight, bias, with_conv=True, row_tile=8))
    # ... auto-chosen tile path ...
    out_auto = jax.block_until_ready(
        upsample_forward(x, weight, bias, with_conv=True))
    # ... B=1 path (forces >=2 row tiles for the 2-TC case) ...
    out_b1 = jax.block_until_ready(
        upsample_forward(x[:1], weight, bias, with_conv=True))
    # ... and the conv-less path.
    out_nn = jax.block_until_ready(
        upsample_forward(x, weight, bias, with_conv=False))

    assert out_tiled.shape == (B, C, 2 * H, 2 * W), out_tiled.shape
    assert jnp.allclose(out_tiled, ref, **tol), \
        float(jnp.max(jnp.abs(out_tiled - ref)))
    assert jnp.allclose(out_auto, ref, **tol), \
        float(jnp.max(jnp.abs(out_auto - ref)))
    assert jnp.allclose(out_b1, ref[:1], **tol), \
        float(jnp.max(jnp.abs(out_b1 - ref[:1])))
    ref_nn = jnp.repeat(jnp.repeat(x, 2, axis=2), 2, axis=3)
    assert jnp.allclose(out_nn, ref_nn)

    print("KERNEL_OK")
</pallas_src>

<mosaic_0001>
module attributes {stable_mosaic.version = 11 : i64} {
  func.func @_upsample_conv_kernel(%arg0: i32, %arg1: i32, %arg2: memref<1x8x24x128xbf16, #tpu.memory_space<vmem>>, %arg3: memref<1x1x24x128xbf16, #tpu.memory_space<vmem>>, %arg4: memref<1x1x24x128xbf16, #tpu.memory_space<vmem>>, %arg5: memref<2x2x128x512xbf16, #tpu.memory_space<vmem>>, %arg6: memref<1x128xf32, #tpu.memory_space<vmem>>, %arg7: memref<1x2x2x8x16x128xf32, #tpu.memory_space<vmem>>, %arg8: memref<4x24x128xbf16, #tpu.memory_space<vmem>>) attributes {dimension_semantics = [#tpu.dimension_semantics<parallel>, #tpu.dimension_semantics<parallel>], iteration_bounds = array<i64: 2, 2>, scalar_prefetch = 0 : i64, scratch_operands = 1 : i64, tpu.core_type = #tpu.core_type<tc>, window_params = [{transform_indices = @transform_0, window_bounds = array<i64: 1, 8, 24, 128>}, {transform_indices = @transform_1, window_bounds = array<i64: 1, 1, 24, 128>}, {transform_indices = @transform_2, window_bounds = array<i64: 1, 1, 24, 128>}, {pipeline_mode = #tpu.pipeline_mode<synchronous>, transform_indices = @transform_3, window_bounds = array<i64: 2, 2, 128, 512>}, {pipeline_mode = #tpu.pipeline_mode<synchronous>, transform_indices = @transform_4, window_bounds = array<i64: 1, 128>}, {transform_indices = @transform_5, window_bounds = array<i64: 1, 2, 2, 8, 16, 128>}]} {
    %c0 = arith.constant 0 : index
    %c6 = arith.constant 6 : index
    %c0_0 = arith.constant 0 : index
    %c0_1 = arith.constant 0 : index
    %0 = vector.load %arg2[%c0, %c6, %c0_0, %c0_1] : memref<1x8x24x128xbf16, #tpu.memory_space<vmem>>, vector<1x2x24x128xbf16>
    %1 = vector.shape_cast %0 : vector<1x2x24x128xbf16> to vector<2x24x128xbf16>
    %c0_2 = arith.constant 0 : index
    %c0_3 = arith.constant 0 : index
    %c0_4 = arith.constant 0 : index
    %2 = vector.load %arg8[%c0_2, %c0_3, %c0_4] : memref<4x24x128xbf16, #tpu.memory_space<vmem>>, vector<2x24x128xbf16>
    tpu.vector_store %arg8[%c0_2, %c0_3, %c0_4], %1 {strides = array<i32>} : memref<4x24x128xbf16, #tpu.memory_space<vmem>>, vector<2x24x128xbf16>,
    %c0_5 = arith.constant 0 : index
    %c0_6 = arith.constant 0 : index
    %c0_7 = arith.constant 0 : index
    %c0_8 = arith.constant 0 : index
    %3 = vector.load %arg3[%c0_5, %c0_6, %c0_7, %c0_8] : memref<1x1x24x128xbf16, #tpu.memory_space<vmem>>, vector<1x1x24x128xbf16>
    %4 = vector.shape_cast %3 : vector<1x1x24x128xbf16> to vector<24x128xbf16>
    %c2 = arith.constant 2 : index
    %c0_9 = arith.constant 0 : index
    %c0_10 = arith.constant 0 : index
    %5 = vector.load %arg8[%c2, %c0_9, %c0_10] : memref<4x24x128xbf16, #tpu.memory_space<vmem>>, vector<1x24x128xbf16>
    %6 = vector.shape_cast %5 : vector<1x24x128xbf16> to vector<24x128xbf16>
    %7 = vector.shape_cast %4 : vector<24x128xbf16> to vector<1x24x128xbf16>
    tpu.vector_store %arg8[%c2, %c0_9, %c0_10], %7 {strides = array<i32>} : memref<4x24x128xbf16, #tpu.memory_space<vmem>>, vector<1x24x128xbf16>,
    %c0_11 = arith.constant 0 : index
    %c0_12 = arith.constant 0 : index
    %c0_13 = arith.constant 0 : index
    %c0_14 = arith.constant 0 : index
    %8 = vector.load %arg4[%c0_11, %c0_12, %c0_13, %c0_14] : memref<1x1x24x128xbf16, #tpu.memory_space<vmem>>, vector<1x1x24x128xbf16>
    %9 = vector.shape_cast %8 : vector<1x1x24x128xbf16> to vector<24x128xbf16>
    %c3 = arith.constant 3 : index
    %c0_15 = arith.constant 0 : index
    %c0_16 = arith.constant 0 : index
    %10 = vector.load %arg8[%c3, %c0_15, %c0_16] : memref<4x24x128xbf16, #tpu.memory_space<vmem>>, vector<1x24x128xbf16>
    %11 = vector.shape_cast %10 : vector<1x24x128xbf16> to vector<24x128xbf16>
    %12 = vector.shape_cast %9 : vector<24x128xbf16> to vector<1x24x128xbf16>
    tpu.vector_store %arg8[%c3, %c0_15, %c0_16], %12 {strides = array<i32>} : memref<4x24x128xbf16, #tpu.memory_space<vmem>>, vector<1x24x128xbf16>,
    %c0_17 = arith.constant 0 : index
    %c0_18 = arith.constant 0 : index
    %13 = vector.load %arg6[%c0_17, %c0_18] : memref<1x128xf32, #tpu.memory_space<vmem>>, vector<1x128xf32>
    %14 = vector.shape_cast %13 : vector<1x128xf32> to vector<128xf32>
    %c0_19 = arith.constant 0 : index
    %c0_20 = arith.constant 0 : index
    %c0_21 = arith.constant 0 : index
    %c0_22 = arith.constant 0 : index
    %15 = vector.load %arg2[%c0_19, %c0_20, %c0_21, %c0_22] : memref<1x8x24x128xbf16, #tpu.memory_space<vmem>>, vector<1x7x24x128xbf16>
    %16 = vector.shape_cast %15 : vector<1x7x24x128xbf16> to vector<7x24x128xbf16>
    %c0_23 = arith.constant 0 : index
    %c1 = arith.constant 1 : index
    %c0_24 = arith.constant 0 : index
    %c0_25 = arith.constant 0 : index
    %17 = vector.load %arg2[%c0_23, %c1, %c0_24, %c0_25] : memref<1x8x24x128xbf16, #tpu.memory_space<vmem>>, vector<1x7x24x128xbf16>
    %18 = vector.shape_cast %17 : vector<1x7x24x128xbf16> to vector<7x24x128xbf16>
    %19 = tpu.concatenate %16, %18 in 2 : vector<7x24x128xbf16>, vector<7x24x128xbf16> -> vector<7x24x256xbf16>
    %20 = vector.shape_cast %19 : vector<7x24x256xbf16> to vector<168x256xbf16>
    %c0_26 = arith.constant 0 : index
    %c0_27 = arith.constant 0 : index
    %c0_28 = arith.constant 0 : index
    %c0_29 = arith.constant 0 : index
    %21 = vector.load %arg5[%c0_26, %c0_27, %c0_28, %c0_29] : memref<2x2x128x512xbf16, #tpu.memory_space<vmem>>, vector<1x2x128x512xbf16>
    %22 = vector.shape_cast %21 : vector<1x2x128x512xbf16> to vector<2x128x512xbf16>
    %23 = vector.shape_cast %22 : vector<2x128x512xbf16> to vector<256x512xbf16>
    %cst = arith.constant dense<0.000000e+00> : vector<168x512xf32>
    %24 = tpu.matmul %20, %23, %cst {dimension_numbers = #tpu.dot_dimension_numbers<[1], [0], [0], [1], [0, 0, 1, 1], [], []>} : vector<168x256xbf16>, vector<256x512xbf16>, vector<168x512xf32> -> vector<168x512xf32>
    %25 = vector.shape_cast %24 : vector<168x512xf32> to vector<7x24x512xf32>
    %26 = vector.extract_strided_slice %25 {offsets = [0, 0, 0], sizes = [7, 16, 128], strides = [1, 1, 1]} : vector<7x24x512xf32> to vector<7x16x128xf32>
    %27 = vector.extract_strided_slice %25 {offsets = [0, 1, 128], sizes = [7, 16, 128], strides = [1, 1, 1]} : vector<7x24x512xf32> to vector<7x16x128xf32>
    %28 = arith.addf %26, %27 : vector<7x16x128xf32>
    %29 = vector.shape_cast %14 : vector<128xf32> to vector<1x1x128xf32>
    %30 = vector.broadcast %29 : vector<1x1x128xf32> to vector<7x16x128xf32>
    %31 = arith.addf %28, %30 : vector<7x16x128xf32>
    %c0_30 = arith.constant 0 : index
    %c0_31 = arith.constant 0 : index
    %c0_32 = arith.constant 0 : index
    %c0_33 = arith.constant 0 : index
    %c0_34 = arith.constant 0 : index
    %c0_35 = arith.constant 0 : index
    %32 = vector.load %arg7[%c0_30, %c0_31, %c0_32, %c0_33, %c0_34, %c0_35] : memref<1x2x2x8x16x128xf32, #tpu.memory_space<vmem>>, vector<1x1x1x7x16x128xf32>
    %33 = vector.shape_cast %32 : vector<1x1x1x7x16x128xf32> to vector<7x16x128xf32>
    %34 = vector.shape_cast %31 : vector<7x16x128xf32> to vector<1x1x1x7x16x128xf32>
    tpu.vector_store %arg7[%c0_30, %c0_31, %c0_32, %c0_33, %c0_34, %c0_35], %34 {strides = array<i32>} : memref<1x2x2x8x16x128xf32, #tpu.memory_space<vmem>>, vector<1x1x1x7x16x128xf32>,
    %35 = vector.extract_strided_slice %25 {offsets = [0, 1, 256], sizes = [7, 16, 128], strides = [1, 1, 1]} : vector<7x24x512xf32> to vector<7x16x128xf32>
    %36 = vector.extract_strided_slice %25 {offsets = [0, 2, 384], sizes = [7, 16, 128], strides = [1, 1, 1]} : vector<7x24x512xf32> to vector<7x16x128xf32>
    %37 = arith.addf %35, %36 : vector<7x16x128xf32>
    %38 = vector.shape_cast %14 : vector<128xf32> to vector<1x1x128xf32>
    %39 = vector.broadcast %38 : vector<1x1x128xf32> to vector<7x16x128xf32>
    %40 = arith.addf %37, %39 : vector<7x16x128xf32>
    %c0_36 = arith.constant 0 : index
    %c0_37 = arith.constant 0 : index
    %c1_38 = arith.constant 1 : index
    %c0_39 = arith.constant 0 : index
    %c0_40 = arith.constant 0 : index
    %c0_41 = arith.constant 0 : index
    %41 = vector.load %arg7[%c0_36, %c0_37, %c1_38, %c0_39, %c0_40, %c0_41] : memref<1x2x2x8x16x128xf32, #tpu.memory_space<vmem>>, vector<1x1x1x7x16x128xf32>
    %42 = vector.shape_cast %41 : vector<1x1x1x7x16x128xf32> to vector<7x16x128xf32>
    %43 = vector.shape_cast %40 : vector<7x16x128xf32> to vector<1x1x1x7x16x128xf32>
    tpu.vector_store %arg7[%c0_36, %c0_37, %c1_38, %c0_39, %c0_40, %c0_41], %43 {strides = array<i32>} : memref<1x2x2x8x16x128xf32, #tpu.memory_space<vmem>>, vector<1x1x1x7x16x128xf32>,
    %c1_42 = arith.constant 1 : index
    %c0_43 = arith.constant 0 : index
    %c0_44 = arith.constant 0 : index
    %44 = vector.load %arg8[%c1_42, %c0_43, %c0_44] : memref<4x24x128xbf16, #tpu.memory_space<vmem>>, vector<1x24x128xbf16>
    %c2_45 = arith.constant 2 : index
    %c0_46 = arith.constant 0 : index
    %c0_47 = arith.constant 0 : index
    %45 = vector.load %arg8[%c2_45, %c0_46, %c0_47] : memref<4x24x128xbf16, #tpu.memory_space<vmem>>, vector<1x24x128xbf16>
    %46 = vector.shape_cast %44 : vector<1x24x128xbf16> to vector<24x128xbf16>
    %c0_48 = arith.constant 0 : index
    %c0_49 = arith.constant 0 : index
    %c0_50 = arith.constant 0 : index
    %c0_51 = arith.constant 0 : index
    %47 = vector.load %arg5[%c0_48, %c0_49, %c0_50, %c0_51] : memref<2x2x128x512xbf16, #tpu.memory_space<vmem>>, vector<1x1x128x512xbf16>
    %48 = vector.shape_cast %47 : vector<1x1x128x512xbf16> to vector<128x512xbf16>
    %cst_52 = arith.constant dense<0.000000e+00> : vector<24x512xf32>
    %49 = tpu.matmul %46, %48, %cst_52 {dimension_numbers = #tpu.dot_dimension_numbers<[1], [0], [0], [1], [0, 0, 1, 1], [], []>} : vector<24x128xbf16>, vector<128x512xbf16>, vector<24x512xf32> -> vector<24x512xf32>
    %50 = vector.shape_cast %45 : vector<1x24x128xbf16> to vector<24x128xbf16>
    %c0_53 = arith.constant 0 : index
    %c1_54 = arith.constant 1 : index
    %c0_55 = arith.constant 0 : index
    %c0_56 = arith.constant 0 : index
    %51 = vector.load %arg5[%c0_53, %c1_54, %c0_55, %c0_56] : memref<2x2x128x512xbf16, #tpu.memory_space<vmem>>, vector<1x1x128x512xbf16>
    %52 = vector.shape_cast %51 : vector<1x1x128x512xbf16> to vector<128x512xbf16>
    %cst_57 = arith.constant dense<0.000000e+00> : vector<24x512xf32>
    %53 = tpu.matmul %50, %52, %cst_57 {dimension_numbers = #tpu.dot_dimension_numbers<[1], [0], [0], [1], [0, 0, 1, 1], [], []>} : vector<24x128xbf16>, vector<128x512xbf16>, vector<24x512xf32> -> vector<24x512xf32>
    %54 = arith.addf %49, %53 : vector<24x512xf32>
    %55 = vector.shape_cast %54 : vector<24x512xf32> to vector<1x24x512xf32>
    %56 = vector.extract_strided_slice %55 {offsets = [0, 0, 0], sizes = [1, 16, 128], strides = [1, 1, 1]} : vector<1x24x512xf32> to vector<1x16x128xf32>
    %57 = vector.extract_strided_slice %55 {offsets = [0, 1, 128], sizes = [1, 16, 128], strides = [1, 1, 1]} : vector<1x24x512xf32> to vector<1x16x128xf32>
    %58 = arith.addf %56, %57 : vector<1x16x128xf32>
    %59 = vector.shape_cast %14 : vector<128xf32> to vector<1x1x128xf32>
    %60 = vector.broadcast %59 : vector<1x1x128xf32> to vector<1x16x128xf32>
    %61 = arith.addf %58, %60 : vector<1x16x128xf32>
    %c0_58 = arith.constant 0 : index
    %c0_59 = arith.constant 0 : index
    %c0_60 = arith.constant 0 : index
    %c7 = arith.constant 7 : index
    %c0_61 = arith.constant 0 : index
    %c0_62 = arith.constant 0 : index
    %62 = vector.load %arg7[%c0_58, %c0_59, %c0_60, %c7, %c0_61, %c0_62] : memref<1x2x2x8x16x128xf32, #tpu.memory_space<vmem>>, vector<1x1x1x1x16x128xf32>
    %63 = vector.shape_cast %62 : vector<1x1x1x1x16x128xf32> to vector<1x16x128xf32>
    %64 = vector.shape_cast %61 : vector<1x16x128xf32> to vector<1x1x1x1x16x128xf32>
    tpu.vector_store %arg7[%c0_58, %c0_59, %c0_60, %c7, %c0_61, %c0_62], %64 {strides = array<i32>} : memref<1x2x2x8x16x128xf32, #tpu.memory_space<vmem>>, vector<1x1x1x1x16x128xf32>,
    %65 = vector.extract_strided_slice %55 {offsets = [0, 1, 256], sizes = [1, 16, 128], strides = [1, 1, 1]} : vector<1x24x512xf32> to vector<1x16x128xf32>
    %66 = vector.extract_strided_slice %55 {offsets = [0, 2, 384], sizes = [1, 16, 128], strides = [1, 1, 1]} : vector<1x24x512xf32> to vector<1x16x128xf32>
    %67 = arith.addf %65, %66 : vector<1x16x128xf32>
    %68 = vector.shape_cast %14 : vector<128xf32> to vector<1x1x128xf32>
    %69 = vector.broadcast %68 : vector<1x1x128xf32> to vector<1x16x128xf32>
    %70 = arith.addf %67, %69 : vector<1x16x128xf32>
    %c0_63 = arith.constant 0 : index
    %c0_64 = arith.constant 0 : index
    %c1_65 = arith.constant 1 : index
    %c7_66 = arith.constant 7 : index
    %c0_67 = arith.constant 0 : index
    %c0_68 = arith.constant 0 : index
    %71 = vector.load %arg7[%c0_63, %c0_64, %c1_65, %c7_66, %c0_67, %c0_68] : memref<1x2x2x8x16x128xf32, #tpu.memory_space<vmem>>, vector<1x1x1x1x16x128xf32>
    %72 = vector.shape_cast %71 : vector<1x1x1x1x16x128xf32> to vector<1x16x128xf32>
    %73 = vector.shape_cast %70 : vector<1x16x128xf32> to vector<1x1x1x1x16x128xf32>
    tpu.vector_store %arg7[%c0_63, %c0_64, %c1_65, %c7_66, %c0_67, %c0_68], %73 {strides = array<i32>} : memref<1x2x2x8x16x128xf32, #tpu.memory_space<vmem>>, vector<1x1x1x1x16x128xf32>,
    %c0_69 = arith.constant 0 : index
    %c1_70 = arith.constant 1 : index
    %c0_71 = arith.constant 0 : index
    %c0_72 = arith.constant 0 : index
    %74 = vector.load %arg2[%c0_69, %c1_70, %c0_71, %c0_72] : memref<1x8x24x128xbf16, #tpu.memory_space<vmem>>, vector<1x6x24x128xbf16>
    %75 = vector.shape_cast %74 : vector<1x6x24x128xbf16> to vector<6x24x128xbf16>
    %c0_73 = arith.constant 0 : index
    %c2_74 = arith.constant 2 : index
    %c0_75 = arith.constant 0 : index
    %c0_76 = arith.constant 0 : index
    %76 = vector.load %arg2[%c0_73, %c2_74, %c0_75, %c0_76] : memref<1x8x24x128xbf16, #tpu.memory_space<vmem>>, vector<1x6x24x128xbf16>
    %77 = vector.shape_cast %76 : vector<1x6x24x128xbf16> to vector<6x24x128xbf16>
    %78 = tpu.concatenate %75, %77 in 2 : vector<6x24x128xbf16>, vector<6x24x128xbf16> -> vector<6x24x256xbf16>
    %79 = vector.shape_cast %78 : vector<6x24x256xbf16> to vector<144x256xbf16>
    %c1_77 = arith.constant 1 : index
    %c0_78 = arith.constant 0 : index
    %c0_79 = arith.constant 0 : index
    %c0_80 = arith.constant 0 : index
    %80 = vector.load %arg5[%c1_77, %c0_78, %c0_79, %c0_80] : memref<2x2x128x512xbf16, #tpu.memory_space<vmem>>, vector<1x2x128x512xbf16>
    %81 = vector.shape_cast %80 : vector<1x2x128x512xbf16> to vector<2x128x512xbf16>
    %82 = vector.shape_cast %81 : vector<2x128x512xbf16> to vector<256x512xbf16>
    %cst_81 = arith.constant dense<0.000000e+00> : vector<144x512xf32>
    %83 = tpu.matmul %79, %82, %cst_81 {dimension_numbers = #tpu.dot_dimension_numbers<[1], [0], [0], [1], [0, 0, 1, 1], [], []>} : vector<144x256xbf16>, vector<256x512xbf16>, vector<144x512xf32> -> vector<144x512xf32>
    %84 = vector.shape_cast %83 : vector<144x512xf32> to vector<6x24x512xf32>
    %85 = vector.extract_strided_slice %84 {offsets = [0, 0, 0], sizes = [6, 16, 128], strides = [1, 1, 1]} : vector<6x24x512xf32> to vector<6x16x128xf32>
    %86 = vector.extract_strided_slice %84 {offsets = [0, 1, 128], sizes = [6, 16, 128], strides = [1, 1, 1]} : vector<6x24x512xf32> to vector<6x16x128xf32>
    %87 = arith.addf %85, %86 : vector<6x16x128xf32>
    %88 = vector.shape_cast %14 : vector<128xf32> to vector<1x1x128xf32>
    %89 = vector.broadcast %88 : vector<1x1x128xf32> to vector<6x16x128xf32>
    %90 = arith.addf %87, %89 : vector<6x16x128xf32>
    %c0_82 = arith.constant 0 : index
    %c1_83 = arith.constant 1 : index
    %c0_84 = arith.constant 0 : index
    %c0_85 = arith.constant 0 : index
    %c0_86 = arith.constant 0 : index
    %c0_87 = arith.constant 0 : index
    %91 = vector.load %arg7[%c0_82, %c1_83, %c0_84, %c0_85, %c0_86, %c0_87] : memref<1x2x2x8x16x128xf32, #tpu.memory_space<vmem>>, vector<1x1x1x6x16x128xf32>
    %92 = vector.shape_cast %91 : vector<1x1x1x6x16x128xf32> to vector<6x16x128xf32>
    %93 = vector.shape_cast %90 : vector<6x16x128xf32> to vector<1x1x1x6x16x128xf32>
    tpu.vector_store %arg7[%c0_82, %c1_83, %c0_84, %c0_85, %c0_86, %c0_87], %93 {strides = array<i32>} : memref<1x2x2x8x16x128xf32, #tpu.memory_space<vmem>>, vector<1x1x1x6x16x128xf32>,
    %94 = vector.extract_strided_slice %84 {offsets = [0, 1, 256], sizes = [6, 16, 128], strides = [1, 1, 1]} : vector<6x24x512xf32> to vector<6x16x128xf32>
    %95 = vector.extract_strided_slice %84 {offsets = [0, 2, 384], sizes = [6, 16, 128], strides = [1, 1, 1]} : vector<6x24x512xf32> to vector<6x16x128xf32>
    %96 = arith.addf %94, %95 : vector<6x16x128xf32>
    %97 = vector.shape_cast %14 : vector<128xf32> to vector<1x1x128xf32>
    %98 = vector.broadcast %97 : vector<1x1x128xf32> to vector<6x16x128xf32>
    %99 = arith.addf %96, %98 : vector<6x16x128xf32>
    %c0_88 = arith.constant 0 : index
    %c1_89 = arith.constant 1 : index
    %c1_90 = arith.constant 1 : index
    %c0_91 = arith.constant 0 : index
    %c0_92 = arith.constant 0 : index
    %c0_93 = arith.constant 0 : index
    %100 = vector.load %arg7[%c0_88, %c1_89, %c1_90, %c0_91, %c0_92, %c0_93] : memref<1x2x2x8x16x128xf32, #tpu.memory_space<vmem>>, vector<1x1x1x6x16x128xf32>
    %101 = vector.shape_cast %100 : vector<1x1x1x6x16x128xf32> to vector<6x16x128xf32>
    %102 = vector.shape_cast %99 : vector<6x16x128xf32> to vector<1x1x1x6x16x128xf32>
    tpu.vector_store %arg7[%c0_88, %c1_89, %c1_90, %c0_91, %c0_92, %c0_93], %102 {strides = array<i32>} : memref<1x2x2x8x16x128xf32, #tpu.memory_space<vmem>>, vector<1x1x1x6x16x128xf32>,
    %c1_94 = arith.constant 1 : index
    %c0_95 = arith.constant 0 : index
    %c0_96 = arith.constant 0 : index
    %103 = vector.load %arg8[%c1_94, %c0_95, %c0_96] : memref<4x24x128xbf16, #tpu.memory_space<vmem>>, vector<2x24x128xbf16>
    %c2_97 = arith.constant 2 : index
    %c0_98 = arith.constant 0 : index
    %c0_99 = arith.constant 0 : index
    %104 = vector.load %arg8[%c2_97, %c0_98, %c0_99] : memref<4x24x128xbf16, #tpu.memory_space<vmem>>, vector<2x24x128xbf16>
    %105 = vector.shape_cast %103 : vector<2x24x128xbf16> to vector<48x128xbf16>
    %c1_100 = arith.constant 1 : index
    %c0_101 = arith.constant 0 : index
    %c0_102 = arith.constant 0 : index
    %c0_103 = arith.constant 0 : index
    %106 = vector.load %arg5[%c1_100, %c0_101, %c0_102, %c0_103] : memref<2x2x128x512xbf16, #tpu.memory_space<vmem>>, vector<1x1x128x512xbf16>
    %107 = vector.shape_cast %106 : vector<1x1x128x512xbf16> to vector<128x512xbf16>
    %cst_104 = arith.constant dense<0.000000e+00> : vector<48x512xf32>
    %108 = tpu.matmul %105, %107, %cst_104 {dimension_numbers = #tpu.dot_dimension_numbers<[1], [0], [0], [1], [0, 0, 1, 1], [], []>} : vector<48x128xbf16>, vector<128x512xbf16>, vector<48x512xf32> -> vector<48x512xf32>
    %109 = vector.shape_cast %104 : vector<2x24x128xbf16> to vector<48x128xbf16>
    %c1_105 = arith.constant 1 : index
    %c1_106 = arith.constant 1 : index
    %c0_107 = arith.constant 0 : index
    %c0_108 = arith.constant 0 : index
    %110 = vector.load %arg5[%c1_105, %c1_106, %c0_107, %c0_108] : memref<2x2x128x512xbf16, #tpu.memory_space<vmem>>, vector<1x1x128x512xbf16>
    %111 = vector.shape_cast %110 : vector<1x1x128x512xbf16> to vector<128x512xbf16>
    %cst_109 = arith.constant dense<0.000000e+00> : vector<48x512xf32>
    %112 = tpu.matmul %109, %111, %cst_109 {dimension_numbers = #tpu.dot_dimension_numbers<[1], [0], [0], [1], [0, 0, 1, 1], [], []>} : vector<48x128xbf16>, vector<128x512xbf16>, vector<48x512xf32> -> vector<48x512xf32>
    %113 = arith.addf %108, %112 : vector<48x512xf32>
    %114 = vector.shape_cast %113 : vector<48x512xf32> to vector<2x24x512xf32>
    %115 = vector.extract_strided_slice %114 {offsets = [0, 0, 0], sizes = [2, 16, 128], strides = [1, 1, 1]} : vector<2x24x512xf32> to vector<2x16x128xf32>
    %116 = vector.extract_strided_slice %114 {offsets = [0, 1, 128], sizes = [2, 16, 128], strides = [1, 1, 1]} : vector<2x24x512xf32> to vector<2x16x128xf32>
    %117 = arith.addf %115, %116 : vector<2x16x128xf32>
    %118 = vector.shape_cast %14 : vector<128xf32> to vector<1x1x128xf32>
    %119 = vector.broadcast %118 : vector<1x1x128xf32> to vector<2x16x128xf32>
    %120 = arith.addf %117, %119 : vector<2x16x128xf32>
    %c0_110 = arith.constant 0 : index
    %c1_111 = arith.constant 1 : index
    %c0_112 = arith.constant 0 : index
    %c6_113 = arith.constant 6 : index
    %c0_114 = arith.constant 0 : index
    %c0_115 = arith.constant 0 : index
    %121 = vector.load %arg7[%c0_110, %c1_111, %c0_112, %c6_113, %c0_114, %c0_115] : memref<1x2x2x8x16x128xf32, #tpu.memory_space<vmem>>, vector<1x1x1x2x16x128xf32>
    %122 = vector.shape_cast %121 : vector<1x1x1x2x16x128xf32> to vector<2x16x128xf32>
    %123 = vector.shape_cast %120 : vector<2x16x128xf32> to vector<1x1x1x2x16x128xf32>
    tpu.vector_store %arg7[%c0_110, %c1_111, %c0_112, %c6_113, %c0_114, %c0_115], %123 {strides = array<i32>} : memref<1x2x2x8x16x128xf32, #tpu.memory_space<vmem>>, vector<1x1x1x2x16x128xf32>,
    %124 = vector.extract_strided_slice %114 {offsets = [0, 1, 256], sizes = [2, 16, 128], strides = [1, 1, 1]} : vector<2x24x512xf32> to vector<2x16x128xf32>
    %125 = vector.extract_strided_slice %114 {offsets = [0, 2, 384], sizes = [2, 16, 128], strides = [1, 1, 1]} : vector<2x24x512xf32> to vector<2x16x128xf32>
    %126 = arith.addf %124, %125 : vector<2x16x128xf32>
    %127 = vector.shape_cast %14 : vector<128xf32> to vector<1x1x128xf32>
    %128 = vector.broadcast %127 : vector<1x1x128xf32> to vector<2x16x128xf32>
    %129 = arith.addf %126, %128 : vector<2x16x128xf32>
    %c0_116 = arith.constant 0 : index
    %c1_117 = arith.constant 1 : index
    %c1_118 = arith.constant 1 : index
    %c6_119 = arith.constant 6 : index
    %c0_120 = arith.constant 0 : index
    %c0_121 = arith.constant 0 : index
    %130 = vector.load %arg7[%c0_116, %c1_117, %c1_118, %c6_119, %c0_120, %c0_121] : memref<1x2x2x8x16x128xf32, #tpu.memory_space<vmem>>, vector<1x1x1x2x16x128xf32>
    %131 = vector.shape_cast %130 : vector<1x1x1x2x16x128xf32> to vector<2x16x128xf32>
    %132 = vector.shape_cast %129 : vector<2x16x128xf32> to vector<1x1x1x2x16x128xf32>
    tpu.vector_store %arg7[%c0_116, %c1_117, %c1_118, %c6_119, %c0_120, %c0_121], %132 {strides = array<i32>} : memref<1x2x2x8x16x128xf32, #tpu.memory_space<vmem>>, vector<1x1x1x2x16x128xf32>,
    return
  }
  func.func @transform_0(%arg0: i32, %arg1: i32) -> (i32, i32, i32, i32) {
    %c0_i32 = arith.constant 0 : i32
    %c0_i32_0 = arith.constant 0 : i32
    %c0_i32_1 = arith.constant 0 : i32
    return %arg0, %arg1, %c0_i32, %c0_i32_0 : i32, i32, i32, i32
  }
  func.func @transform_1(%arg0: i32, %arg1: i32) -> (i32, i32, i32, i32) {
    %c1_i32 = arith.constant 1 : i32
    %0 = arith.addi %arg1, %c1_i32 : i32
    %c8_i32 = arith.constant 8 : i32
    %1 = arith.muli %0, %c8_i32 : i32
    %c0_i32 = arith.constant 0 : i32
    %c0_i32_0 = arith.constant 0 : i32
    %c0_i32_1 = arith.constant 0 : i32
    return %arg0, %1, %c0_i32, %c0_i32_0 : i32, i32, i32, i32
  }
  func.func @transform_2(%arg0: i32, %arg1: i32) -> (i32, i32, i32, i32) {
    %c1_i32 = arith.constant 1 : i32
    %0 = arith.addi %arg1, %c1_i32 : i32
    %c8_i32 = arith.constant 8 : i32
    %1 = arith.muli %0, %c8_i32 : i32
    %c1_i32_0 = arith.constant 1 : i32
    %2 = arith.addi %1, %c1_i32_0 : i32
    %c0_i32 = arith.constant 0 : i32
    %c0_i32_1 = arith.constant 0 : i32
    %c0_i32_2 = arith.constant 0 : i32
    return %arg0, %2, %c0_i32, %c0_i32_1 : i32, i32, i32, i32
  }
  func.func @transform_3(%arg0: i32, %arg1: i32) -> (i32, i32, i32, i32) {
    %c0_i32 = arith.constant 0 : i32
    %c0_i32_0 = arith.constant 0 : i32
    %c0_i32_1 = arith.constant 0 : i32
    %c0_i32_2 = arith.constant 0 : i32
    %c0_i32_3 = arith.constant 0 : i32
    return %c0_i32, %c0_i32_0, %c0_i32_1, %c0_i32_2 : i32, i32, i32, i32
  }
  func.func @transform_4(%arg0: i32, %arg1: i32) -> (i32, i32) {
    %c0_i32 = arith.constant 0 : i32
    %c0_i32_0 = arith.constant 0 : i32
    %c0_i32_1 = arith.constant 0 : i32
    return %c0_i32, %c0_i32_0 : i32, i32
  }
  func.func @transform_5(%arg0: i32, %arg1: i32) -> (i32, i32, i32, i32, i32, i32) {
    %c0_i32 = arith.constant 0 : i32
    %c0_i32_0 = arith.constant 0 : i32
    %c0_i32_1 = arith.constant 0 : i32
    %c0_i32_2 = arith.constant 0 : i32
    %c0_i32_3 = arith.constant 0 : i32
    return %arg0, %c0_i32, %c0_i32_0, %arg1, %c0_i32_1, %c0_i32_2 : i32, i32, i32, i32, i32, i32
  }
}

</mosaic_0001>

<bundles_post_ra>
// kernel: tpu_custom_call.1
= control target key start
LH: loop header
LB: loop body
LE: loop exit
PB: predicated region body
PF: predicated region fallthrough
CT: control target
= control target key end

     0   :  { %s7526_s0 = inlined_call_operand.hbm [shape: bf16[2,18,24,128], index: 0, kind: input, shape index: {}]   ;;  %s7527_s1 = inlined_call_operand.hbm [shape: bf16[2,18,24,128], index: 1, kind: input, shape index: {}]   ;;  %s7528_s2 = inlined_call_operand.hbm [shape: bf16[2,18,24,128], index: 2, kind: input, shape index: {}]   ;;  %s7529_s3 = inlined_call_operand.hbm [shape: bf16[2,2,128,512], index: 3, kind: input, shape index: {}]   ;;  %s7530_s4 = inlined_call_operand.vmem [shape: f32[1,128], index: 4, kind: input, shape index: {}]   ;;  %s7531_s5 = inlined_call_operand.hbm [shape: f32[2,2,2,16,16,128], index: 5, kind: output, shape index: {}]  }
   0x1   :  { %7550 = sst [smem:[#allocation35_spill]] %s7526_s0 }
   0x2   :  { %7551 = sst [smem:[#allocation36_spill]] %s7527_s1 }
   0x3   :  { %7552 = sst [smem:[#allocation37_spill]] %s7528_s2 }
   0x4   :  { %7553 = sst [smem:[#allocation38_spill]] %s7529_s3 }
   0x5   :  { %7554 = sst [smem:[#allocation39_spill]] %s7530_s4 }
   0x6   :  { %7555 = sst [smem:[#allocation40_spill]] %s7531_s5 }
   0x7   :  { %10 = vsyncpa [#allocation4], 0 }
   0x8   :  { %12 = vsyncpa [#allocation4 + $0x1], 0 }
   0x9   :  { %13 = vsyncpa [#allocation7], 0 }
   0xa   :  { %15 = vsyncpa [#allocation7 + $0x1], 0 }
   0xb   :  { %16 = vsyncpa [#allocation10], 0 }
   0xc   :  { %17 = vsyncpa [#allocation5], 0 }
   0xd   :  { %19 = vsyncpa [#allocation5 + $0x1], 0  ;;  %s6534_s18 = smov 0   ;;  %s6536_s19 = smov 0  }
   0xe   :  { %s6538_s20 = smov 0   ;;  %s6540_s21 = smov 0  }
   0xf   :  { %s6542_s22 = smov 0   ;;  %s6544_s23 = smov 0  }
  0x10   :  { %s6546_s24 = smov 0   ;;  %s6548_s25 = smov 0  }
  0x11   :  { %s6550_s26 = smov 0   ;;  %s6552_s27 = smov 0  }
  0x12   :  { %s6554_s28 = smov 0   ;;  %s6556_s29 = smov 0  }
  0x13   :  { %s6558_s30 = smov 0   ;;  %s6560_s6 = smov 0  }
  0x14 LB: > { %7556 = sst [smem:[#allocation19_spill]] %s6455_s23  ;;  %s6605_s7 = sadd.s32 4294967295, %s6487_s6   ;;  %s6487_s6 = sphi %s6560_s6, %s25_s6   ;;  %s6483_s30 = sphi %s6558_s30, %s7619_s30   ;;  %s6479_s29 = sphi %s6556_s29, %s7618_s29   ;;  %s6475_s28 = sphi %s6554_s28, %s7607_s28   ;;  %s6471_s27 = sphi %s6552_s27, %s7606_s27   ;;  %s6467_s26 = sphi %s6550_s26, %s7605_s26   ;;  %s6463_s25 = sphi %s6548_s25, %s7617_s25   ;;  %s6459_s24 = sphi %s6546_s24, %s7616_s24   ;;  %s6455_s23 = sphi %s6544_s23, %s7615_s23   ;;  %s6451_s22 = sphi %s6542_s22, %s7614_s22   ;;  %s6447_s21 = sphi %s6540_s21, %s7613_s21   ;;  %s6443_s20 = sphi %s6538_s20, %s7612_s20   ;;  %s6439_s19 = sphi %s6536_s19, %s7611_s19   ;;  %s6435_s18 = sphi %s6534_s18, %s7610_s18  }
  0x15   : > { %7557 = sst [smem:[#allocation20_spill]] %s6459_s24  ;;  %s34_s9 = sadd.s32 1, %s6479_s29 }
  0x16   : > { %7558 = sst [smem:[#allocation21_spill]] %s6467_s26  ;;  %s37_s10 = sadd.s32 1, %s6483_s30 }
  0x17   : > { %7559 = sst [smem:[#allocation22_spill]] %s6471_s27  ;;  %p35_p0 = scmp.ge.s32.totalorder %s34_s9, 2 }
  0x18   : > { %7560 = sst [smem:[#allocation23_spill]] %s6475_s28  ;;  %s46_s11 = sadd.s32 1, %s6467_s26 }
  0x19   : > { %7561 = sst [smem:[#allocation24_spill]] %s6479_s29  ;;  %p53_p1 = scmp.ne.s32.totalorder %s6467_s26, %s6463_s25 }
  0x1a   : > { %7562 = sst [smem:[#allocation25_spill]] %s6483_s30  ;;  %p54_p2 = scmp.eq.s32.totalorder %s6487_s6, 0 }
  0x1b   : > { %7563 = sst [smem:[#allocation26_spill]] %s6487_s6  ;;  %s7621_s9 = smov (%p35_p0, %s34_s9), 0 }
  0x1c   : > { %7564 = sst [smem:[#allocation27_spill]] %s7621_s9  ;;  %s7623_s10 = smov (!%p35_p0, %s37_s10), %s6483_s30 }
  0x1d   : > { %s42_s12 = ssub.s32 %s6479_s29, %s7621_s9  ;;  %p6624_p3 = por %p54_p2, %p53_p1 }
  0x1e   : > { %p39_p4 = scmp.ge.s32.totalorder %s7623_s10, 2  ;;  %p7534_p5 = scmp.ne.s32.totalorder %s6463_s25, %s6459_s24 }
  0x1f   : > { %p60_p6 = scmp.eq.s32.totalorder %s6605_s7, 0  ;;  %s5753_s14 = sshll.u32 %s6479_s29, 3 }
  0x20   : > { %s7625_s10 = smov (%p39_p4, %s7623_s10), 0  ;;  %s5754_s16 = sadd.s32 8, %s5753_s14 }
  0x21   : > { %7566 = sst [smem:[#allocation28_spill]] %s7625_s10  ;;  %p6639_p7 = por %p60_p6, %p7534_p5 }
  0x22   : > { %s41_s17 = ssub.s32 %s6483_s30, %s7625_s10  ;;  %s5755_s8 = sshll.u32 %s7621_s9, 3 }
  0x23   : > { %s7567_s15 = scalar_select %p6639_p7, 1, 0 }
  0x24   : > { %s43_s5 = sor.u32 %s42_s12, %s41_s17  ;;  %s5756_s28 = sadd.s32 8, %s5755_s8 }
  0x25   : > { %p44_p8 = scmp.eq.s32.totalorder %s43_s5, 0  ;;  %s74_s27 = ssub.s32 %s5754_s16, %s5756_s28 }
  0x26   : > { %s75_s4 = sor.u32 %s74_s27, %s41_s17  ;;  %s78_s2 = sadd.s32 1, %s6455_s23 }
  0x27   : > { %s6648_s1 = scalar_select %p44_p8, %s6467_s26, %s46_s11  }
  0x28   : > { %p76_p9 = scmp.eq.s32.totalorder %s75_s4, 0  ;;  %p85_p10 = scmp.ne.s32.totalorder %s6455_s23, %s6451_s22 }
  0x29   : > { %7568 = sst [smem:[#allocation29_spill]] %s6648_s1  ;;  %p91_p11 = scmp.ne.s32.totalorder %s6451_s22, %s6447_s21 }
  0x2a   : > { %s103_s8 = sadd.s32 1, %s5754_s16  ;;  %p6659_p12 = por %p85_p10, %p54_p2 }
  0x2b   : > { %s6655_s12 = scalar_select %p76_p9, %s6455_s23, %s78_s2  }
  0x2c   : > { %p6665_p13 = por %p91_p11, %p60_p6  ;;  %s106_s21 = sadd.s32 1, %s5756_s28 }
  0x2d   : > { %7569 = sst [smem:[#allocation30_spill]] %s6655_s12  ;;  %s112_s27 = sadd.s32 1, %s6443_s20 }
  0x2e   : > { %s7571_s4 = scalar_select %p6665_p13, 1, 0 }
  0x2f   : > { %s108_s11 = ssub.s32 %s103_s8, %s106_s21  ;;  %p119_p0 = scmp.ne.s32.totalorder %s6443_s20, %s6439_s19 }
  0x30   : > { %s109_s2 = sor.u32 %s108_s11, %s41_s17  ;;  %p125_p4 = scmp.ne.s32.totalorder %s6439_s19, %s6435_s18 }
  0x31   : > { %p110_p8 = scmp.eq.s32.totalorder %s109_s2, 0  ;;  %p6676_p9 = por %p119_p0, %p54_p2 }
  0x32   : > { %p6682_p10 = por %p125_p4, %p60_p6  ;;  %p193_p11 = scmp.eq.s32.totalorder %s6605_s7, 3 }
  0x33   : > { %s7572_s14 = scalar_select %p6676_p9, 1, 0 }
  0x34   : > { %s7573_s16 = scalar_select %p6682_p10, 1, 0 }
  0x35   : > { %s6688_s10 = scalar_select %p110_p8, %s6443_s20, %s112_s27  }
  0x36   : > { %7574 = sst [smem:[#allocation31_spill]] %s7573_s16  ;;  %p6693_p5 = por %p193_p11, %p53_p1 }
  0x37   : > { %7575 = sst [smem:[#allocation32_spill]] %s6688_s10  ;;  %s7578_s18 = sadd.s32 4294967294, %s6487_s6  }
  0x38   : > { %s7576_s28 = scalar_select %p6693_p5, 1, 0 }
  0x39   : > { %p199_p13 = scmp.eq.s32.totalorder %s7578_s18, 3  ;;  %p4391_p2 = scmp.ge.s32.totalorder %s6487_s6, 1 }
  0x3a   : > { %7577 = sst [smem:[#allocation33_spill]] %s7576_s28  ;;  %p206_p0 = scmp.lt.s32.totalorder %s6487_s6, 5 }
  0x3b   : > { %p7579_p7 = scmp.ne.s32.totalorder %s6463_s25, %s6459_s24  ;;  %s7583_s3 = sld [smem:[#allocation38_spill]] }
  0x3c   : > { %p6708_p4 = pnand %p4391_p2, %p206_p0  ;;  %s6489_s2 = smov [#allocation9]  }
  0x3d   : > { %p6704_p9 = por %p199_p13, %p7579_p7  ;;  %s219_s18 = sshll.u32 %s6489_s2, 4  ;;  %s220_s18 = int_to_ptr.vmem [resolvable:$true] %s219_s18 }
  0x3e   : > { %p6089_p1 = pneg %p6708_p4  ;;  %s6490_s9 = smov 256  }
  0x3f   : > { %s7580_s17 = scalar_select %p6704_p9, 1, 0 }
  0x40   : > { %p6090_p7 = pnand %p6089_p1, %p60_p6  ;;  %s6491_s1 = smov 16  }
  0x41   : > { %7581 = sst [smem:[#allocation34_spill]] %s7580_s17  ;;  %s217_s11 = sshll.u32 %s7583_s3, 4  ;;  %s218_s11 = int_to_ptr.hbm [resolvable:$true] %s217_s11 }
  0x42   : > { %6092 = dma.hbm_to_vmem [thread:$0]  (!%p6090_p7), %s218_s11, 16384, %s220_s18, [#allocation10], %s6490_s9, %s6490_s9, %s6491_s1  }
  0x43   : > { %p4393_p13 = scmp.ge.s32.totalorder %s6487_s6, 4 }
  0x45   : > { %232 = sbr.rel (%p4393_p13) target bundleno = 115 (0x73), region = 24 }
  0x4a   : > { %235 = sbr.rel (!%p6624_p3) target bundleno = 100 (0x64), region = 28  ;;  %s236_s21 = sand.u32 (%p6624_p3), 1, %s6467_s26  }
  0x4b   : > { %s6064_s27 = smul.u32 (%p6624_p3), 96, %s236_s21  ;;  %s6723_s3 = scalar_lea.sflag (%p6624_p3), [#allocation4], %s236_s21 }
  0x4c   : > { %s6065_s12 = smul.u32 (%p6624_p3), 24, %s6479_s29  ;;  %s7584_s0 = sld [smem:[#allocation35_spill]] (%p6624_p3) }
  0x4d   : > { %s240_s2 = scalar_lea.vmem (%p6624_p3), [#allocation3], %s6064_s27  ;;  %s6066_s10 = smul.u32 (%p6624_p3), 54, %s6483_s30 }
  0x4e   : > { %s6727_s17 = sshll.u32 (%p6624_p3), %s240_s2, 4  ;;  %s261_s17 = int_to_ptr.vmem [resolvable:$true] %s6727_s17 }
  0x4f   : > { %s253_s1 = sadd.s32 %s6066_s10, %s6065_s12 }
  0x50   : > { %s4399_s9 = sshll.u32 %s253_s1, 2 }
  0x52   : > { %s255_s13 = scalar_lea.hbm %s7584_s0, %s4399_s9  ;;  %s6271_s16 = scalar_lea.hbm %s7584_s0, 432 }
  0x53   : > { %s258_s24 = sshll.u32 %s255_s13, 4  ;;  %s259_s24 = int_to_ptr.hbm [resolvable:$true] %s258_s24 }
  0x54   : > { %s6260_s28 = sshra.s32 %s259_s24, 4  ;;  %s6261_s28 = int_to_ptr.hbm [resolvable:$true] %s6260_s28 }
  0x55   : > { %s6267_s26 = scalar_lea.hbm %s6261_s28, 96 }
  0x56   : > { %p6268_p3 = scmp.ne.s32.totalorder %s6261_s28, %s6267_s26  ;;  %p6273_p8 = scmp.lt.s32.totalorder %s6271_s16, %s6267_s26 }
  0x58   : > { %p6275_p11 = pnand %p6273_p8, %p6268_p3 }
  0x5a   : > { %6278 = shalt.err (!%p6275_p11)
}
  0x5b   : > { %s6279_s10 = sshra.s32 %s261_s17, 4  ;;  %s6492_s2 = smov [#allocation3]   ;;  %s6280_s10 = int_to_ptr.vmem [resolvable:$true] %s6279_s10 }
  0x5c   : > { %s6286_s12 = scalar_lea.vmem %s6280_s10, 96  ;;  %s6290_s1 = scalar_lea.vmem %s6492_s2, 192 }
  0x5d   : > { %p6287_p2 = scmp.ne.s32.totalorder %s6280_s10, %s6286_s12  ;;  %p6292_p0 = scmp.lt.s32.totalorder %s6290_s1, %s6286_s12 }
  0x5f   : > { %p6294_p1 = pnand %p6292_p0, %p6287_p2 }
  0x61   : > { %6297 = shalt.err (!%p6294_p1)
}
  0x62   : > { %s6493_s9 = smov 64   ;;  %s6494_s28 = smov 4  }
  0x63   : > { %266 = dma.hbm_to_vmem [thread:$0]  %s259_s24, 1536, %s261_s17, %s6723_s3, %s6493_s9, %s6493_s9, %s6494_s28  }
  0x64 PF: > { %s270_s26 = sand.u32 1, %s6487_s6   ;;  %s272_s16 = sand.u32 1, %s6455_s23  }
  0x65   : > { %s6067_s11 = smul.u32 12, %s272_s16  ;;  %s298_s2 = sand.u32 1, %s6443_s20  }
  0x66   : > { %s4275_s18 = smul.u32 24, %s6479_s29  ;;  %s7585_s24 = sld [smem:[#allocation36_spill]] }
  0x67   : > { %s4276_s13 = smul.u32 54, %s6483_s30  ;;  %s274_s21 = scalar_lea.vmem [#allocation6], %s6067_s11 }
  0x68   : > { %s286_s27 = sshll.u32 %s274_s21, 4  ;;  %s7586_s0 = sld [smem:[#allocation37_spill]]  ;;  %s287_s27 = int_to_ptr.vmem [resolvable:$true] %s286_s27 }
  0x69   : > { %s4277_s10 = sadd.s32 %s4276_s13, %s4275_s18  ;;  %s6068_s30 = smul.u32 12, %s298_s2 }
  0x6a   : > { %s4402_s12 = sshll.u32 %s4277_s10, 2  ;;  %s271_s21 = scalar_lea.sflag [#allocation7], %s270_s26 }
  0x6b   : > { %s6495_s18 = smov 64   ;;  %s6496_s13 = smov 4  }
  0x6c   : > { %s4279_s17 = scalar_lea.hbm %s7585_s24, %s4402_s12  ;;  %s300_s10 = scalar_lea.vmem [#allocation8], %s6068_s30 }
  0x6d   : > { %s4280_s23 = scalar_lea.hbm %s4279_s17, 96  ;;  %s313_s1 = sshll.u32 %s300_s10, 4  ;;  %s314_s1 = int_to_ptr.vmem [resolvable:$true] %s313_s1 }
  0x6e   : > { %s4289_s6 = scalar_lea.hbm %s7586_s0, %s4402_s12  ;;  %s284_s29 = sshll.u32 %s4280_s23, 4  ;;  %s285_s29 = int_to_ptr.hbm [resolvable:$true] %s284_s29 }
  0x6f   : > { %s4290_s16 = scalar_lea.hbm %s4289_s6, 108  ;;  %p7587_p7 = scmp.ne.s32.totalorder %s7572_s14, 0 }
  0x70   : > { %s311_s11 = sshll.u32 %s4290_s16, 4  ;;  %s312_s11 = int_to_ptr.hbm [resolvable:$true] %s311_s11 }
  0x71   : > { %6074 = dma.hbm_to_vmem [thread:$0]  (%p6659_p12), %s285_s29, 192, %s287_s27, %s271_s21, %s6495_s18, %s6495_s18, %s6496_s13  }
  0x72   : > { %6075 = dma.hbm_to_vmem [thread:$0]  (%p7587_p7), %s312_s11, 192, %s314_s1, %s271_s21, %s6495_s18, %s6495_s18, %s6496_s13  }
  0x73 PF: > { %325 = sbr.rel (%p6708_p4) target bundleno = 1117 (0x45d), region = 40  ;;  %s6759_s0 = sand.u32 (!%p6708_p4), 1, %s6463_s25  }
  0x74   : > { %s6069_s23 = smul.u32 (!%p6708_p4), 96, %s6759_s0  ;;  %s328_s6 = scalar_lea.sflag (!%p6708_p4), [#allocation4], %s6759_s0 }
  0x75   : > { %p7588_p12 = scmp.ne.s32.totalorder (!%p6708_p4), %s7567_s15, 0 }
  0x76   : > { %s6763_s5 = scalar_lea.vmem (!%p6708_p4), [#allocation3], %s6069_s23 }
  0x78   : > { %6412 = dma.done.wait (%p7588_p12), %s328_s6, 1536  }
  0x79   : > { %6414 = vsyncadd (%p7588_p12), %s328_s6, 4294965760  ;;  %s337_s29 = sand.u32 1, %s6605_s7   ;;  %s339_s30 = sand.u32 1, %s6451_s22  }
  0x7a   : > { %s6771_s14 = smul.u32 12, %s339_s30  ;;  %s338_s8 = scalar_lea.sflag [#allocation7], %s337_s29 }
  0x7b   : > { %p7589_p4 = scmp.ne.s32.totalorder %s7571_s4, 0 }
  0x7c   : > { %s341_s26 = scalar_lea.vmem [#allocation6], %s6771_s14 }
  0x7d   : > { %6416 = dma.done.wait (%p7589_p4), %s338_s8, 192  }
  0x7e   : > { %6418 = vsyncadd (%p7589_p4), %s338_s8, 4294967104  ;;  %s349_s12 = sand.u32 1, %s6439_s19  }
  0x7f   : > { %s6779_s15 = smul.u32 12, %s349_s12 }
  0x81   : > { %s351_s2 = scalar_lea.vmem [#allocation8], %s6779_s15 }
  0x82   : > { %6420 = dma.done.wait (%p6682_p10), %s338_s8, 192  }
  0x83   : > { %6422 = vsyncadd (%p6682_p10), %s338_s8, 4294967104 }
  0x84   : > { %6424 = dma.done.wait (%p60_p6), [#allocation10], 16384  }
  0x85   : > { %6426 = vsyncadd (%p60_p6), [#allocation10], 4294950912  ;;  %v4630_v0 = vld [vmem:[#allocation9 + $0xe0] sm:$0xf]  ;;  %v5811_v1 = vld [vmem:[#allocation9 + $0xec] sm:$0xf0] }
  0x86   : > { %v4758_v2 = vld [vmem:[#allocation9 + $0x1e0] sm:$0xf]  ;;  %v4631_v3 = vor.u32 %v5811_v1, %v4630_v0  ;;  %v5843_v4 = vld [vmem:[#allocation9 + $0x1ec] sm:$0xf0]  ;;  %v5809_v5 = vld [vmem:[#allocation9 + $0xe4] sm:$0xf] }
  0x87   : > { %v4759_v6 = vor.u32 %v5843_v4, %v4758_v2  ;;  %v4632_v7 = vld [vmem:[#allocation9 + $0xf0] sm:$0xf0]  ;;  %v5841_v8 = vld [vmem:[#allocation9 + $0x1e4] sm:$0xf]  ;;  %v4614_v12 = vld [vmem:[#allocation9 + $0xc0] sm:$0xf] }
  0x88   : > { %v4760_v9 = vld [vmem:[#allocation9 + $0x1f0] sm:$0xf0]  ;;  %989 = vmatpush.bf16.msra.mxu0 %v4631_v3  ;;  %v4635_v10 = vor.u32 %v5809_v5, %v4632_v7  ;;  %v5807_v13 = vld [vmem:[#allocation9 + $0xcc] sm:$0xf0]  ;;  %v4742_v14 = vld [vmem:[#allocation9 + $0x1c0] sm:$0xf] }
  0x89   : > { %v4763_v11 = vor.u32 %v5841_v8, %v4760_v9  ;;  %1045 = vmatpush.bf16.msra.mxu1 %v4759_v6  ;;  %v4615_v15 = vor.u32 %v5807_v13, %v4614_v12  ;;  %v5839_v16 = vld [vmem:[#allocation9 + $0x1cc] sm:$0xf0]  ;;  %v5805_v17 = vld [vmem:[#allocation9 + $0xc4] sm:$0xf]  ;;  %v4616_v18 = vld [vmem:[#allocation9 + $0xd0] sm:$0xf0] }
  0x8a   : > { %1101 = vmatpush.bf16.msra.mxu2 %v4635_v10  ;;  %v4743_v19 = vor.u32 %v5839_v16, %v4742_v14  ;;  %v4619_v20 = vor.u32 %v5805_v17, %v4616_v18  ;;  %v5837_v21 = vld [vmem:[#allocation9 + $0x1c4] sm:$0xf]  ;;  %v4744_v22 = vld [vmem:[#allocation9 + $0x1d0] sm:$0xf0]  ;;  %v4598_v23 = vld [vmem:[#allocation9 + $0xa0] sm:$0xf] }
  0x8b   : > { %1164 = vmatpush.bf16.msra.mxu3 %v4763_v11  ;;  %v4747_v24 = vor.u32 %v5837_v21, %v4744_v22  ;;  %v5803_v25 = vld [vmem:[#allocation9 + $0xac] sm:$0xf0]  ;;  %v4726_v26 = vld [vmem:[#allocation9 + $0x1a0] sm:$0xf]  ;;  %v5801_v29 = vld [vmem:[#allocation9 + $0xa4] sm:$0xf] }
  0x8c   : > { %v5835_v27 = vld [vmem:[#allocation9 + $0x1ac] sm:$0xf0]  ;;  %990 = vmatpush.bf16.msra.mxu0 %v4615_v15  ;;  %v4599_v28 = vor.u32 %v5803_v25, %v4598_v23  ;;  %v4600_v30 = vld [vmem:[#allocation9 + $0xb0] sm:$0xf0]  ;;  %v5833_v31 = vld [vmem:[#allocation9 + $0x1a4] sm:$0xf] }
  0x8d   : > { %1046 = vmatpush.bf16.msra.mxu1 %v4743_v19  ;;  %v4727_v32 = vor.u32 %v5835_v27, %v4726_v26  ;;  %v4728_v33 = vld [vmem:[#allocation9 + $0x1b0] sm:$0xf0]  ;;  %v4582_v34 = vld [vmem:[#allocation9 + $0x80] sm:$0xf]  ;;  %v5799_v35 = vld [vmem:[#allocation9 + $0x8c] sm:$0xf0]  ;;  %v4603_v36 = vor.u32 %v5801_v29, %v4600_v30 }
  0x8e   : > { %1102 = vmatpush.bf16.msra.mxu2 %v4619_v20  ;;  %v4731_v37 = vor.u32 %v5833_v31, %v4728_v33  ;;  %v4710_v38 = vld [vmem:[#allocation9 + $0x180] sm:$0xf]  ;;  %v5831_v39 = vld [vmem:[#allocation9 + $0x18c] sm:$0xf0]  ;;  %v5797_v40 = vld [vmem:[#allocation9 + $0x84] sm:$0xf]  ;;  %v4583_v44 = vor.u32 %v5799_v35, %v4582_v34 }
  0x8f   : > { %1165 = vmatpush.bf16.msra.mxu3 %v4747_v24  ;;  %v4584_v41 = vld [vmem:[#allocation9 + $0x90] sm:$0xf0]  ;;  %v5829_v42 = vld [vmem:[#allocation9 + $0x184] sm:$0xf]  ;;  %v4711_v45 = vor.u32 %v5831_v39, %v4710_v38  ;;  %v4566_v46 = vld [vmem:[#allocation9 + $0x60] sm:$0xf] }
  0x90   : > { %v4712_v43 = vld [vmem:[#allocation9 + $0x190] sm:$0xf0]  ;;  %991 = vmatpush.bf16.msra.mxu0 %v4599_v28  ;;  %v5795_v47 = vld [vmem:[#allocation9 + $0x6c] sm:$0xf0]  ;;  %v4587_v48 = vor.u32 %v5797_v40, %v4584_v41  ;;  %v4694_v50 = vld [vmem:[#allocation9 + $0x160] sm:$0xf] }
  0x91   : > { %1047 = vmatpush.bf16.msra.mxu1 %v4727_v32  ;;  %v4715_v49 = vor.u32 %v5829_v42, %v4712_v43  ;;  %v5827_v51 = vld [vmem:[#allocation9 + $0x16c] sm:$0xf0]  ;;  %v5793_v52 = vld [vmem:[#allocation9 + $0x64] sm:$0xf]  ;;  %v4568_v53 = vld [vmem:[#allocation9 + $0x70] sm:$0xf0]  ;;  %v4567_v56 = vor.u32 %v5795_v47, %v4566_v46 }
  0x92   : > { %1103 = vmatpush.bf16.msra.mxu2 %v4603_v36  ;;  %v5825_v54 = vld [vmem:[#allocation9 + $0x164] sm:$0xf]  ;;  %v4696_v55 = vld [vmem:[#allocation9 + $0x170] sm:$0xf0]  ;;  %v4695_v57 = vor.u32 %v5827_v51, %v4694_v50  ;;  %v4550_v58 = vld [vmem:[#allocation9 + $0x40] sm:$0xf]  ;;  %v4571_v60 = vor.u32 %v5793_v52, %v4568_v53 }
  0x93   : > { %1166 = vmatpush.bf16.msra.mxu3 %v4731_v37  ;;  %v5791_v59 = vld [vmem:[#allocation9 + $0x4c] sm:$0xf0]  ;;  %v4699_v61 = vor.u32 %v5825_v54, %v4696_v55  ;;  %v4678_v62 = vld [vmem:[#allocation9 + $0x140] sm:$0xf]  ;;  %v5789_v0 = vld [vmem:[#allocation9 + $0x44] sm:$0xf] }
  0x94   : > { %992 = vmatpush.bf16.msra.mxu0 %v4583_v44  ;;  %v5823_v63 = vld [vmem:[#allocation9 + $0x14c] sm:$0xf0]  ;;  %v4552_v1 = vld [vmem:[#allocation9 + $0x50] sm:$0xf0]  ;;  %v5821_v2 = vld [vmem:[#allocation9 + $0x144] sm:$0xf]  ;;  %v4551_v4 = vor.u32 %v5791_v59, %v4550_v58 }
  0x95   : > { %1048 = vmatpush.bf16.msra.mxu1 %v4711_v45  ;;  %v4680_v3 = vld [vmem:[#allocation9 + $0x150] sm:$0xf0]  ;;  %v4679_v5 = vor.u32 %v5823_v63, %v4678_v62  ;;  %v4534_v6 = vld [vmem:[#allocation9 + $0x20] sm:$0xf]  ;;  %v5787_v7 = vld [vmem:[#allocation9 + $0x2c] sm:$0xf0]  ;;  %v4555_v8 = vor.u32 %v5789_v0, %v4552_v1 }
  0x96   : > { %1104 = vmatpush.bf16.msra.mxu2 %v4587_v48  ;;  %v4683_v9 = vor.u32 %v5821_v2, %v4680_v3  ;;  %v4662_v10 = vld [vmem:[#allocation9 + $0x120] sm:$0xf]  ;;  %v5819_v11 = vld [vmem:[#allocation9 + $0x12c] sm:$0xf0]  ;;  %v5785_v12 = vld [vmem:[#allocation9 + $0x24] sm:$0xf]  ;;  %v4535_v16 = vor.u32 %v5787_v7, %v4534_v6 }
  0x97   : > { %1167 = vmatpush.bf16.msra.mxu3 %v4715_v49  ;;  %v4536_v13 = vld [vmem:[#allocation9 + $0x30] sm:$0xf0]  ;;  %v5817_v14 = vld [vmem:[#allocation9 + $0x124] sm:$0xf]  ;;  %v4518_v17 = vld [vmem:[#allocation9] sm:$0xf]  ;;  %v4663_v18 = vor.u32 %v5819_v11, %v4662_v10 }
  0x98   : > { %993 = vmatpush.bf16.msra.mxu0 %v4567_v56  ;;  %v4664_v15 = vld [vmem:[#allocation9 + $0x130] sm:$0xf0]  ;;  %v5783_v19 = vld [vmem:[#allocation9 + $0xc] sm:$0xf0]  ;;  %v4646_v20 = vld [vmem:[#allocation9 + $0x100] sm:$0xf]  ;;  %v4539_v22 = vor.u32 %v5785_v12, %v4536_v13 }
  0x99   : > { %1049 = vmatpush.bf16.msra.mxu1 %v4695_v57  ;;  %v5815_v21 = vld [vmem:[#allocation9 + $0x10c] sm:$0xf0]  ;;  %v4667_v23 = vor.u32 %v5817_v14, %v4664_v15  ;;  %v5781_v24 = vld [vmem:[#allocation9 + $0x4] sm:$0xf]  ;;  %v4638_v25 = vld [vmem:[#allocation9 + $0xe8] sm:$0xf]  ;;  %v4519_v30 = vor.u32 %v5783_v19, %v4518_v17 }
  0x9a   : > { %1105 = vmatpush.bf16.msra.mxu2 %v4571_v60  ;;  %v5812_v26 = vld [vmem:[#allocation9 + $0xf4] sm:$0xf0]  ;;  %v4520_v27 = vld [vmem:[#allocation9 + $0x10] sm:$0xf0]  ;;  %v5813_v28 = vld [vmem:[#allocation9 + $0x104] sm:$0xf]  ;;  %v4647_v33 = vor.u32 %v5815_v21, %v4646_v20 }
  0x9b   : > { %1168 = vmatpush.bf16.msra.mxu3 %v4699_v61  ;;  %v4648_v29 = vld [vmem:[#allocation9 + $0x110] sm:$0xf0]  ;;  %v5842_v31 = vld [vmem:[#allocation9 + $0x1ec] sm:$0xf]  ;;  %v4768_v32 = vld [vmem:[#allocation9 + $0x1f8] sm:$0xf0]  ;;  %v4639_v36 = vor.u32 %v5812_v26, %v4638_v25  ;;  %v4523_v37 = vor.u32 %v5781_v24, %v4520_v27 }
  0x9c   : > { %994 = vmatpush.bf16.msra.mxu0 %v4551_v4  ;;  %v5810_v34 = vld [vmem:[#allocation9 + $0xec] sm:$0xf]  ;;  %v4640_v35 = vld [vmem:[#allocation9 + $0xf8] sm:$0xf0]  ;;  %v4651_v38 = vor.u32 %v5813_v28, %v4648_v29  ;;  %v6791_v39 = vld [vmem:[%s6763_s5] sm:$0xff]  ;;  %v4771_v40 = vor.u32 %v5842_v31, %v4768_v32  ;;  %vm1500_vm0 = vcmask 1046528  }
  0x9d   : > { %1050 = vmatpush.bf16.msra.mxu1 %v4679_v5  ;;  %v4766_v41 = vld [vmem:[#allocation9 + $0x1e8] sm:$0xf]  ;;  %v5844_v42 = vld [vmem:[#allocation9 + $0x1f4] sm:$0xf0]  ;;  %v6794_v43 = vld [vmem:[%s6763_s5 + $0xc] sm:$0xff]  ;;  %v4643_v44 = vor.u32 %v5810_v34, %v4640_v35  ;;  %s4408_s7 = sshll.u32 %s6759_s0, 9 }
  0x9e   : > { %1106 = vmatpush.bf16.msra.mxu2 %v4555_v8  ;;  %v5838_v45 = vld [vmem:[#allocation9 + $0x1cc] sm:$0xf]  ;;  %v4752_v46 = vld [vmem:[#allocation9 + $0x1d8] sm:$0xf0]  ;;  %v4767_v49 = vor.u32 %v5844_v42, %v4766_v41  ;;  %v4750_v51 = vld [vmem:[#allocation9 + $0x1c8] sm:$0xf] }
  0x9f   : > { %1169 = vmatpush.bf16.msra.mxu3 %v4683_v9  ;;  %v5806_v47 = vld [vmem:[#allocation9 + $0xcc] sm:$0xf]  ;;  %v4624_v48 = vld [vmem:[#allocation9 + $0xd8] sm:$0xf0]  ;;  %v4755_v50 = vor.u32 %v5838_v45, %v4752_v46  ;;  %v5840_v52 = vld [vmem:[#allocation9 + $0x1d4] sm:$0xf0] }
  0xa0   : > { %995 = vmatpush.bf16.msra.mxu0 %v4535_v16  ;;  %v4627_v53 = vor.u32 %v5806_v47, %v4624_v48  ;;  %v4622_v54 = vld [vmem:[#allocation9 + $0xc8] sm:$0xf]  ;;  %v5808_v55 = vld [vmem:[#allocation9 + $0xd4] sm:$0xf0]  ;;  %v5834_v56 = vld [vmem:[#allocation9 + $0x1ac] sm:$0xf]  ;;  %v4751_v57 = vor.u32 %v5840_v52, %v4750_v51 }
  0xa1   : > { %1051 = vmatpush.bf16.msra.mxu1 %v4663_v18  ;;  %v4623_v58 = vor.u32 %v5808_v55, %v4622_v54  ;;  %v4736_v59 = vld [vmem:[#allocation9 + $0x1b8] sm:$0xf0]  ;;  %v5802_v60 = vld [vmem:[#allocation9 + $0xac] sm:$0xf]  ;;  %v6804_v1 = vld [vmem:[%s6763_s5 + $0x14] sm:$0xff]  ;;  %s7591_s24 = sld [smem:[#allocation39_spill]] }
  0xa2   : > { %1107 = vmatpush.bf16.msra.mxu2 %v4539_v22  ;;  %v4608_v61 = vld [vmem:[#allocation9 + $0xb8] sm:$0xf0]  ;;  %v4739_v62 = vor.u32 %v5834_v56, %v4736_v59  ;;  %v4734_v2 = vld [vmem:[#allocation9 + $0x1a8] sm:$0xf]  ;;  %v5836_v3 = vld [vmem:[#allocation9 + $0x1b4] sm:$0xf0] }
  0xa3   : > { %1170 = vmatpush.bf16.msra.mxu3 %v4667_v23  ;;  %v4611_v63 = vor.u32 %v5802_v60, %v4608_v61  ;;  %v6801_v0 = vld [vmem:[%s6763_s5 + $0x8] sm:$0xff]  ;;  %v4606_v4 = vld [vmem:[#allocation9 + $0xa8] sm:$0xf]  ;;  %v4735_v5 = vor.u32 %v5836_v3, %v4734_v2  ;;  %v6811_v8 = vld [vmem:[%s6763_s5 + $0x10] sm:$0xff]  ;;  %s6900_s9 = scalar_lea.vmem [#allocation11], %s4408_s7  ;;  %s4192_s10 = scalar_lea.sflag [#allocation5], %s6759_s0 }
  0xa4   : > { %996 = vmatpush.bf16.msra.mxu0 %v4519_v30  ;;  %v5804_v6 = vld [vmem:[#allocation9 + $0xb4] sm:$0xf0]  ;;  %v6814_v9 = vld [vmem:[%s6763_s5 + $0x1c] sm:$0xff]  ;;  %v4720_v11 = vld [vmem:[#allocation9 + $0x198] sm:$0xf0] }
  0xa5   : > { %1052 = vmatpush.bf16.msra.mxu1 %v4647_v33  ;;  %v4607_v7 = vor.u32 %v5804_v6, %v4606_v4  ;;  %v5830_v10 = vld [vmem:[#allocation9 + $0x18c] sm:$0xf]  ;;  %v4592_v14 = vld [vmem:[#allocation9 + $0x98] sm:$0xf0]  ;;  %v4718_v15 = vld [vmem:[#allocation9 + $0x188] sm:$0xf] }
  0xa6   : > { %1108 = vmatpush.bf16.msra.mxu2 %v4523_v37  ;;  %v5798_v12 = vld [vmem:[#allocation9 + $0x8c] sm:$0xf]  ;;  %v4723_v13 = vor.u32 %v5830_v10, %v4720_v11  ;;  %v5832_v16 = vld [vmem:[#allocation9 + $0x194] sm:$0xf0]  ;;  %v4590_v21 = vld [vmem:[#allocation9 + $0x88] sm:$0xf] }
  0xa7   : > { %1171 = vmatpush.bf16.msra.mxu3 %v4651_v38  ;;  %997 = vmatmul.bf16.vlgmr.msra.gmra.mxu0 %v6791_v39  ;;  %v4595_v17 = vor.u32 %v5798_v12, %v4592_v14  ;;  %v4719_v18 = vor.u32 %v5832_v16, %v4718_v15  ;;  %v6821_v19 = vld [vmem:[%s6763_s5 + $0x18] sm:$0xff]  ;;  %v6824_v20 = vld [vmem:[%s6763_s5 + $0x24] sm:$0xff]  ;;  %v4704_v25 = vld [vmem:[#allocation9 + $0x178] sm:$0xf0]  ;;  %s7592_s17 = smov %s7591_s24 }
  0xa8   : > { %1227 = vmatpush.bf16.msrb.mxu0 %v4639_v36  ;;  %1053 = vmatmul.bf16.vlgmr.msra.gmra.mxu1 %v6794_v43  ;;  %v5800_v22 = vld [vmem:[#allocation9 + $0x94] sm:$0xf0]  ;;  %v5826_v23 = vld [vmem:[#allocation9 + $0x16c] sm:$0xf]  ;;  %v4576_v27 = vld [vmem:[#allocation9 + $0x78] sm:$0xf0] }
  0xa9   : > { %1109 = vmatmul.bf16.vlgmr.msra.gmra.mxu2 %v6791_v39  ;;  %1290 = vmatpush.bf16.msrb.mxu1 %v4767_v49  ;;  %v4591_v24 = vor.u32 %v5800_v22, %v4590_v21  ;;  %v5794_v26 = vld [vmem:[#allocation9 + $0x6c] sm:$0xf]  ;;  %v4707_v28 = vor.u32 %v5826_v23, %v4704_v25  ;;  %v4702_v30 = vld [vmem:[#allocation9 + $0x168] sm:$0xf]  ;;  %v5828_v31 = vld [vmem:[#allocation9 + $0x174] sm:$0xf0] }
  0xaa   : > { %1353 = vmatpush.bf16.msrb.mxu2 %v4643_v44  ;;  %1172 = vmatmul.bf16.vlgmr.msra.gmra.mxu3 %v6794_v43  ;;  %v4579_v29 = vor.u32 %v5794_v26, %v4576_v27  ;;  %v4703_v32 = vor.u32 %v5828_v31, %v4702_v30  ;;  %v6831_v33 = vld [vmem:[%s6763_s5 + $0x20] sm:$0xff]  ;;  %v6834_v34 = vld [vmem:[%s6763_s5 + $0x2c] sm:$0xff]  ;;  %v4574_v35 = vld [vmem:[#allocation9 + $0x68] sm:$0xf] }
  0xab   : > { %1416 = vmatpush.bf16.msrb.mxu3 %v4771_v40  ;;  %v5796_v36 = vld [vmem:[#allocation9 + $0x74] sm:$0xf0]  ;;  %v5822_v37 = vld [vmem:[#allocation9 + $0x14c] sm:$0xf]  ;;  %v4688_v40 = vld [vmem:[#allocation9 + $0x158] sm:$0xf0] }
  0xac   : > { %1228 = vmatpush.bf16.msrb.mxu0 %v4623_v58  ;;  %v4575_v38 = vor.u32 %v5796_v36, %v4574_v35  ;;  %v4691_v41 = vor.u32 %v5822_v37, %v4688_v40  ;;  %v6841_v42 = vld [vmem:[%s6763_s5 + $0x28] sm:$0xff]  ;;  %v6844_v44 = vld [vmem:[%s6763_s5 + $0x34] sm:$0xff]  ;;  %v5790_v45 = vld [vmem:[#allocation9 + $0x4c] sm:$0xf] }
  0xad   : > { %1291 = vmatpush.bf16.msrb.mxu1 %v4751_v57  ;;  %v4560_v46 = vld [vmem:[#allocation9 + $0x58] sm:$0xf0]  ;;  %v4686_v47 = vld [vmem:[#allocation9 + $0x148] sm:$0xf]  ;;  %v5824_v49 = vld [vmem:[#allocation9 + $0x154] sm:$0xf0] }
  0xae   : > { %1354 = vmatpush.bf16.msrb.mxu2 %v4627_v53  ;;  %v4563_v48 = vor.u32 %v5790_v45, %v4560_v46  ;;  %v6851_v51 = vld [vmem:[%s6763_s5 + $0x30] sm:$0xff]  ;;  %v6854_v52 = vld [vmem:[%s6763_s5 + $0x3c] sm:$0xff]  ;;  %v4558_v53 = vld [vmem:[#allocation9 + $0x48] sm:$0xf] }
  0xaf   : > { %1417 = vmatpush.bf16.msrb.mxu3 %v4755_v50  ;;  %v4687_v50 = vor.u32 %v5824_v49, %v4686_v47  ;;  %v5792_v54 = vld [vmem:[#allocation9 + $0x54] sm:$0xf0]  ;;  %v5818_v56 = vld [vmem:[#allocation9 + $0x12c] sm:$0xf]  ;;  %v4672_v57 = vld [vmem:[#allocation9 + $0x138] sm:$0xf0] }
  0xb0   : > { %1229 = vmatpush.bf16.msrb.mxu0 %v4607_v7  ;;  %v4559_v55 = vor.u32 %v5792_v54, %v4558_v53  ;;  %v5786_v58 = vld [vmem:[#allocation9 + $0x2c] sm:$0xf]  ;;  %v4675_v59 = vor.u32 %v5818_v56, %v4672_v57  ;;  %v4544_v60 = vld [vmem:[#allocation9 + $0x38] sm:$0xf0]  ;;  %v4670_v61 = vld [vmem:[#allocation9 + $0x128] sm:$0xf] }
  0xb1   : > { %1292 = vmatpush.bf16.msrb.mxu1 %v4735_v5  ;;  %v6861_v3 = vld [vmem:[%s6763_s5 + $0x38] sm:$0xff]  ;;  %v6864_v4 = vld [vmem:[%s6763_s5 + $0x44] sm:$0xff]  ;;  %v6874_v7 = vld [vmem:[%s6763_s5 + $0x4c] sm:$0xff] }
  0xb2   : > { %1355 = vmatpush.bf16.msrb.mxu2 %v4611_v63  ;;  %v4547_v63 = vor.u32 %v5786_v58, %v4544_v60  ;;  %v6871_v5 = vld [vmem:[%s6763_s5 + $0x40] sm:$0xff]  ;;  %v4542_v11 = vld [vmem:[#allocation9 + $0x28] sm:$0xf]  ;;  %v5788_v12 = vld [vmem:[#allocation9 + $0x34] sm:$0xf0] }
  0xb3   : > { %1418 = vmatpush.bf16.msrb.mxu3 %v4739_v62  ;;  %v5820_v62 = vld [vmem:[#allocation9 + $0x134] sm:$0xf0]  ;;  %v4543_v14 = vor.u32 %v5788_v12, %v4542_v11  ;;  %v4656_v15 = vld [vmem:[#allocation9 + $0x118] sm:$0xf0]  ;;  %v5782_v16 = vld [vmem:[#allocation9 + $0xc] sm:$0xf] }
  0xb4   : > { %1230 = vmatpush.bf16.msrb.mxu0 %v4591_v24  ;;  %v4671_v2 = vor.u32 %v5820_v62, %v4670_v61  ;;  %v4654_v22 = vld [vmem:[#allocation9 + $0x108] sm:$0xf]  ;;  %v5816_v23 = vld [vmem:[#allocation9 + $0x114] sm:$0xf0]  ;;  %v6891_v49 = vld [vmem:[%s7591_s24] ss:$0 sm:$0xff] }
  0xb5   : > { %1293 = vmatpush.bf16.msrb.mxu1 %v4719_v18  ;;  %v4655_v24 = vor.u32 %v5816_v23, %v4654_v22  ;;  %v6881_v30 = vld [vmem:[%s6763_s5 + $0x48] sm:$0xff]  ;;  %v4526_v31 = vld [vmem:[#allocation9 + $0x8] sm:$0xf]  ;;  %v454_v57 = vld [vmem:[%s6763_s5 + $0x50] sm:$0xf] }
  0xb6   : > { %1356 = vmatpush.bf16.msrb.mxu2 %v4595_v17  ;;  %v4528_v17 = vld [vmem:[#allocation9 + $0x18] sm:$0xf0]  ;;  %v6884_v37 = vld [vmem:[%s6763_s5 + $0x54] sm:$0xff]  ;;  %v4435_v61 = vld [vmem:[%s6763_s5 + $0x5c] sm:$0xf] }
  0xb7   : > { %1002 = vmatmul.bf16.gmra.mxu0 %v6801_v0  ;;  %1419 = vmatpush.bf16.msrb.mxu3 %v4723_v13  ;;  %v5814_v13 = vld [vmem:[#allocation9 + $0x10c] sm:$0xf]  ;;  %v4531_v21 = vor.u32 %v5782_v16, %v4528_v17  ;;  %v4919_v11 = vld [vmem:[#allocation9 + $0x1e8] sm:$0xf]  ;;  %v5910_v12 = vld [vmem:[#allocation9 + $0x1f4] sm:$0xf0] }
  0xb8   : > { %1058 = vmatmul.bf16.gmra.mxu1 %v6804_v1  ;;  %1231 = vmatpush.bf16.msrb.mxu0 %v4575_v38  ;;  %v4659_v18 = vor.u32 %v5814_v13, %v4656_v15  ;;  %v5908_v62 = vld [vmem:[#allocation9 + $0x1ec] sm:$0xf]  ;;  %v4920_v15 = vor.u32 %v5910_v12, %v4919_v11  ;;  %v5907_v16 = vld [vmem:[#allocation9 + $0x1e4] sm:$0xf]  ;;  %v4913_v17 = vld [vmem:[#allocation9 + $0x1f0] sm:$0xf0] }
  0xb9   : > { %1114 = vmatmul.bf16.gmra.mxu2 %v6801_v0  ;;  %1294 = vmatpush.bf16.msrb.mxu1 %v4703_v32  ;;  %v5784_v32 = vld [vmem:[#allocation9 + $0x14] sm:$0xf0]  ;;  %v4903_v11 = vld [vmem:[#allocation9 + $0x1c8] sm:$0xf] }
  0xba   : > { %1177 = vmatmul.bf16.gmra.mxu3 %v6804_v1  ;;  %1357 = vmatpush.bf16.msrb.mxu2 %v4579_v29  ;;  %v4527_v38 = vor.u32 %v5784_v32, %v4526_v31 }
  0xbb   : > { %1420 = vmatpush.bf16.msrb.mxu3 %v4707_v28 }
  0xbc   : > { %1232 = vmatpush.bf16.msrb.mxu0 %v4559_v55 }
  0xbd   : > { %1295 = vmatpush.bf16.msrb.mxu1 %v4687_v50 }
  0xbe   : > { %1358 = vmatpush.bf16.msrb.mxu2 %v4563_v48 }
  0xbf   : > { %1421 = vmatpush.bf16.msrb.mxu3 %v4691_v41 }
  0xc0   : > { %1233 = vmatpush.bf16.msrb.mxu0 %v4543_v14  ;;  %v560_v14 = vunpack.c.l.b16 %v4435_v61 }
  0xc1   : > { %1296 = vmatpush.bf16.msrb.mxu1 %v4671_v2 }
  0xc2   : > { %1359 = vmatpush.bf16.msrb.mxu2 %v4547_v63  ;;  %v4921_v63 = vld [vmem:[#allocation9 + $0x1f8] sm:$0xf0] }
  0xc3   : > { %1422 = vmatpush.bf16.msrb.mxu3 %v4675_v59 }
  0xc4   : > { %1234 = vmatpush.bf16.msrb.mxu0 %v4527_v38 }
  0xc5   : > { %1297 = vmatpush.bf16.msrb.mxu1 %v4655_v24 }
  0xc6   : > { %1360 = vmatpush.bf16.msrb.mxu2 %v4531_v21  ;;  %v4916_v21 = vor.u32 %v5907_v16, %v4913_v17 }
  0xc7   : > { %1006 = vmatmul.bf16.gmra.mxu0 %v6811_v8  ;;  %1423 = vmatpush.bf16.msrb.mxu3 %v4659_v18 }
  0xc8   : > { %1062 = vmatmul.bf16.gmra.mxu1 %v6814_v9 }
  0xc9   : > { %1119 = vmatmul.bf16.gmra.mxu2 %v6811_v8  ;;  %1995 = vmatpush.bf16.msra.mxu1 %v4916_v21 }
  0xca   : > { %1182 = vmatmul.bf16.gmra.mxu3 %v6814_v9  ;;  %2013 = vmatpush.bf16.msra.mxu2 %v4920_v15 }
  0xd7   : > { %1010 = vmatmul.bf16.gmra.mxu0 %v6821_v19 }
  0xd8   : > { %1066 = vmatmul.bf16.gmra.mxu1 %v6824_v20 }
  0xd9   : > { %1124 = vmatmul.bf16.gmra.mxu2 %v6821_v19 }
  0xda   : > { %1187 = vmatmul.bf16.gmra.mxu3 %v6824_v20 }
  0xe7   : > { %1015 = vmatmul.bf16.gmra.mxu0 %v6831_v33 }
  0xe8   : > { %1071 = vmatmul.bf16.gmra.mxu1 %v6834_v34 }
  0xe9   : > { %1129 = vmatmul.bf16.gmra.mxu2 %v6831_v33 }
  0xea   : > { %1192 = vmatmul.bf16.gmra.mxu3 %v6834_v34 }
  0xf7   : > { %1019 = vmatmul.bf16.gmra.mxu0 %v6841_v42 }
  0xf8   : > { %1075 = vmatmul.bf16.gmra.mxu1 %v6844_v44 }
  0xf9   : > { %1134 = vmatmul.bf16.gmra.mxu2 %v6841_v42 }
  0xfa   : > { %1197 = vmatmul.bf16.gmra.mxu3 %v6844_v44 }
 0x107   : > { %1023 = vmatmul.bf16.gmra.mxu0 %v6851_v51 }
 0x108   : > { %1079 = vmatmul.bf16.gmra.mxu1 %v6854_v52 }
 0x109   : > { %1139 = vmatmul.bf16.gmra.mxu2 %v6851_v51 }
 0x10a   : > { %1202 = vmatmul.bf16.gmra.mxu3 %v6854_v52 }
 0x117   : > { %1028 = vmatmul.bf16.gmra.mxu0 %v6861_v3 }
 0x118   : > { %1084 = vmatmul.bf16.gmra.mxu1 %v6864_v4 }
 0x119   : > { %1144 = vmatmul.bf16.gmra.mxu2 %v6861_v3 }
 0x11a   : > { %1207 = vmatmul.bf16.gmra.mxu3 %v6864_v4 }
 0x124   : > { %v998_v6 = vpop.f32.mrf.mxu0 }
 0x125   : > { %v1054_v10 = vpop.f32.mrf.mxu1 }
 0x126   : > { %v1055_v48 = vadd.f32 %v1054_v10, %v998_v6  ;;  %v518_v6 = vunpack.c.l.b16 %v454_v57  ;;  %v4924_v10 = vor.u32 %v5908_v62, %v4921_v63  ;;  %v5904_v63 = vld [vmem:[#allocation9 + $0x1cc] sm:$0xf] }
 0x127   : > { %1032 = vmatmul.bf16.gmra.mxu0 %v6871_v5 }
 0x128   : > { %1088 = vmatmul.bf16.gmra.mxu1 %v6874_v7  ;;  %2031 = vmatpush.bf16.msra.mxu3 %v4924_v10  ;;  %v6904_v23 = vpack.c.b16 %v518_v6, %v518_v6 }
 0x129   : > { %1149 = vmatmul.bf16.gmra.mxu2 %v6871_v5 }
 0x12a   : > { %1212 = vmatmul.bf16.gmra.mxu3 %v6874_v7 }
 0x12c   : > { %v1110_v25 = vpop.f32.mrf.mxu2  ;;  %v1000_v27 = vpop.f32.mrf.mxu0 }
 0x12d   : > { %v1173_v26 = vpop.f32.mrf.mxu3  ;;  %v1056_v28 = vpop.f32.mrf.mxu1 }
 0x12e   : > { %v1174_v29 = vadd.f32 %v1173_v26, %v1110_v25  ;;  %v1057_v13 = vadd.f32 %v1056_v28, %v1000_v27 }
 0x130   : > { %v1501_v46 = vrot.slane %v1174_v29, 1  ;;  %v6907_v29 = vpack.c.b16 %v560_v14, %v560_v14  ;;  %v4897_v14 = vld [vmem:[#allocation9 + $0x1d0] sm:$0xf0] }
 0x134   : > { %v1112_v35 = vpop.f32.mrf.mxu2  ;;  %v1003_v41 = vpop.f32.mrf.mxu0 }
 0x135   : > { %v1175_v36 = vpop.f32.mrf.mxu3  ;;  %v1059_v45 = vpop.f32.mrf.mxu1  ;;  %v4911_v41 = vld [vmem:[#allocation9 + $0x1e0] sm:$0xf] }
 0x136   : > { %v1176_v40 = vadd.f32 %v1175_v36, %v1112_v35  ;;  %v5909_v45 = vld [vmem:[#allocation9 + $0x1ec] sm:$0xf0] }
 0x137   : > { %1036 = vmatmul.bf16.gmra.mxu0 %v6881_v30 }
 0x138   : > { %v1502_v47 = vrot.slane %v1176_v40, 1  ;;  %1092 = vmatmul.bf16.gmra.mxu1 %v6884_v37 }
 0x139   : > { %1154 = vmatmul.bf16.gmra.mxu2 %v6881_v30 }
 0x13a   : > { %v1503_v50 = vsel %vm1500_vm0, %v1501_v46, %v1502_v47  ;;  %1217 = vmatmul.bf16.gmra.mxu3 %v6884_v37 }
 0x13b   : > { %v1550_v53 = vadd.f32 %v1503_v50, %v1055_v48  ;;  %v4912_v48 = vor.u32 %v5909_v45, %v4911_v41 }
 0x13c   : > { %v1115_v55 = vpop.f32.mrf.mxu2  ;;  %v1004_v59 = vpop.f32.mrf.mxu0 }
 0x13d   : > { %v1567_v54 = vadd.f32 %v6891_v49, %v1550_v53  ;;  %v1178_v56 = vpop.f32.mrf.mxu3  ;;  %v1060_v60 = vpop.f32.mrf.mxu1  ;;  %1978 = vmatpush.bf16.msra.mxu0 %v4912_v48 }
 0x13e   : > { %v1179_v58 = vadd.f32 %v1178_v56, %v1115_v55  ;;  %v1061_v50 = vadd.f32 %v1060_v60, %v1004_v59  ;;  %v5906_v59 = vld [vmem:[#allocation9 + $0x1d4] sm:$0xf0] }
 0x13f   : > { %1581 = vst [vmem:[%s6900_s9] sm:$0xff] %v1567_v54  ;;  %v4904_v12 = vor.u32 %v5906_v59, %v4903_v11 }
 0x140   : > { %v1504_v2 = vrot.slane %v1179_v58, 1 }
 0x141   : > { %2014 = vmatpush.bf16.msra.mxu2 %v4904_v12 }
 0x142   : > { %v1505_v18 = vsel %vm1500_vm0, %v1502_v47, %v1504_v2  ;;  %v4905_v2 = vld [vmem:[#allocation9 + $0x1d8] sm:$0xf0] }
 0x143   : > { %v1551_v22 = vadd.f32 %v1505_v18, %v1057_v13  ;;  %v4908_v10 = vor.u32 %v5904_v63, %v4905_v2  ;;  %v5903_v13 = vld [vmem:[#allocation9 + $0x1c4] sm:$0xf]  ;;  %v5902_v63 = vld [vmem:[#allocation9 + $0x1b4] sm:$0xf0] }
 0x144   : > { %v1117_v25 = vpop.f32.mrf.mxu2  ;;  %v1007_v27 = vpop.f32.mrf.mxu0  ;;  %v4900_v16 = vor.u32 %v5903_v13, %v4897_v14 }
 0x145   : > { %v1568_v24 = vadd.f32 %v6891_v49, %v1551_v22  ;;  %v1180_v26 = vpop.f32.mrf.mxu3  ;;  %v1063_v28 = vpop.f32.mrf.mxu1  ;;  %2032 = vmatpush.bf16.msra.mxu3 %v4908_v10 }
 0x146   : > { %v1181_v31 = vadd.f32 %v1180_v26, %v1117_v25  ;;  %v1064_v60 = vadd.f32 %v1063_v28, %v1007_v27  ;;  %1996 = vmatpush.bf16.msra.mxu1 %v4900_v16 }
 0x147   : > { %1582 = vst [vmem:[%s6900_s9 + $0x8] sm:$0xff] %v1568_v24  ;;  %1041 = vmatmul.bf16.gmra.mxu0 %v6904_v23 }
 0x148   : > { %1097 = vmatmul.bf16.gmra.mxu1 %v6907_v29  ;;  %v1506_v46 = vrot.slane %v1181_v31, 1 }
 0x149   : > { %1159 = vmatmul.bf16.gmra.mxu2 %v6904_v23 }
 0x14a   : > { %1222 = vmatmul.bf16.gmra.mxu3 %v6907_v29 }
 0x14c   : > { %v1120_v32 = vpop.f32.mrf.mxu2  ;;  %v1009_v38 = vpop.f32.mrf.mxu0 }
 0x14d   : > { %v1183_v35 = vpop.f32.mrf.mxu3  ;;  %v1065_v40 = vpop.f32.mrf.mxu1 }
 0x14e   : > { %v1184_v36 = vadd.f32 %v1183_v35, %v1120_v32  ;;  %v4895_v35 = vld [vmem:[#allocation9 + $0x1c0] sm:$0xf] }
 0x150   : > { %v1507_v47 = vrot.slane %v1184_v36, 1 }
 0x152   : > { %v1508_v53 = vsel %vm1500_vm0, %v1506_v46, %v1507_v47 }
 0x153   : > { %v1552_v54 = vadd.f32 %v1508_v53, %v1061_v50 }
 0x154   : > { %v1122_v56 = vpop.f32.mrf.mxu2  ;;  %v1011_v61 = vpop.f32.mrf.mxu0 }
 0x155   : > { %v1569_v55 = vadd.f32 %v6891_v49, %v1552_v54  ;;  %v1185_v57 = vpop.f32.mrf.mxu3  ;;  %v1067_v62 = vpop.f32.mrf.mxu1 }
 0x156   : > { %v1186_v58 = vadd.f32 %v1185_v57, %v1122_v56  ;;  %v1068_v41 = vadd.f32 %v1067_v62, %v1011_v61  ;;  %v5900_v56 = vld [vmem:[#allocation9 + $0x1ac] sm:$0xf]  ;;  %v4889_v57 = vld [vmem:[#allocation9 + $0x1b8] sm:$0xf0]  ;;  %v4887_v62 = vld [vmem:[#allocation9 + $0x1a8] sm:$0xf] }
 0x157   : > { %1583 = vst [vmem:[%s6900_s9 + $0x10] sm:$0xff] %v1569_v55  ;;  %1235 = vmatmul.bf16.vlgmr.msrb.gmra.mxu0 %v6791_v39  ;;  %v4892_v61 = vor.u32 %v5900_v56, %v4889_v57  ;;  %v4888_v2 = vor.u32 %v5902_v63, %v4887_v62  ;;  %v5897_v62 = vld [vmem:[#allocation9 + $0x18c] sm:$0xf0] }
 0x158   : > { %v1509_v6 = vrot.slane %v1186_v58, 1  ;;  %1298 = vmatmul.bf16.vlgmr.msrb.gmra.mxu1 %v6794_v43 }
 0x159   : > { %1361 = vmatmul.bf16.vlgmr.msrb.gmra.mxu2 %v6791_v39  ;;  %2033 = vmatpush.bf16.msra.mxu3 %v4892_v61  ;;  %v4863_v61 = vld [vmem:[#allocation9 + $0x180] sm:$0xf] }
 0x15a   : > { %v1510_v15 = vsel %vm1500_vm0, %v1507_v47, %v1509_v6  ;;  %1424 = vmatmul.bf16.vlgmr.msrb.gmra.mxu3 %v6794_v43  ;;  %v5905_v43 = vld [vmem:[#allocation9 + $0x1cc] sm:$0xf0]  ;;  %v4881_v6 = vld [vmem:[#allocation9 + $0x1b0] sm:$0xf0]  ;;  %2015 = vmatpush.bf16.msra.mxu2 %v4888_v2 }
 0x15b   : > { %v1553_v17 = vadd.f32 %v1510_v15, %v1064_v60  ;;  %v4896_v40 = vor.u32 %v5905_v43, %v4895_v35 }
 0x15c   : > { %v1125_v21 = vpop.f32.mrf.mxu2  ;;  %v1013_v24 = vpop.f32.mrf.mxu0 }
 0x15d   : > { %v1570_v18 = vadd.f32 %v6891_v49, %v1553_v17  ;;  %v1188_v22 = vpop.f32.mrf.mxu3  ;;  %v1069_v25 = vpop.f32.mrf.mxu1  ;;  %1979 = vmatpush.bf16.msra.mxu0 %v4896_v40 }
 0x15e   : > { %v1189_v26 = vadd.f32 %v1188_v22, %v1125_v21 }
 0x15f   : > { %1584 = vst [vmem:[%s6900_s9 + $0x18] sm:$0xff] %v1570_v18 }
 0x160   : > { %v1511_v36 = vrot.slane %v1189_v26, 1  ;;  %v5901_v26 = vld [vmem:[#allocation9 + $0x1ac] sm:$0xf0] }
 0x164   : > { %v1127_v27 = vpop.f32.mrf.mxu2  ;;  %v1016_v32 = vpop.f32.mrf.mxu0 }
 0x165   : > { %v1190_v28 = vpop.f32.mrf.mxu3  ;;  %v1072_v39 = vpop.f32.mrf.mxu1 }
 0x166   : > { %v1191_v31 = vadd.f32 %v1190_v28, %v1127_v27  ;;  %v5896_v27 = vld [vmem:[#allocation9 + $0x18c] sm:$0xf]  ;;  %v4873_v39 = vld [vmem:[#allocation9 + $0x198] sm:$0xf0] }
 0x167   : > { %1240 = vmatmul.bf16.gmra.mxu0 %v6801_v0  ;;  %v4876_v43 = vor.u32 %v5896_v27, %v4873_v39  ;;  %v4855_v39 = vld [vmem:[#allocation9 + $0x168] sm:$0xf] }
 0x168   : > { %v1512_v38 = vrot.slane %v1191_v31, 1  ;;  %1303 = vmatmul.bf16.gmra.mxu1 %v6804_v1 }
 0x169   : > { %1366 = vmatmul.bf16.gmra.mxu2 %v6801_v0  ;;  %v1070_v0 = vadd.f32 %v1069_v25, %v1013_v24  ;;  %v4879_v25 = vld [vmem:[#allocation9 + $0x1a0] sm:$0xf]  ;;  %2034 = vmatpush.bf16.msra.mxu3 %v4876_v43 }
 0x16a   : > { %v1513_v45 = vsel %vm1500_vm0, %v1511_v36, %v1512_v38  ;;  %1429 = vmatmul.bf16.gmra.mxu3 %v6804_v1  ;;  %v5899_v1 = vld [vmem:[#allocation9 + $0x1a4] sm:$0xf]  ;;  %v4880_v32 = vor.u32 %v5901_v26, %v4879_v25 }
 0x16b   : > { %v1554_v46 = vadd.f32 %v1513_v45, %v1068_v41  ;;  %v4884_v11 = vor.u32 %v5899_v1, %v4881_v6 }
 0x16c   : > { %v1130_v48 = vpop.f32.mrf.mxu2  ;;  %v1017_v54 = vpop.f32.mrf.mxu0  ;;  %1980 = vmatpush.bf16.msra.mxu0 %v4880_v32 }
 0x16d   : > { %v1571_v47 = vadd.f32 %v6891_v49, %v1554_v46  ;;  %v1193_v50 = vpop.f32.mrf.mxu3  ;;  %v1073_v55 = vpop.f32.mrf.mxu1  ;;  %1997 = vmatpush.bf16.msra.mxu1 %v4884_v11 }
 0x16e   : > { %v1194_v53 = vadd.f32 %v1193_v50, %v1130_v48  ;;  %v1074_v35 = vadd.f32 %v1073_v55, %v1017_v54  ;;  %v5898_v48 = vld [vmem:[#allocation9 + $0x194] sm:$0xf0]  ;;  %v5895_v54 = vld [vmem:[#allocation9 + $0x184] sm:$0xf]  ;;  %v4865_v55 = vld [vmem:[#allocation9 + $0x190] sm:$0xf0] }
 0x16f   : > { %1585 = vst [vmem:[%s6900_s9 + $0x20] sm:$0xff] %v1571_v47  ;;  %v4871_v47 = vld [vmem:[#allocation9 + $0x188] sm:$0xf]  ;;  %v4868_v57 = vor.u32 %v5895_v54, %v4865_v55 }
 0x170   : > { %v1514_v58 = vrot.slane %v1194_v53, 1  ;;  %v4872_v53 = vor.u32 %v5898_v48, %v4871_v47 }
 0x171   : > { %1998 = vmatpush.bf16.msra.mxu1 %v4868_v57 }
 0x172   : > { %v1515_v10 = vsel %vm1500_vm0, %v1512_v38, %v1514_v58  ;;  %2016 = vmatpush.bf16.msra.mxu2 %v4872_v53 }
 0x173   : > { %v1555_v59 = vadd.f32 %v1515_v10, %v1070_v0  ;;  %v4864_v0 = vor.u32 %v5897_v62, %v4863_v61 }
 0x174   : > { %v1132_v12 = vpop.f32.mrf.mxu2  ;;  %v1020_v14 = vpop.f32.mrf.mxu0 }
 0x175   : > { %v1572_v60 = vadd.f32 %v6891_v49, %v1555_v59  ;;  %v1195_v13 = vpop.f32.mrf.mxu3  ;;  %v1076_v15 = vpop.f32.mrf.mxu1  ;;  %1981 = vmatpush.bf16.msra.mxu0 %v4864_v0  ;;  %v4841_v0 = vld [vmem:[#allocation9 + $0x158] sm:$0xf0] }
 0x176   : > { %v1196_v16 = vadd.f32 %v1195_v13, %v1132_v12  ;;  %v1077_v56 = vadd.f32 %v1076_v15, %v1020_v14  ;;  %v5892_v14 = vld [vmem:[#allocation9 + $0x16c] sm:$0xf]  ;;  %v4857_v15 = vld [vmem:[#allocation9 + $0x178] sm:$0xf0] }
 0x177   : > { %1586 = vst [vmem:[%s6900_s9 + $0x28] sm:$0xff] %v1572_v60  ;;  %1245 = vmatmul.bf16.gmra.mxu0 %v6811_v8 }
 0x178   : > { %1308 = vmatmul.bf16.gmra.mxu1 %v6814_v9  ;;  %v1516_v28 = vrot.slane %v1196_v16, 1 }
 0x179   : > { %1371 = vmatmul.bf16.gmra.mxu2 %v6811_v8 }
 0x17a   : > { %1434 = vmatmul.bf16.gmra.mxu3 %v6814_v9 }
 0x17c   : > { %v1135_v17 = vpop.f32.mrf.mxu2  ;;  %v1022_v22 = vpop.f32.mrf.mxu0 }
 0x17d   : > { %v1198_v18 = vpop.f32.mrf.mxu3  ;;  %v1078_v24 = vpop.f32.mrf.mxu1 }
 0x17e   : > { %v1199_v21 = vadd.f32 %v1198_v18, %v1135_v17  ;;  %v4860_v18 = vor.u32 %v5892_v14, %v4857_v15 }
 0x180   : > { %v1517_v31 = vrot.slane %v1199_v21, 1  ;;  %2035 = vmatpush.bf16.msra.mxu3 %v4860_v18 }
 0x182   : > { %v1518_v8 = vsel %vm1500_vm0, %v1516_v28, %v1517_v31 }
 0x183   : > { %v1556_v9 = vadd.f32 %v1518_v8, %v1074_v35  ;;  %v5894_v35 = vld [vmem:[#allocation9 + $0x174] sm:$0xf0] }
 0x184   : > { %v1137_v38 = vpop.f32.mrf.mxu2  ;;  %v1024_v45 = vpop.f32.mrf.mxu0  ;;  %v4856_v8 = vor.u32 %v5894_v35, %v4855_v39 }
 0x185   : > { %v1573_v36 = vadd.f32 %v6891_v49, %v1556_v9  ;;  %v1200_v40 = vpop.f32.mrf.mxu3  ;;  %v1080_v46 = vpop.f32.mrf.mxu1  ;;  %v5891_v9 = vld [vmem:[#allocation9 + $0x164] sm:$0xf] }
 0x186   : > { %v1201_v41 = vadd.f32 %v1200_v40, %v1137_v38  ;;  %v1081_v21 = vadd.f32 %v1080_v46, %v1024_v45  ;;  %v5893_v40 = vld [vmem:[#allocation9 + $0x16c] sm:$0xf0]  ;;  %2017 = vmatpush.bf16.msra.mxu2 %v4856_v8  ;;  %v5884_v8 = vld [vmem:[#allocation9 + $0x12c] sm:$0xf] }
 0x187   : > { %1587 = vst [vmem:[%s6900_s9 + $0x30] sm:$0xff] %v1573_v36  ;;  %1250 = vmatmul.bf16.gmra.mxu0 %v6821_v19  ;;  %v4849_v36 = vld [vmem:[#allocation9 + $0x170] sm:$0xf0] }
 0x188   : > { %v1519_v50 = vrot.slane %v1201_v41, 1  ;;  %1313 = vmatmul.bf16.gmra.mxu1 %v6824_v20  ;;  %v4852_v38 = vor.u32 %v5891_v9, %v4849_v36  ;;  %v4825_v9 = vld [vmem:[#allocation9 + $0x138] sm:$0xf0] }
 0x189   : > { %1376 = vmatmul.bf16.gmra.mxu2 %v6821_v19  ;;  %v4828_v36 = vor.u32 %v5884_v8, %v4825_v9 }
 0x18a   : > { %v1520_v58 = vsel %vm1500_vm0, %v1517_v31, %v1519_v50  ;;  %1439 = vmatmul.bf16.gmra.mxu3 %v6824_v20  ;;  %1999 = vmatpush.bf16.msra.mxu1 %v4852_v38  ;;  %v5886_v38 = vld [vmem:[#allocation9 + $0x134] sm:$0xf0] }
 0x18b   : > { %v1557_v63 = vadd.f32 %v1520_v58, %v1077_v56 }
 0x18c   : > { %v1140_v1 = vpop.f32.mrf.mxu2  ;;  %v1026_v10 = vpop.f32.mrf.mxu0 }
 0x18d   : > { %v1574_v2 = vadd.f32 %v6891_v49, %v1557_v63  ;;  %v1203_v6 = vpop.f32.mrf.mxu3  ;;  %v1082_v11 = vpop.f32.mrf.mxu1  ;;  %v5888_v63 = vld [vmem:[#allocation9 + $0x14c] sm:$0xf] }
 0x18e   : > { %v1204_v59 = vadd.f32 %v1203_v6, %v1140_v1 }
 0x18f   : > { %1588 = vst [vmem:[%s6900_s9 + $0x38] sm:$0xff] %v1574_v2  ;;  %v4839_v2 = vld [vmem:[#allocation9 + $0x148] sm:$0xf] }
 0x190   : > { %v1521_v16 = vrot.slane %v1204_v59, 1 }
 0x194   : > { %v1142_v60 = vpop.f32.mrf.mxu2  ;;  %v1029_v13 = vpop.f32.mrf.mxu0 }
 0x195   : > { %v1205_v12 = vpop.f32.mrf.mxu3  ;;  %v1085_v20 = vpop.f32.mrf.mxu1 }
 0x196   : > { %v1206_v19 = vadd.f32 %v1205_v12, %v1142_v60 }
 0x197   : > { %1255 = vmatmul.bf16.gmra.mxu0 %v6831_v33 }
 0x198   : > { %v1522_v17 = vrot.slane %v1206_v19, 1  ;;  %1318 = vmatmul.bf16.gmra.mxu1 %v6834_v34 }
 0x199   : > { %1381 = vmatmul.bf16.gmra.mxu2 %v6831_v33  ;;  %v1083_v33 = vadd.f32 %v1082_v11, %v1026_v10  ;;  %v4844_v10 = vor.u32 %v5888_v63, %v4841_v0  ;;  %v5890_v11 = vld [vmem:[#allocation9 + $0x154] sm:$0xf0] }
 0x19a   : > { %v1523_v22 = vsel %vm1500_vm0, %v1521_v16, %v1522_v17  ;;  %1444 = vmatmul.bf16.gmra.mxu3 %v6834_v34  ;;  %v4847_v34 = vld [vmem:[#allocation9 + $0x160] sm:$0xf]  ;;  %v4840_v60 = vor.u32 %v5890_v11, %v4839_v2  ;;  %v5887_v16 = vld [vmem:[#allocation9 + $0x144] sm:$0xf] }
 0x19b   : > { %v1558_v24 = vadd.f32 %v1523_v22, %v1081_v21  ;;  %v4848_v45 = vor.u32 %v5893_v40, %v4847_v34  ;;  %2036 = vmatpush.bf16.msra.mxu3 %v4844_v10  ;;  %v4831_v22 = vld [vmem:[#allocation9 + $0x140] sm:$0xf]  ;;  %v5883_v34 = vld [vmem:[#allocation9 + $0x124] sm:$0xf] }
 0x19c   : > { %v1145_v26 = vpop.f32.mrf.mxu2  ;;  %v1030_v31 = vpop.f32.mrf.mxu0  ;;  %2018 = vmatpush.bf16.msra.mxu2 %v4840_v60 }
 0x19d   : > { %v1575_v25 = vadd.f32 %v6891_v49, %v1558_v24  ;;  %v1208_v27 = vpop.f32.mrf.mxu3  ;;  %v1086_v32 = vpop.f32.mrf.mxu1  ;;  %1982 = vmatpush.bf16.msra.mxu0 %v4848_v45  ;;  %v5889_v24 = vld [vmem:[#allocation9 + $0x14c] sm:$0xf0] }
 0x19e   : > { %v1209_v28 = vadd.f32 %v1208_v27, %v1145_v26  ;;  %v1087_v59 = vadd.f32 %v1086_v32, %v1030_v31  ;;  %v4832_v26 = vor.u32 %v5889_v24, %v4831_v22 }
 0x19f   : > { %1589 = vst [vmem:[%s6900_s9 + $0x40] sm:$0xff] %v1575_v25  ;;  %2037 = vmatpush.bf16.msra.mxu3 %v4828_v36 }
 0x1a0   : > { %v1524_v43 = vrot.slane %v1209_v28, 1 }
 0x1a1   : > { %1983 = vmatpush.bf16.msra.mxu0 %v4832_v26 }
 0x1a2   : > { %v1525_v41 = vsel %vm1500_vm0, %v1522_v17, %v1524_v43  ;;  %v4833_v17 = vld [vmem:[#allocation9 + $0x150] sm:$0xf0] }
 0x1a3   : > { %v1559_v46 = vadd.f32 %v1525_v41, %v1083_v33  ;;  %v4836_v21 = vor.u32 %v5887_v16, %v4833_v17  ;;  %v4823_v33 = vld [vmem:[#allocation9 + $0x128] sm:$0xf]  ;;  %v5882_v16 = vld [vmem:[#allocation9 + $0x114] sm:$0xf0] }
 0x1a4   : > { %v1147_v48 = vpop.f32.mrf.mxu2  ;;  %v1033_v53 = vpop.f32.mrf.mxu0  ;;  %v4824_v40 = vor.u32 %v5886_v38, %v4823_v33  ;;  %v5876_v38 = vld [vmem:[#allocation9 + $0xec] sm:$0xf] }
 0x1a5   : > { %v1576_v47 = vadd.f32 %v6891_v49, %v1559_v46  ;;  %v1210_v50 = vpop.f32.mrf.mxu3  ;;  %v1089_v54 = vpop.f32.mrf.mxu1  ;;  %2000 = vmatpush.bf16.msra.mxu1 %v4836_v21  ;;  %v4801_v21 = vld [vmem:[#allocation9 + $0x110] sm:$0xf0] }
 0x1a6   : > { %v1211_v55 = vadd.f32 %v1210_v50, %v1147_v48  ;;  %v1090_v25 = vadd.f32 %v1089_v54, %v1033_v53  ;;  %2019 = vmatpush.bf16.msra.mxu2 %v4824_v40 }
 0x1a7   : > { %1590 = vst [vmem:[%s6900_s9 + $0x48] sm:$0xff] %v1576_v47  ;;  %1260 = vmatmul.bf16.gmra.mxu0 %v6841_v42 }
 0x1a8   : > { %1323 = vmatmul.bf16.gmra.mxu1 %v6844_v44  ;;  %v1526_v1 = vrot.slane %v1211_v55, 1 }
 0x1a9   : > { %1386 = vmatmul.bf16.gmra.mxu2 %v6841_v42 }
 0x1aa   : > { %1449 = vmatmul.bf16.gmra.mxu3 %v6844_v44 }
 0x1ac   : > { %v1150_v56 = vpop.f32.mrf.mxu2  ;;  %v1035_v61 = vpop.f32.mrf.mxu0 }
 0x1ad   : > { %v1213_v57 = vpop.f32.mrf.mxu3  ;;  %v1091_v62 = vpop.f32.mrf.mxu1 }
 0x1ae   : > { %v1214_v58 = vadd.f32 %v1213_v57, %v1150_v56 }
 0x1b0   : > { %v1527_v6 = vrot.slane %v1214_v58, 1 }
 0x1b2   : > { %v1528_v42 = vsel %vm1500_vm0, %v1526_v1, %v1527_v6 }
 0x1b3   : > { %v1560_v44 = vadd.f32 %v1528_v42, %v1087_v59 }
 0x1b4   : > { %v1152_v19 = vpop.f32.mrf.mxu2  ;;  %v1037_v14 = vpop.f32.mrf.mxu0 }
 0x1b5   : > { %v1577_v12 = vadd.f32 %v6891_v49, %v1560_v44  ;;  %v1215_v13 = vpop.f32.mrf.mxu3  ;;  %v1093_v15 = vpop.f32.mrf.mxu1  ;;  %v4815_v44 = vld [vmem:[#allocation9 + $0x120] sm:$0xf] }
 0x1b6   : > { %v1216_v20 = vadd.f32 %v1215_v13, %v1152_v19  ;;  %v1094_v55 = vadd.f32 %v1093_v15, %v1037_v14  ;;  %v5880_v13 = vld [vmem:[#allocation9 + $0x10c] sm:$0xf]  ;;  %v4807_v14 = vld [vmem:[#allocation9 + $0x108] sm:$0xf] }
 0x1b7   : > { %1591 = vst [vmem:[%s6900_s9 + $0x50] sm:$0xff] %v1577_v12  ;;  %1265 = vmatmul.bf16.gmra.mxu0 %v6851_v51  ;;  %v5885_v12 = vld [vmem:[#allocation9 + $0x12c] sm:$0xf0]  ;;  %v4808_v17 = vor.u32 %v5882_v16, %v4807_v14  ;;  %v5011_v16 = vld [vmem:[#allocation9 + $0xa0] sm:$0xf] }
 0x1b8   : > { %v1529_v18 = vrot.slane %v1216_v20, 1  ;;  %1328 = vmatmul.bf16.gmra.mxu1 %v6854_v52  ;;  %v4816_v19 = vor.u32 %v5885_v12, %v4815_v44  ;;  %v4809_v20 = vld [vmem:[#allocation9 + $0x118] sm:$0xf0]  ;;  %v421_v44 = vld [vmem:[%s341_s26 + $0x8] sm:$0xf] }
 0x1b9   : > { %1391 = vmatmul.bf16.gmra.mxu2 %v6851_v51  ;;  %v4817_v51 = vld [vmem:[#allocation9 + $0x130] sm:$0xf0]  ;;  %v4812_v15 = vor.u32 %v5880_v13, %v4809_v20  ;;  %v5868_v13 = vld [vmem:[#allocation9 + $0xac] sm:$0xf]  ;;  %v5021_v20 = vld [vmem:[#allocation9 + $0xb8] sm:$0xf0] }
 0x1ba   : > { %v1530_v27 = vsel %vm1500_vm0, %v1527_v6, %v1529_v18  ;;  %1454 = vmatmul.bf16.gmra.mxu3 %v6854_v52  ;;  %v4820_v52 = vor.u32 %v5883_v34, %v4817_v51  ;;  %v5879_v18 = vld [vmem:[#allocation9 + $0x104] sm:$0xf]  ;;  %1984 = vmatpush.bf16.msra.mxu0 %v4816_v19  ;;  %v5053_v34 = vld [vmem:[#allocation9 + $0xf8] sm:$0xf0]  ;;  %425 = vst [vmem:[#allocation2 + $0x20] sm:$0xf] %v421_v44 }
 0x1bb   : > { %v1561_v28 = vadd.f32 %v1530_v27, %v1090_v25  ;;  %2038 = vmatpush.bf16.msra.mxu3 %v4812_v15  ;;  %v4804_v22 = vor.u32 %v5879_v18, %v4801_v21  ;;  %2020 = vmatpush.bf16.msra.mxu2 %v4808_v17  ;;  %v5056_v51 = vor.u32 %v5876_v38, %v5053_v34  ;;  %v5869_v17 = vld [vmem:[#allocation9 + $0xac] sm:$0xf0]  ;;  %v5867_v18 = vld [vmem:[#allocation9 + $0xa4] sm:$0xf]  ;;  %v4997_v34 = vld [vmem:[#allocation9 + $0x90] sm:$0xf0] }
 0x1bc   : > { %v1155_v32 = vpop.f32.mrf.mxu2  ;;  %v1039_v35 = vpop.f32.mrf.mxu0  ;;  %2001 = vmatpush.bf16.msra.mxu1 %v4820_v52  ;;  %v5043_v52 = vld [vmem:[#allocation9 + $0xe0] sm:$0xf]  ;;  %v5024_v15 = vor.u32 %v5868_v13, %v5021_v20  ;;  %v5863_v38 = vld [vmem:[#allocation9 + $0x84] sm:$0xf] }
 0x1bd   : > { %v1578_v31 = vadd.f32 %v6891_v49, %v1561_v28  ;;  %v1218_v39 = vpop.f32.mrf.mxu3  ;;  %v1095_v43 = vpop.f32.mrf.mxu1  ;;  %v419_v28 = vld [vmem:[%s341_s26] sm:$0xff]  }
 0x1be   : > { %v1219_v41 = vadd.f32 %v1218_v39, %v1155_v32  ;;  %v1096_v6 = vadd.f32 %v1095_v43, %v1039_v35  ;;  %423 = vst [vmem:[#allocation2 + $0x18] sm:$0xff] %v419_v28   ;;  %v5019_v28 = vld [vmem:[#allocation9 + $0xa8] sm:$0xf] }
 0x1bf   : > { %1592 = vst [vmem:[%s6900_s9 + $0x58] sm:$0xff] %v1578_v31  ;;  %v4799_v31 = vld [vmem:[#allocation9 + $0x100] sm:$0xf]  ;;  %2272 = vmatpush.bf16.msrb.mxu3 %v5056_v51 }
 0x1c0   : > { %v1531_v53 = vrot.slane %v1219_v41, 1  ;;  %2002 = vmatpush.bf16.msra.mxu1 %v4804_v22  ;;  %v5877_v41 = vld [vmem:[#allocation9 + $0xec] sm:$0xf0] }
 0x1c4   : > { %v1157_v45 = vpop.f32.mrf.mxu2  ;;  %v1042_v48 = vpop.f32.mrf.mxu0 }
 0x1c5   : > { %v1220_v46 = vpop.f32.mrf.mxu3  ;;  %v1098_v50 = vpop.f32.mrf.mxu1  ;;  %v5045_v48 = vld [vmem:[#allocation9 + $0xf0] sm:$0xf0] }
 0x1c6   : > { %v1221_v47 = vadd.f32 %v1220_v46, %v1157_v45  ;;  %v5875_v45 = vld [vmem:[#allocation9 + $0xe4] sm:$0xf]  ;;  %v5051_v50 = vld [vmem:[#allocation9 + $0xe8] sm:$0xf] }
 0x1c7   : > { %1270 = vmatmul.bf16.gmra.mxu0 %v6861_v3 }
 0x1c8   : > { %v1532_v54 = vrot.slane %v1221_v47, 1  ;;  %1333 = vmatmul.bf16.gmra.mxu1 %v6864_v4  ;;  %v5044_v47 = vor.u32 %v5877_v41, %v5043_v52  ;;  %v5003_v41 = vld [vmem:[#allocation9 + $0x88] sm:$0xf] }
 0x1c9   : > { %1396 = vmatmul.bf16.gmra.mxu2 %v6861_v3 }
 0x1ca   : > { %v1533_v56 = vsel %vm1500_vm0, %v1531_v53, %v1532_v54  ;;  %1459 = vmatmul.bf16.gmra.mxu3 %v6864_v4  ;;  %v5878_v53 = vld [vmem:[#allocation9 + $0xf4] sm:$0xf0] }
 0x1cb   : > { %v1562_v57 = vadd.f32 %v1533_v56, %v1094_v55  ;;  %v5048_v55 = vor.u32 %v5875_v45, %v5045_v48  ;;  %v5052_v56 = vor.u32 %v5878_v53, %v5051_v50  ;;  %v5866_v45 = vld [vmem:[#allocation9 + $0x94] sm:$0xf0]  ;;  %v4989_v48 = vld [vmem:[#allocation9 + $0x78] sm:$0xf0]  ;;  %v4979_v53 = vld [vmem:[#allocation9 + $0x60] sm:$0xf] }
 0x1cc   : > { %v1160_v61 = vpop.f32.mrf.mxu2  ;;  %v1043_v0 = vpop.f32.mrf.mxu0 }
 0x1cd   : > { %v1579_v58 = vadd.f32 %v6891_v49, %v1562_v57  ;;  %v1223_v62 = vpop.f32.mrf.mxu3  ;;  %v1099_v2 = vpop.f32.mrf.mxu1  ;;  %v5872_v57 = vld [vmem:[#allocation9 + $0xcc] sm:$0xf]  ;;  %2236 = vmatpush.bf16.msrb.mxu1 %v5048_v55  ;;  %2254 = vmatpush.bf16.msrb.mxu2 %v5052_v56  ;;  %v5859_v55 = vld [vmem:[#allocation9 + $0x64] sm:$0xf] }
 0x1ce   : > { %v1224_v63 = vadd.f32 %v1223_v62, %v1160_v61  ;;  %v5027_v61 = vld [vmem:[#allocation9 + $0xc0] sm:$0xf]  ;;  %v5871_v2 = vld [vmem:[#allocation9 + $0xc4] sm:$0xf] }
 0x1cf   : > { %1593 = vst [vmem:[%s6900_s9 + $0x60] sm:$0xff] %v1579_v58  ;;  %v5037_v58 = vld [vmem:[#allocation9 + $0xd8] sm:$0xf0] }
 0x1d0   : > { %v1534_v1 = vrot.slane %v1224_v63, 1 }
 0x1d2   : > { %v1535_v10 = vsel %vm1500_vm0, %v1532_v54, %v1534_v1  ;;  %v5029_v1 = vld [vmem:[#allocation9 + $0xd0] sm:$0xf0] }
 0x1d3   : > { %v1563_v11 = vadd.f32 %v1535_v10, %v1096_v6 }
 0x1d4   : > { %v1162_v3 = vpop.f32.mrf.mxu2  ;;  %v1236_v4 = vpop.f32.mrf.mxu0 }
 0x1d5   : > { %v1580_v59 = vadd.f32 %v6891_v49, %v1563_v11  ;;  %v1225_v60 = vpop.f32.mrf.mxu3  ;;  %v1299_v42 = vpop.f32.mrf.mxu1  ;;  %v5032_v3 = vor.u32 %v5871_v2, %v5029_v1  ;;  %v4963_v2 = vld [vmem:[#allocation9 + $0x40] sm:$0xf] }
 0x1d6   : > { %v1300_v40 = vadd.f32 %v1299_v42, %v1236_v4  ;;  %v5035_v60 = vld [vmem:[#allocation9 + $0xc8] sm:$0xf]  ;;  %v5874_v4 = vld [vmem:[#allocation9 + $0xd4] sm:$0xf0] }
 0x1d7   : > { %1594 = vst [vmem:[%s6900_s9 + $0x68] sm:$0xff] %v1580_v59  ;;  %1275 = vmatmul.bf16.gmra.mxu0 %v6871_v5  ;;  %v5036_v42 = vor.u32 %v5874_v4, %v5035_v60  ;;  %2237 = vmatpush.bf16.msrb.mxu1 %v5032_v3  ;;  %v5855_v3 = vld [vmem:[#allocation9 + $0x44] sm:$0xf] }
 0x1d8   : > { %1338 = vmatmul.bf16.gmra.mxu1 %v6874_v7 }
 0x1d9   : > { %1401 = vmatmul.bf16.gmra.mxu2 %v6871_v5 }
 0x1da   : > { %1464 = vmatmul.bf16.gmra.mxu3 %v6874_v7  ;;  %v5881_v7 = vld [vmem:[#allocation9 + $0x10c] sm:$0xf0]  ;;  %2255 = vmatpush.bf16.msrb.mxu2 %v5036_v42 }
 0x1db   : > { %v4800_v35 = vor.u32 %v5881_v7, %v4799_v31 }
 0x1dc   : > { %v1362_v24 = vpop.f32.mrf.mxu2  ;;  %v6986_v26 = vpop.f32.mrf.mxu0 }
 0x1dd   : > { %v1425_v25 = vpop.f32.mrf.mxu3  ;;  %v6988_v27 = vpop.f32.mrf.mxu1  ;;  %1985 = vmatpush.bf16.msra.mxu0 %v4800_v35  ;;  %v4995_v35 = vld [vmem:[#allocation9 + $0x80] sm:$0xf] }
 0x1de   : > { %v1426_v5 = vadd.f32 %v1425_v25, %v1362_v24  ;;  %v1302_v14 = vadd.f32 %v6988_v27, %v6986_v26  ;;  %v5012_v24 = vor.u32 %v5869_v17, %v5011_v16  ;;  %v5013_v25 = vld [vmem:[#allocation9 + $0xb0] sm:$0xf0]  ;;  %v5864_v27 = vld [vmem:[#allocation9 + $0x8c] sm:$0xf]  ;;  %v4957_v17 = vld [vmem:[#allocation9 + $0x38] sm:$0xf0] }
 0x1df   : > { %v5016_v7 = vor.u32 %v5867_v18, %v5013_v25  ;;  %v5852_v16 = vld [vmem:[#allocation9 + $0x2c] sm:$0xf]  ;;  %v4412_v18 = vld [vmem:[%s6763_s5 + $0x54] sm:$0xff]   ;;  %v5853_v25 = vld [vmem:[#allocation9 + $0x2c] sm:$0xf0] }
 0x1e0   : > { %v1616_v36 = vrot.slane %v1426_v5, 1  ;;  %v5870_v5 = vld [vmem:[#allocation9 + $0xb4] sm:$0xf0]  ;;  %416 = vst [vmem:[#allocation2 + $0xc] sm:$0xff] %v4412_v18  }
 0x1e1   : > { %2219 = vmatpush.bf16.msrb.mxu0 %v5044_v47  ;;  %2238 = vmatpush.bf16.msrb.mxu1 %v5016_v7  ;;  %v5860_v47 = vld [vmem:[#allocation9 + $0x6c] sm:$0xf]  ;;  %v4949_v7 = vld [vmem:[#allocation9 + $0x30] sm:$0xf0] }
 0x1e2   : > { %v4992_v50 = vor.u32 %v5860_v47, %v4989_v48 }
 0x1e4   : > { %v1364_v32 = vpop.f32.mrf.mxu2  ;;  %v1241_v8 = vpop.f32.mrf.mxu0 }
 0x1e5   : > { %v1427_v39 = vpop.f32.mrf.mxu3  ;;  %v1304_v9 = vpop.f32.mrf.mxu1 }
 0x1e6   : > { %v6992_v43 = vadd.f32 %v1427_v39, %v1364_v32  ;;  %v1305_v12 = vadd.f32 %v1304_v9, %v1241_v8  ;;  %v5020_v32 = vor.u32 %v5870_v5, %v5019_v28  ;;  %v5005_v39 = vld [vmem:[#allocation9 + $0x98] sm:$0xf0]  ;;  %v5851_v28 = vld [vmem:[#allocation9 + $0x24] sm:$0xf] }
 0x1e7   : > { %1280 = vmatmul.bf16.gmra.mxu0 %v6881_v30 }
 0x1e8   : > { %v1617_v33 = vrot.slane %v6992_v43, 1  ;;  %1343 = vmatmul.bf16.gmra.mxu1 %v6884_v37  ;;  %2256 = vmatpush.bf16.msrb.mxu2 %v5020_v32  ;;  %v4955_v32 = vld [vmem:[#allocation9 + $0x28] sm:$0xf] }
 0x1e9   : > { %1406 = vmatmul.bf16.gmra.mxu2 %v6881_v30  ;;  %v5040_v30 = vor.u32 %v5872_v57, %v5037_v58  ;;  %v4981_v57 = vld [vmem:[#allocation9 + $0x70] sm:$0xf0]  ;;  %v4987_v58 = vld [vmem:[#allocation9 + $0x68] sm:$0xf] }
 0x1ea   : > { %v1618_v46 = vsel %vm1500_vm0, %v1616_v36, %v1617_v33  ;;  %1469 = vmatmul.bf16.gmra.mxu3 %v6884_v37  ;;  %v5873_v37 = vld [vmem:[#allocation9 + $0xcc] sm:$0xf0]  ;;  %v5008_v36 = vor.u32 %v5864_v27, %v5005_v39  ;;  %v5846_v39 = vld [vmem:[#allocation2 + $0x18] sm:$0xff] }
 0x1eb   : > { %v1672_v54 = vadd.f32 %v1618_v46, %v1300_v40  ;;  %v5028_v59 = vor.u32 %v5873_v37, %v5027_v61  ;;  %2273 = vmatpush.bf16.msrb.mxu3 %v5040_v30  ;;  %v5000_v46 = vor.u32 %v5863_v38, %v4997_v34  ;;  %v5856_v30 = vld [vmem:[#allocation9 + $0x4c] sm:$0xf]  ;;  %v4973_v37 = vld [vmem:[#allocation9 + $0x58] sm:$0xf0] }
 0x1ec   : > { %v1367_v63 = vpop.f32.mrf.mxu2  ;;  %v7001_v10 = vpop.f32.mrf.mxu0 }
 0x1ed   : > { %v1693_v62 = vadd.f32 %v6891_v49, %v1672_v54  ;;  %v1430_v0 = vpop.f32.mrf.mxu3  ;;  %v7003_v11 = vpop.f32.mrf.mxu1  ;;  %2220 = vmatpush.bf16.msrb.mxu0 %v5028_v59  ;;  %v5861_v54 = vld [vmem:[#allocation9 + $0x6c] sm:$0xf0]  ;;  %2239 = vmatpush.bf16.msrb.mxu1 %v5000_v46  ;;  %v4976_v59 = vor.u32 %v5856_v30, %v4973_v37  ;;  %v5412_v37 = vld [vmem:[#allocation9 + $0x3e0] sm:$0xf] }
 0x1ee   : > { %v1431_v6 = vadd.f32 %v1430_v0, %v1367_v63  ;;  %v4980_v56 = vor.u32 %v5861_v54, %v4979_v53  ;;  %v5862_v63 = vld [vmem:[#allocation9 + $0x74] sm:$0xf0]  ;;  %v5959_v30 = vld [vmem:[#allocation9 + $0x2ec] sm:$0xf0] }
 0x1ef   : > { %4772 = vst [vmem:[%s6900_s9 + $0x7f] sm:$0xfe] %v1693_v62  ;;  %2274 = vmatpush.bf16.msrb.mxu3 %v5024_v15  ;;  %v4984_v62 = vor.u32 %v5859_v55, %v4981_v57  ;;  %v4988_v0 = vor.u32 %v5862_v63, %v4987_v58  ;;  %v5850_v53 = vld [vmem:[#allocation9 + $0x14] sm:$0xf0]  ;;  %v5989_v58 = vld [vmem:[#allocation9 + $0x3e4] sm:$0xf] }
 0x1f0   : > { %v1619_v19 = vrot.slane %v1431_v6, 1 }
 0x1f1   : > { %2221 = vmatpush.bf16.msrb.mxu0 %v5012_v24  ;;  %2240 = vmatpush.bf16.msrb.mxu1 %v4984_v62  ;;  %v4947_v24 = vld [vmem:[#allocation9 + $0x20] sm:$0xf] }
 0x1f2   : > { %v1620_v21 = vsel %vm1500_vm0, %v1617_v33, %v1619_v19  ;;  %v1674_v22 = vadd.f32 %v1619_v19, %v1305_v12  ;;  %v5865_v33 = vld [vmem:[#allocation9 + $0x8c] sm:$0xf0]  ;;  %v4971_v12 = vld [vmem:[#allocation9 + $0x48] sm:$0xf]  ;;  %v5858_v19 = vld [vmem:[#allocation9 + $0x54] sm:$0xf0] }
 0x1f3   : > { %v1673_v31 = vadd.f32 %v1620_v21, %v1302_v14  ;;  %v4996_v52 = vor.u32 %v5865_v33, %v4995_v35  ;;  %2275 = vmatpush.bf16.msrb.mxu3 %v5008_v36  ;;  %v4972_v14 = vor.u32 %v5858_v19, %v4971_v12  ;;  %v1307_v21 = vadd.f32 %v7003_v11, %v7001_v10  ;;  %v5848_v10 = vld [vmem:[#allocation9 + $0xc] sm:$0xf]  ;;  %v4941_v11 = vld [vmem:[#allocation9 + $0x18] sm:$0xf0]  ;;  %v5268_v12 = vld [vmem:[#allocation9 + $0x2c0] sm:$0xf] }
 0x1f4   : > { %v1695_v26 = vadd.f32 %v6891_v49, %v1674_v22  ;;  %v1369_v8 = vpop.f32.mrf.mxu2  ;;  %v7014_v40 = vpop.f32.mrf.mxu0  ;;  %v4960_v22 = vor.u32 %v5852_v16, %v4957_v17  ;;  %v4952_v35 = vor.u32 %v5851_v28, %v4949_v7  ;;  %v4944_v34 = vor.u32 %v5848_v10, %v4941_v11  ;;  %v5396_v16 = vld [vmem:[#allocation9 + $0x3c0] sm:$0xf]  ;;  %v5987_v17 = vld [vmem:[#allocation9 + $0x3cc] sm:$0xf0]  ;;  %v5270_v28 = vld [vmem:[#allocation9 + $0x2d0] sm:$0xf0] }
 0x1f5   : > { %v1694_v43 = vadd.f32 %v6891_v49, %v1673_v31  ;;  %v1432_v9 = vpop.f32.mrf.mxu3  ;;  %v7016_v51 = vpop.f32.mrf.mxu1  ;;  %v5004_v49 = vor.u32 %v5866_v45, %v5003_v41  ;;  %2222 = vmatpush.bf16.msrb.mxu0 %v4996_v52  ;;  %v4948_v31 = vor.u32 %v5853_v25, %v4947_v24  ;;  %v5849_v52 = vld [vmem:[#allocation9 + $0xc] sm:$0xf0]  ;;  %v5847_v41 = vld [vmem:[#allocation9 + $0x4] sm:$0xf]  ;;  %v4933_v45 = vld [vmem:[#allocation9 + $0x10] sm:$0xf0]  ;;  %v5397_v24 = vor.u32 %v5987_v17, %v5396_v16 }
 0x1f6   : > { %4774 = vst [vmem:[%s6900_s9 + $0x8f] sm:$0x1] %v1695_v26  ;;  %v1433_v61 = vadd.f32 %v1432_v9, %v1369_v8  ;;  %v5854_v26 = vld [vmem:[#allocation9 + $0x34] sm:$0xf0]  ;;  %v4931_v8 = vld [vmem:[#allocation9] sm:$0xf]  ;;  %v4936_v54 = vor.u32 %v5847_v41, %v4933_v45  ;;  %v1310_v62 = vadd.f32 %v7016_v51, %v7014_v40 }
 0x1f7   : > { %4773 = vst [vmem:[%s6900_s9 + $0x87] sm:$0xff] %v1694_v43  ;;  %1285 = vmatmul.bf16.gmra.mxu0 %v6904_v23  ;;  %2257 = vmatpush.bf16.msrb.mxu2 %v5004_v49  ;;  %v4956_v43 = vor.u32 %v5854_v26, %v4955_v32  ;;  %v7033_v9 = vld [vmem:[%s7592_s17] ss:$0 sm:$0xff]  ;;  %v4932_v48 = vor.u32 %v5849_v52, %v4931_v8  ;;  %v5286_v40 = vld [vmem:[#allocation9 + $0x2f0] sm:$0xf0] }
 0x1f8   : > { %1348 = vmatmul.bf16.gmra.mxu1 %v6907_v29  ;;  %2276 = vmatpush.bf16.msrb.mxu3 %v4992_v50  ;;  %v1621_v13 = vrot.slane %v1433_v61, 1  ;;  %v4939_v50 = vld [vmem:[#allocation9 + $0x8] sm:$0xf]  ;;  %v5414_v61 = vld [vmem:[#allocation9 + $0x3f0] sm:$0xf0] }
 0x1f9   : > { %1411 = vmatmul.bf16.gmra.mxu2 %v6904_v23  ;;  %2223 = vmatpush.bf16.msrb.mxu0 %v4980_v56  ;;  %v5857_v23 = vld [vmem:[#allocation9 + $0x4c] sm:$0xf0]  ;;  %v4940_v55 = vor.u32 %v5850_v53, %v4939_v50  ;;  %v5417_v63 = vor.u32 %v5989_v58, %v5414_v61  ;;  %v5953_v25 = vld [vmem:[#allocation9 + $0x2c4] sm:$0xf]  ;;  %v5382_v32 = vld [vmem:[#allocation9 + $0x3b0] sm:$0xf0] }
 0x1fa   : > { %1474 = vmatmul.bf16.gmra.mxu3 %v6907_v29  ;;  %v4965_v29 = vld [vmem:[#allocation9 + $0x50] sm:$0xf0]  ;;  %v4964_v44 = vor.u32 %v5857_v23, %v4963_v2  ;;  %v5957_v23 = vld [vmem:[#allocation9 + $0x2e4] sm:$0xf]  ;;  %v4414_v26 = vld [vmem:[%s6763_s5 + $0x5c] sm:$0xf] }
 0x1fb   : > { %2258 = vmatpush.bf16.msrb.mxu2 %v4988_v0  ;;  %v4968_v20 = vor.u32 %v5855_v3, %v4965_v29  ;;  %v5284_v0 = vld [vmem:[#allocation9 + $0x2e0] sm:$0xf]  ;;  %v5981_v7 = vld [vmem:[#allocation9 + $0x3a4] sm:$0xf]  ;;  %v5983_v11 = vld [vmem:[#allocation9 + $0x3ac] sm:$0xf0] }
 0x1fc   : > { %v1372_v1 = vpop.f32.mrf.mxu2  ;;  %v1248_v4 = vpop.f32.mrf.mxu0  ;;  %2277 = vmatpush.bf16.msrb.mxu3 %v4976_v59  ;;  %v5991_v59 = vld [vmem:[#allocation9 + $0x3ec] sm:$0xf0]  ;;  %v1742_v29 = vld [vmem:[#allocation2 + $0x20] sm:$0xf]  ;;  %v5949_v8 = vld [vmem:[#allocation9 + $0x2a4] sm:$0xf] }
 0x1fd   : > { %v1435_v6 = vpop.f32.mrf.mxu3  ;;  %v1311_v42 = vpop.f32.mrf.mxu1  ;;  %2224 = vmatpush.bf16.msrb.mxu0 %v4964_v44  ;;  %2241 = vmatpush.bf16.msrb.mxu1 %v4968_v20  ;;  %v5398_v44 = vld [vmem:[#allocation9 + $0x3d0] sm:$0xf0]  ;;  %418 = vst [vmem:[#allocation2 + $0x14] sm:$0xf] %v4414_v26  ;;  %v5977_v41 = vld [vmem:[#allocation9 + $0x384] sm:$0xf] }
 0x1fe   : > { %v7023_v60 = vadd.f32 %v1435_v6, %v1372_v1  ;;  %v1312_v56 = vadd.f32 %v1311_v42, %v1248_v4  ;;  %v5285_v6 = vor.u32 %v5959_v30, %v5284_v0  ;;  %v5289_v4 = vor.u32 %v5957_v23, %v5286_v40  ;;  %v5985_v42 = vld [vmem:[#allocation9 + $0x3c4] sm:$0xf]  ;;  %v5366_v45 = vld [vmem:[#allocation9 + $0x390] sm:$0xf0]  ;;  %v5348_v40 = vld [vmem:[#allocation9 + $0x360] sm:$0xf] }
 0x1ff   : > { %2259 = vmatpush.bf16.msrb.mxu2 %v4972_v14  ;;  %v5401_v14 = vor.u32 %v5985_v42, %v5398_v44  ;;  %v5369_v53 = vor.u32 %v5977_v41, %v5366_v45  ;;  %v5238_v0 = vld [vmem:[#allocation9 + $0x290] sm:$0xf0]  ;;  %v5975_v42 = vld [vmem:[#allocation9 + $0x36c] sm:$0xf0]  ;;  %v5941_v44 = vld [vmem:[#allocation9 + $0x264] sm:$0xf] }
 0x200   : > { %v1622_v15 = vrot.slane %v7023_v60, 1  ;;  %2278 = vmatpush.bf16.msrb.mxu3 %v4960_v22  ;;  %v5413_v60 = vor.u32 %v5991_v59, %v5412_v37  ;;  %v5350_v59 = vld [vmem:[#allocation9 + $0x370] sm:$0xf0]  ;;  %v5937_v26 = vld [vmem:[#allocation9 + $0x244] sm:$0xf] }
 0x201   : > { %2225 = vmatpush.bf16.msrb.mxu0 %v4948_v31  ;;  %2242 = vmatpush.bf16.msrb.mxu1 %v4952_v35  ;;  %v1813_v31 = vunpack.c.l.b16 %v1742_v29  ;;  %v5951_v35 = vld [vmem:[#allocation9 + $0x2ac] sm:$0xf0]  ;;  %v5220_v29 = vld [vmem:[#allocation9 + $0x260] sm:$0xf] }
 0x202   : > { %v1623_v5 = vsel %vm1500_vm0, %v1621_v13, %v1622_v15 }
 0x203   : > { %v1675_v27 = vadd.f32 %v1623_v5, %v1307_v21  ;;  %2260 = vmatpush.bf16.msrb.mxu2 %v4956_v43  ;;  %v5273_v5 = vor.u32 %v5953_v25, %v5270_v28  ;;  %v5380_v43 = vld [vmem:[#allocation9 + $0x3a0] sm:$0xf]  ;;  %v1815_v52 = vpack.c.b16 %v1813_v31, %v1813_v31  ;;  %v5971_v28 = vld [vmem:[#allocation9 + $0x34c] sm:$0xf0] }
 0x204   : > { %v1374_v33 = vpop.f32.mrf.mxu2  ;;  %v7036_v49 = vpop.f32.mrf.mxu0  ;;  %2279 = vmatpush.bf16.msrb.mxu3 %v4944_v34  ;;  %v5332_v25 = vld [vmem:[#allocation9 + $0x340] sm:$0xf] }
 0x205   : > { %v1696_v36 = vadd.f32 %v7033_v9, %v1675_v27  ;;  %v1437_v38 = vpop.f32.mrf.mxu3  ;;  %v7038_v47 = vpop.f32.mrf.mxu1  ;;  %2226 = vmatpush.bf16.msrb.mxu0 %v4932_v48  ;;  %2243 = vmatpush.bf16.msrb.mxu1 %v4936_v54  ;;  %v5385_v27 = vor.u32 %v5981_v7, %v5382_v32  ;;  %v5947_v54 = vld [vmem:[#allocation9 + $0x28c] sm:$0xf0] }
 0x206   : > { %v1438_v46 = vadd.f32 %v1437_v38, %v1374_v33  ;;  %v5381_v33 = vor.u32 %v5983_v11, %v5380_v43  ;;  %v1315_v23 = vadd.f32 %v7038_v47, %v7036_v49  ;;  %v5969_v47 = vld [vmem:[#allocation9 + $0x344] sm:$0xf] }
 0x207   : > { %4775 = vst [vmem:[%s6900_s9 + $0x8f] sm:$0xfe] %v1696_v36  ;;  %1986 = vmatmul.bf16.vlgmr.msra.gmra.mxu0 %v5846_v39  ;;  %2261 = vmatpush.bf16.msrb.mxu2 %v4940_v55  ;;  %v5254_v36 = vld [vmem:[#allocation9 + $0x2b0] sm:$0xf0]  ;;  %v5364_v55 = vld [vmem:[#allocation9 + $0x380] sm:$0xf] }
 0x208   : > { %v1624_v57 = vrot.slane %v1438_v46, 1  ;;  %2003 = vmatmul.bf16.vlgmr.msra.gmra.mxu1 %v5846_v39  ;;  %v5257_v38 = vor.u32 %v5949_v8, %v5254_v36  ;;  %v5236_v46 = vld [vmem:[#allocation9 + $0x280] sm:$0xf]  ;;  %v5965_v11 = vld [vmem:[#allocation9 + $0x324] sm:$0xf] }
 0x209   : > { %2021 = vmatmul.bf16.vlgmr.msra.gmra.mxu2 %v5846_v39  ;;  %2858 = vmatpush.bf16.msra.mxu0 %v5285_v6  ;;  %v5973_v6 = vld [vmem:[#allocation9 + $0x364] sm:$0xf]  ;;  %v5318_v8 = vld [vmem:[#allocation9 + $0x330] sm:$0xf0] }
 0x20a   : > { %v1625_v2 = vsel %vm1500_vm0, %v1622_v15, %v1624_v57  ;;  %v1677_v1 = vadd.f32 %v1624_v57, %v1312_v56  ;;  %2039 = vmatmul.bf16.vlgmr.msra.gmra.mxu3 %v5846_v39  ;;  %2906 = vmatpush.bf16.msra.mxu1 %v5413_v60  ;;  %v5955_v15 = vld [vmem:[#allocation9 + $0x2cc] sm:$0xf0]  ;;  %v5252_v39 = vld [vmem:[#allocation9 + $0x2a0] sm:$0xf] }
 0x20b   : > { %v1676_v3 = vadd.f32 %v1625_v2, %v1310_v62  ;;  %3008 = vmatpush.bf16.msra.mxu3 %v5417_v63  ;;  %2954 = vmatpush.bf16.msra.mxu2 %v5289_v4  ;;  %v5269_v22 = vor.u32 %v5955_v15, %v5268_v12  ;;  %v5253_v10 = vor.u32 %v5951_v35, %v5252_v39  ;;  %v5979_v56 = vld [vmem:[#allocation9 + $0x38c] sm:$0xf0]  ;;  %v5945_v63 = vld [vmem:[#allocation9 + $0x284] sm:$0xf] }
 0x20c   : > { %v1698_v51 = vadd.f32 %v7033_v9, %v1677_v1  ;;  %v1377_v13 = vpop.f32.mrf.mxu2  ;;  %v7047_v18 = vpop.f32.mrf.mxu0  ;;  %v5237_v62 = vor.u32 %v5947_v54, %v5236_v46  ;;  %v5365_v30 = vor.u32 %v5979_v56, %v5364_v55  ;;  %v5241_v37 = vor.u32 %v5945_v63, %v5238_v0  ;;  %v5943_v60 = vld [vmem:[#allocation9 + $0x26c] sm:$0xf0] }
 0x20d   : > { %v1697_v19 = vadd.f32 %v7033_v9, %v1676_v3  ;;  %v1440_v20 = vpop.f32.mrf.mxu3  ;;  %v7049_v21 = vpop.f32.mrf.mxu1  ;;  %2859 = vmatpush.bf16.msra.mxu0 %v5269_v22  ;;  %v5353_v3 = vor.u32 %v5973_v6, %v5350_v59  ;;  %v5221_v4 = vor.u32 %v5943_v60, %v5220_v29  ;;  %v5333_v39 = vor.u32 %v5971_v28, %v5332_v25  ;;  %v5845_v55 = vld [vmem:[#allocation2 + $0xc] sm:$0xff]  ;;  %v5174_v29 = vld [vmem:[#allocation9 + $0x210] sm:$0xf0] }
 0x20e   : > { %4777 = vst [vmem:[%s6900_s9 + $0x9f] sm:$0x1] %v1698_v51  ;;  %2907 = vmatpush.bf16.msra.mxu1 %v5397_v24  ;;  %v1441_v34 = vadd.f32 %v1440_v20, %v1377_v13  ;;  %v5222_v13 = vld [vmem:[#allocation9 + $0x270] sm:$0xf0]  ;;  %v5939_v24 = vld [vmem:[#allocation9 + $0x24c] sm:$0xf0]  ;;  %v1317_v36 = vadd.f32 %v7049_v21, %v7047_v18 }
 0x20f   : > { %4776 = vst [vmem:[%s6900_s9 + $0x97] sm:$0xff] %v1697_v19  ;;  %3009 = vmatpush.bf16.msra.mxu3 %v5401_v14  ;;  %2955 = vmatpush.bf16.msra.mxu2 %v5273_v5  ;;  %v5349_v19 = vor.u32 %v5975_v42, %v5348_v40  ;;  %v5225_v49 = vor.u32 %v5941_v44, %v5222_v13  ;;  %v5334_v20 = vld [vmem:[#allocation9 + $0x350] sm:$0xf0]  ;;  %v5204_v14 = vld [vmem:[#allocation9 + $0x240] sm:$0xf] }
 0x210   : > { %v1626_v2 = vrot.slane %v1441_v34, 1  ;;  %v5337_v22 = vor.u32 %v5969_v47, %v5334_v20  ;;  %v5205_v32 = vor.u32 %v5939_v24, %v5204_v14  ;;  %v5935_v34 = vld [vmem:[#allocation9 + $0x22c] sm:$0xf0]  ;;  %v5961_v21 = vld [vmem:[#allocation9 + $0x304] sm:$0xf] }
 0x211   : > { %2860 = vmatpush.bf16.msra.mxu0 %v5253_v10  ;;  %v1739_v44 = vld [vmem:[#allocation2 + $0x14] sm:$0xf]  ;;  %v5422_v47 = vld [vmem:[#allocation9 + $0x3f8] sm:$0xf0] }
 0x212   : > { %2908 = vmatpush.bf16.msra.mxu1 %v5381_v33  ;;  %v5321_v33 = vor.u32 %v5965_v11, %v5318_v8 }
 0x213   : > { %3010 = vmatpush.bf16.msra.mxu3 %v5385_v27  ;;  %2956 = vmatpush.bf16.msra.mxu2 %v5257_v38  ;;  %v5206_v27 = vld [vmem:[#allocation9 + $0x250] sm:$0xf0]  ;;  %v5188_v38 = vld [vmem:[#allocation9 + $0x220] sm:$0xf] }
 0x214   : > { %v1379_v48 = vpop.f32.mrf.mxu2  ;;  %v1256_v58 = vpop.f32.mrf.mxu0  ;;  %v5209_v35 = vor.u32 %v5937_v26, %v5206_v27  ;;  %v5189_v46 = vor.u32 %v5935_v34, %v5188_v38 }
 0x215   : > { %v1442_v50 = vpop.f32.mrf.mxu3  ;;  %v1319_v61 = vpop.f32.mrf.mxu1  ;;  %2861 = vmatpush.bf16.msra.mxu0 %v5237_v62 }
 0x216   : > { %v7053_v57 = vadd.f32 %v1442_v50, %v1379_v48  ;;  %2909 = vmatpush.bf16.msra.mxu1 %v5365_v30  ;;  %v1320_v43 = vadd.f32 %v1319_v61, %v1256_v58  ;;  %v5967_v48 = vld [vmem:[#allocation9 + $0x32c] sm:$0xf0]  ;;  %v5933_v50 = vld [vmem:[#allocation9 + $0x224] sm:$0xf]  ;;  %v5302_v58 = vld [vmem:[#allocation9 + $0x310] sm:$0xf0] }
 0x217   : > { %1991 = vmatmul.bf16.gmra.mxu0 %v1815_v52  ;;  %3011 = vmatpush.bf16.msra.mxu3 %v5369_v53  ;;  %v5190_v53 = vld [vmem:[#allocation9 + $0x230] sm:$0xf0]  ;;  %v5172_v61 = vld [vmem:[#allocation9 + $0x200] sm:$0xf]  ;;  %v5305_v30 = vor.u32 %v5961_v21, %v5302_v58 }
 0x218   : > { %v1627_v1 = vrot.slane %v7053_v57, 1  ;;  %2008 = vmatmul.bf16.gmra.mxu1 %v1815_v52  ;;  %2957 = vmatpush.bf16.msra.mxu2 %v5241_v37  ;;  %v5193_v57 = vor.u32 %v5933_v50, %v5190_v53  ;;  %v5931_v37 = vld [vmem:[#allocation9 + $0x20c] sm:$0xf0]  ;;  %v5406_v50 = vld [vmem:[#allocation9 + $0x3d8] sm:$0xf0] }
 0x219   : > { %2026 = vmatmul.bf16.gmra.mxu2 %v1815_v52  ;;  %2862 = vmatpush.bf16.msra.mxu0 %v5221_v4 }
 0x21a   : > { %v1628_v51 = vsel %vm1500_vm0, %v1626_v2, %v1627_v1  ;;  %2044 = vmatmul.bf16.gmra.mxu3 %v1815_v52  ;;  %2910 = vmatpush.bf16.msra.mxu1 %v5349_v19  ;;  %v5316_v52 = vld [vmem:[#allocation9 + $0x320] sm:$0xf] }
 0x21b   : > { %v1678_v12 = vadd.f32 %v1628_v51, %v1315_v23  ;;  %3012 = vmatpush.bf16.msra.mxu3 %v5353_v3  ;;  %v5317_v56 = vor.u32 %v5967_v48, %v5316_v52  ;;  %v5300_v2 = vld [vmem:[#allocation9 + $0x300] sm:$0xf]  ;;  %v5173_v23 = vor.u32 %v5931_v37, %v5172_v61  ;;  %v5929_v3 = vld [vmem:[#allocation9 + $0x204] sm:$0xf]  ;;  %v5292_v52 = vld [vmem:[#allocation9 + $0x2e8] sm:$0xf] }
 0x21c   : > { %v1382_v16 = vpop.f32.mrf.mxu2  ;;  %v7060_v31 = vpop.f32.mrf.mxu0  ;;  %2958 = vmatpush.bf16.msra.mxu2 %v5225_v49  ;;  %v5177_v40 = vor.u32 %v5929_v3, %v5174_v29  ;;  %v5990_v49 = vld [vmem:[#allocation9 + $0x3ec] sm:$0xf]  ;;  %v7083_v61 = vld [vmem:[%s6763_s5 + $0xc] sm:$0xff] }
 0x21d   : > { %v1699_v15 = vadd.f32 %v7033_v9, %v1678_v12  ;;  %v1445_v17 = vpop.f32.mrf.mxu3  ;;  %v7062_v7 = vpop.f32.mrf.mxu1  ;;  %2863 = vmatpush.bf16.msra.mxu0 %v5205_v32 }
 0x21e   : > { %v1446_v5 = vadd.f32 %v1445_v17, %v1382_v16  ;;  %2911 = vmatpush.bf16.msra.mxu1 %v5333_v39  ;;  %v5425_v16 = vor.u32 %v5990_v49, %v5422_v47  ;;  %v1322_v17 = vadd.f32 %v7062_v7, %v7060_v31  ;;  %v5420_v31 = vld [vmem:[#allocation9 + $0x3e8] sm:$0xf]  ;;  %v5992_v7 = vld [vmem:[#allocation9 + $0x3f4] sm:$0xf0] }
 0x21f   : > { %4778 = vst [vmem:[%s6900_s9 + $0x9f] sm:$0xfe] %v1699_v15  ;;  %3013 = vmatpush.bf16.msra.mxu3 %v5337_v22  ;;  %v2054_v15 = vunpack.c.l.b16 %v1739_v44 }
 0x220   : > { %v1629_v10 = vrot.slane %v1446_v5, 1  ;;  %2959 = vmatpush.bf16.msra.mxu2 %v5209_v35  ;;  %v5958_v35 = vld [vmem:[#allocation9 + $0x2ec] sm:$0xf] }
 0x221   : > { %2864 = vmatpush.bf16.msra.mxu0 %v5189_v46  ;;  %v2056_v25 = vpack.c.b16 %v2054_v15, %v2054_v15 }
 0x222   : > { %v1630_v41 = vsel %vm1500_vm0, %v1627_v1, %v1629_v10  ;;  %v1680_v45 = vadd.f32 %v1629_v10, %v1320_v43  ;;  %v5963_v1 = vld [vmem:[#allocation9 + $0x30c] sm:$0xf0]  ;;  %2912 = vmatpush.bf16.msra.mxu1 %v5317_v56  ;;  %v5294_v43 = vld [vmem:[#allocation9 + $0x2f8] sm:$0xf0] }
 0x223   : > { %v1679_v54 = vadd.f32 %v1630_v41, %v1317_v36  ;;  %3014 = vmatpush.bf16.msra.mxu3 %v5321_v33  ;;  %v5301_v60 = vor.u32 %v5963_v1, %v5300_v2  ;;  %v5297_v8 = vor.u32 %v5958_v35, %v5294_v43  ;;  %v5421_v33 = vor.u32 %v5992_v7, %v5420_v31  ;;  %v5960_v41 = vld [vmem:[#allocation9 + $0x2f4] sm:$0xf0]  ;;  %v5954_v1 = vld [vmem:[#allocation9 + $0x2cc] sm:$0xf]  ;;  %v7098_v31 = vld [vmem:[%s6763_s5 + $0x14] sm:$0xff] }
 0x224   : > { %v1701_v18 = vadd.f32 %v7033_v9, %v1680_v45  ;;  %v1384_v63 = vpop.f32.mrf.mxu2  ;;  %v1261_v6 = vpop.f32.mrf.mxu0  ;;  %2960 = vmatpush.bf16.msra.mxu2 %v5193_v57  ;;  %v5986_v45 = vld [vmem:[#allocation9 + $0x3cc] sm:$0xf]  ;;  %v5293_v48 = vor.u32 %v5960_v41, %v5292_v52  ;;  %v5984_v43 = vld [vmem:[#allocation9 + $0x3b4] sm:$0xf0] }
 0x225   : > { %v1700_v62 = vadd.f32 %v7033_v9, %v1679_v54  ;;  %v1447_v0 = vpop.f32.mrf.mxu3  ;;  %v1324_v59 = vpop.f32.mrf.mxu1  ;;  %2865 = vmatpush.bf16.msra.mxu0 %v5173_v23  ;;  %v5409_v54 = vor.u32 %v5986_v45, %v5406_v50 }
 0x226   : > { %4780 = vst [vmem:[%s6900_s9 + $0xaf] sm:$0x1] %v1701_v18  ;;  %2913 = vmatpush.bf16.msra.mxu1 %v5301_v60  ;;  %v1448_v51 = vadd.f32 %v1447_v0, %v1384_v63  ;;  %v1325_v36 = vadd.f32 %v1324_v59, %v1261_v6  ;;  %v7086_v0 = vld [vmem:[%s6763_s5 + $0x18] sm:$0xff]  ;;  %v5278_v6 = vld [vmem:[#allocation9 + $0x2d8] sm:$0xf0] }
 0x227   : > { %4779 = vst [vmem:[%s6900_s9 + $0xa7] sm:$0xff] %v1700_v62  ;;  %2227 = vmatmul.bf16.vlgmr.msrb.gmra.mxu0 %v5845_v55  ;;  %3015 = vmatpush.bf16.msra.mxu3 %v5305_v30  ;;  %v5404_v59 = vld [vmem:[#allocation9 + $0x3c8] sm:$0xf]  ;;  %v5281_v29 = vor.u32 %v5954_v1, %v5278_v6  ;;  %v5988_v60 = vld [vmem:[#allocation9 + $0x3d4] sm:$0xf0] }
 0x228   : > { %2244 = vmatmul.bf16.vlgmr.msrb.gmra.mxu1 %v5845_v55  ;;  %2961 = vmatpush.bf16.msra.mxu2 %v5177_v40  ;;  %v1631_v20 = vrot.slane %v1448_v51, 1  ;;  %v5405_v51 = vor.u32 %v5988_v60, %v5404_v59  ;;  %v5260_v6 = vld [vmem:[#allocation9 + $0x2a8] sm:$0xf]  ;;  %v5952_v59 = vld [vmem:[#allocation9 + $0x2b4] sm:$0xf0] }
 0x229   : > { %2262 = vmatmul.bf16.vlgmr.msrb.gmra.mxu2 %v5845_v55  ;;  %3062 = vmatpush.bf16.msrb.mxu0 %v5293_v48  ;;  %v5978_v60 = vld [vmem:[#allocation9 + $0x38c] sm:$0xf] }
 0x22a   : > { %2280 = vmatmul.bf16.vlgmr.msrb.gmra.mxu3 %v5845_v55  ;;  %3116 = vmatpush.bf16.msrb.mxu1 %v5421_v33 }
 0x22b   : > { %3224 = vmatpush.bf16.msrb.mxu3 %v5425_v16 }
 0x22c   : > { %v1387_v4 = vpop.f32.mrf.mxu2  ;;  %v1263_v19 = vpop.f32.mrf.mxu0  ;;  %3170 = vmatpush.bf16.msrb.mxu2 %v5297_v8 }
 0x22d   : > { %v1450_v42 = vpop.f32.mrf.mxu3  ;;  %v1326_v13 = vpop.f32.mrf.mxu1 }
 0x22e   : > { %v1451_v12 = vadd.f32 %v1450_v42, %v1387_v4  ;;  %v1327_v10 = vadd.f32 %v1326_v13, %v1263_v19  ;;  %3117 = vmatpush.bf16.msrb.mxu1 %v5405_v51 }
 0x22f   : > { %3225 = vmatpush.bf16.msrb.mxu3 %v5409_v54 }
 0x230   : > { %v1632_v14 = vrot.slane %v1451_v12, 1  ;;  %3171 = vmatpush.bf16.msrb.mxu2 %v5281_v29  ;;  %v5261_v29 = vor.u32 %v5952_v59, %v5260_v6  ;;  %v5228_v6 = vld [vmem:[#allocation9 + $0x268] sm:$0xf] }
 0x232   : > { %v1633_v22 = vsel %vm1500_vm0, %v1631_v20, %v1632_v14  ;;  %v5276_v20 = vld [vmem:[#allocation9 + $0x2c8] sm:$0xf] }
 0x233   : > { %v1681_v24 = vadd.f32 %v1633_v22, %v1322_v17  ;;  %v5982_v22 = vld [vmem:[#allocation9 + $0x3ac] sm:$0xf] }
 0x234   : > { %v1389_v5 = vpop.f32.mrf.mxu2  ;;  %v1266_v27 = vpop.f32.mrf.mxu0 }
 0x235   : > { %v1702_v28 = vadd.f32 %v7033_v9, %v1681_v24  ;;  %v1452_v32 = vpop.f32.mrf.mxu3  ;;  %v1329_v39 = vpop.f32.mrf.mxu1  ;;  %v5390_v24 = vld [vmem:[#allocation9 + $0x3b8] sm:$0xf0] }
 0x236   : > { %v1453_v26 = vadd.f32 %v1452_v32, %v1389_v5  ;;  %v1330_v40 = vadd.f32 %v1329_v39, %v1266_v27  ;;  %v5950_v5 = vld [vmem:[#allocation9 + $0x2ac] sm:$0xf]  ;;  %v5262_v32 = vld [vmem:[#allocation9 + $0x2b8] sm:$0xf0] }
 0x237   : > { %4781 = vst [vmem:[%s6900_s9 + $0xaf] sm:$0xfe] %v1702_v28  ;;  %2232 = vmatmul.bf16.gmra.mxu0 %v2056_v25  ;;  %v5393_v28 = vor.u32 %v5982_v22, %v5390_v24  ;;  %v5265_v35 = vor.u32 %v5950_v5, %v5262_v32  ;;  %v5948_v5 = vld [vmem:[#allocation9 + $0x294] sm:$0xf0] }
 0x238   : > { %v1634_v11 = vrot.slane %v1453_v26, 1  ;;  %2249 = vmatmul.bf16.gmra.mxu1 %v2056_v25  ;;  %v5388_v26 = vld [vmem:[#allocation9 + $0x3a8] sm:$0xf] }
 0x239   : > { %2267 = vmatmul.bf16.gmra.mxu2 %v2056_v25  ;;  %3226 = vmatpush.bf16.msrb.mxu3 %v5393_v28  ;;  %v5244_v28 = vld [vmem:[#allocation9 + $0x288] sm:$0xf] }
 0x23a   : > { %v1635_v38 = vsel %vm1500_vm0, %v1632_v14, %v1634_v11  ;;  %v1683_v34 = vadd.f32 %v1634_v11, %v1327_v10  ;;  %2285 = vmatmul.bf16.gmra.mxu3 %v2056_v25  ;;  %v5956_v14 = vld [vmem:[#allocation9 + $0x2d4] sm:$0xf0]  ;;  %v5389_v11 = vor.u32 %v5984_v43, %v5388_v26  ;;  %3172 = vmatpush.bf16.msrb.mxu2 %v5265_v35  ;;  %v5974_v26 = vld [vmem:[#allocation9 + $0x36c] sm:$0xf] }
 0x23b   : > { %v1682_v46 = vadd.f32 %v1635_v38, %v1325_v36  ;;  %v5277_v17 = vor.u32 %v5956_v14, %v5276_v20  ;;  %v7102_v38 = vld [vmem:[%s6763_s5 + $0x20] sm:$0xff]  ;;  %v5245_v32 = vor.u32 %v5948_v5, %v5244_v28 }
 0x23c   : > { %v1704_v53 = vadd.f32 %v7033_v9, %v1683_v34  ;;  %v1392_v56 = vpop.f32.mrf.mxu2  ;;  %v1268_v18 = vpop.f32.mrf.mxu0  ;;  %3118 = vmatpush.bf16.msrb.mxu1 %v5389_v11  ;;  %v7131_v43 = vld [vmem:[%s6763_s5 + $0x24] sm:$0xff] }
 0x23d   : > { %v1703_v55 = vadd.f32 %v7033_v9, %v1682_v46  ;;  %v1455_v57 = vpop.f32.mrf.mxu3  ;;  %v1331_v21 = vpop.f32.mrf.mxu1  ;;  %3063 = vmatpush.bf16.msrb.mxu0 %v5277_v17 }
 0x23e   : > { %4783 = vst [vmem:[%s6900_s9 + $0xbf] sm:$0x1] %v1704_v53  ;;  %v1456_v58 = vadd.f32 %v1455_v57, %v1392_v56  ;;  %v1332_v25 = vadd.f32 %v1331_v21, %v1268_v18  ;;  %v7112_v21 = vld [vmem:[%s6763_s5 + $0x1c] sm:$0xff] }
 0x23f   : > { %4782 = vst [vmem:[%s6900_s9 + $0xb7] sm:$0xff] %v1703_v55 }
 0x240   : > { %v1636_v23 = vrot.slane %v1456_v58, 1 }
 0x241   : > { %3064 = vmatpush.bf16.msrb.mxu0 %v5261_v29 }
 0x244   : > { %v1394_v62 = vpop.f32.mrf.mxu2  ;;  %v1271_v37 = vpop.f32.mrf.mxu0 }
 0x245   : > { %v1457_v63 = vpop.f32.mrf.mxu3  ;;  %v1334_v2 = vpop.f32.mrf.mxu1  ;;  %3065 = vmatpush.bf16.msrb.mxu0 %v5245_v32 }
 0x246   : > { %v1458_v30 = vadd.f32 %v1457_v63, %v1394_v62  ;;  %v1335_v15 = vadd.f32 %v1334_v2, %v1271_v37 }
 0x247   : > { %2866 = vmatmul.bf16.vlgmr.msra.gmra.mxu0 %v7083_v61 }
 0x248   : > { %v1637_v3 = vrot.slane %v1458_v30, 1  ;;  %2914 = vmatmul.bf16.vlgmr.msra.gmra.mxu1 %v7086_v0  ;;  %v7116_v30 = vld [vmem:[%s6763_s5 + $0x28] sm:$0xff] }
 0x249   : > { %2962 = vmatmul.bf16.vlgmr.msra.gmra.mxu2 %v7083_v61 }
 0x24a   : > { %v1638_v4 = vsel %vm1500_vm0, %v1636_v23, %v1637_v3  ;;  %3016 = vmatmul.bf16.vlgmr.msra.gmra.mxu3 %v7086_v0 }
 0x24b   : > { %v1684_v42 = vadd.f32 %v1638_v4, %v1330_v40  ;;  %v5374_v40 = vld [vmem:[#allocation9 + $0x398] sm:$0xf0] }
 0x24c   : > { %v1397_v12 = vpop.f32.mrf.mxu2  ;;  %v1273_v49 = vpop.f32.mrf.mxu0  ;;  %v5377_v4 = vor.u32 %v5978_v60, %v5374_v40 }
 0x24d   : > { %v1705_v44 = vadd.f32 %v7033_v9, %v1684_v42  ;;  %v1460_v19 = vpop.f32.mrf.mxu3  ;;  %v1336_v47 = vpop.f32.mrf.mxu1  ;;  %v5946_v42 = vld [vmem:[#allocation9 + $0x28c] sm:$0xf] }
 0x24e   : > { %v1461_v13 = vadd.f32 %v1460_v19, %v1397_v12  ;;  %v1337_v56 = vadd.f32 %v1336_v47, %v1273_v49  ;;  %v5372_v12 = vld [vmem:[#allocation9 + $0x388] sm:$0xf]  ;;  %v5980_v47 = vld [vmem:[#allocation9 + $0x394] sm:$0xf0]  ;;  %3227 = vmatpush.bf16.msrb.mxu3 %v5377_v4 }
 0x24f   : > { %4784 = vst [vmem:[%s6900_s9 + $0xbf] sm:$0xfe] %v1705_v44  ;;  %v5246_v44 = vld [vmem:[#allocation9 + $0x298] sm:$0xf0]  ;;  %v5373_v14 = vor.u32 %v5980_v47, %v5372_v12  ;;  %v7151_v47 = vld [vmem:[%s6763_s5 + $0x38] sm:$0xff] }
 0x250   : > { %v1639_v16 = vrot.slane %v1461_v13, 1  ;;  %v5249_v49 = vor.u32 %v5946_v42, %v5246_v44  ;;  %v7147_v12 = vld [vmem:[%s6763_s5 + $0x2c] sm:$0xff] }
 0x251   : > { %3119 = vmatpush.bf16.msrb.mxu1 %v5373_v14 }
 0x252   : > { %v1640_v27 = vsel %vm1500_vm0, %v1637_v3, %v1639_v16  ;;  %v1686_v39 = vadd.f32 %v1639_v16, %v1335_v15  ;;  %3173 = vmatpush.bf16.msrb.mxu2 %v5249_v49 }
 0x253   : > { %v1685_v10 = vadd.f32 %v1640_v27, %v1332_v25  ;;  %v5358_v27 = vld [vmem:[#allocation9 + $0x378] sm:$0xf0] }
 0x254   : > { %v1707_v8 = vadd.f32 %v7033_v9, %v1686_v39  ;;  %v1399_v36 = vpop.f32.mrf.mxu2  ;;  %v1276_v34 = vpop.f32.mrf.mxu0  ;;  %v5361_v39 = vor.u32 %v5974_v26, %v5358_v27  ;;  %v7170_v26 = vld [vmem:[%s6763_s5 + $0x34] sm:$0xff] }
 0x255   : > { %v1706_v7 = vadd.f32 %v7033_v9, %v1685_v10  ;;  %v1462_v33 = vpop.f32.mrf.mxu3  ;;  %v1339_v52 = vpop.f32.mrf.mxu1 }
 0x256   : > { %4786 = vst [vmem:[%s6900_s9 + $0xcf] sm:$0x1] %v1707_v8  ;;  %v1463_v41 = vadd.f32 %v1462_v33, %v1399_v36  ;;  %v1340_v51 = vadd.f32 %v1339_v52, %v1276_v34  ;;  %3228 = vmatpush.bf16.msrb.mxu3 %v5361_v39  ;;  %v7134_v8 = vld [vmem:[%s6763_s5 + $0x30] sm:$0xff]  ;;  %v5230_v36 = vld [vmem:[#allocation9 + $0x278] sm:$0xf0] }
 0x257   : > { %4785 = vst [vmem:[%s6900_s9 + $0xc7] sm:$0xff] %v1706_v7  ;;  %2871 = vmatmul.bf16.gmra.mxu0 %v7098_v31  ;;  %v5942_v7 = vld [vmem:[#allocation9 + $0x26c] sm:$0xf] }
 0x258   : > { %2919 = vmatmul.bf16.gmra.mxu1 %v7102_v38  ;;  %v1641_v54 = vrot.slane %v1463_v41, 1  ;;  %v5233_v41 = vor.u32 %v5942_v7, %v5230_v36  ;;  %v5212_v7 = vld [vmem:[#allocation9 + $0x248] sm:$0xf]  ;;  %v5940_v36 = vld [vmem:[#allocation9 + $0x254] sm:$0xf0] }
 0x259   : > { %2967 = vmatmul.bf16.gmra.mxu2 %v7098_v31 }
 0x25a   : > { %3021 = vmatmul.bf16.gmra.mxu3 %v7102_v38  ;;  %3174 = vmatpush.bf16.msrb.mxu2 %v5233_v41 }
 0x25c   : > { %v1402_v45 = vpop.f32.mrf.mxu2  ;;  %v1278_v50 = vpop.f32.mrf.mxu0 }
 0x25d   : > { %v1465_v46 = vpop.f32.mrf.mxu3  ;;  %v1341_v53 = vpop.f32.mrf.mxu1 }
 0x25e   : > { %v1466_v48 = vadd.f32 %v1465_v46, %v1402_v45  ;;  %v1342_v23 = vadd.f32 %v1341_v53, %v1278_v50  ;;  %v5356_v45 = vld [vmem:[#allocation9 + $0x368] sm:$0xf]  ;;  %v5976_v46 = vld [vmem:[#allocation9 + $0x374] sm:$0xf0] }
 0x260   : > { %v1642_v55 = vrot.slane %v1466_v48, 1  ;;  %v5357_v48 = vor.u32 %v5976_v46, %v5356_v45  ;;  %v5966_v46 = vld [vmem:[#allocation9 + $0x32c] sm:$0xf] }
 0x262   : > { %v1643_v57 = vsel %vm1500_vm0, %v1641_v54, %v1642_v55  ;;  %3120 = vmatpush.bf16.msrb.mxu1 %v5357_v48  ;;  %v5326_v48 = vld [vmem:[#allocation9 + $0x338] sm:$0xf0] }
 0x263   : > { %v1687_v18 = vadd.f32 %v1643_v57, %v1337_v56 }
 0x264   : > { %v1404_v62 = vpop.f32.mrf.mxu2  ;;  %v7118_v2 = vpop.f32.mrf.mxu0 }
 0x265   : > { %v1708_v58 = vadd.f32 %v7033_v9, %v1687_v18  ;;  %v1467_v63 = vpop.f32.mrf.mxu3  ;;  %v1344_v1 = vpop.f32.mrf.mxu1 }
 0x266   : > { %v1468_v37 = vadd.f32 %v1467_v63, %v1404_v62  ;;  %v1345_v54 = vadd.f32 %v1344_v1, %v7118_v2  ;;  %v5944_v2 = vld [vmem:[#allocation9 + $0x274] sm:$0xf0]  ;;  %v5970_v1 = vld [vmem:[#allocation9 + $0x34c] sm:$0xf] }
 0x267   : > { %4787 = vst [vmem:[%s6900_s9 + $0xcf] sm:$0xfe] %v1708_v58  ;;  %2875 = vmatmul.bf16.gmra.mxu0 %v7112_v21  ;;  %v5229_v59 = vor.u32 %v5944_v2, %v5228_v6 }
 0x268   : > { %v1644_v3 = vrot.slane %v1468_v37, 1  ;;  %2923 = vmatmul.bf16.gmra.mxu1 %v7116_v30 }
 0x269   : > { %2972 = vmatmul.bf16.gmra.mxu2 %v7112_v21  ;;  %3066 = vmatpush.bf16.msrb.mxu0 %v5229_v59  ;;  %v5936_v59 = vld [vmem:[#allocation9 + $0x234] sm:$0xf0] }
 0x26a   : > { %v1645_v19 = vsel %vm1500_vm0, %v1642_v55, %v1644_v3  ;;  %v1689_v13 = vadd.f32 %v1644_v3, %v1342_v23  ;;  %3026 = vmatmul.bf16.gmra.mxu3 %v7116_v30  ;;  %v5342_v23 = vld [vmem:[#allocation9 + $0x358] sm:$0xf0] }
 0x26b   : > { %v1688_v20 = vadd.f32 %v1645_v19, %v1340_v51  ;;  %v5345_v60 = vor.u32 %v5970_v1, %v5342_v23  ;;  %v5196_v1 = vld [vmem:[#allocation9 + $0x228] sm:$0xf]  ;;  %v5962_v23 = vld [vmem:[#allocation9 + $0x30c] sm:$0xf] }
 0x26c   : > { %v1710_v15 = vadd.f32 %v7033_v9, %v1689_v13  ;;  %v1407_v17 = vpop.f32.mrf.mxu2  ;;  %v1283_v24 = vpop.f32.mrf.mxu0 }
 0x26d   : > { %v1709_v16 = vadd.f32 %v7033_v9, %v1688_v20  ;;  %v1470_v22 = vpop.f32.mrf.mxu3  ;;  %v1346_v25 = vpop.f32.mrf.mxu1  ;;  %3229 = vmatpush.bf16.msrb.mxu3 %v5345_v60 }
 0x26e   : > { %4789 = vst [vmem:[%s6900_s9 + $0xdf] sm:$0x1] %v1710_v15  ;;  %v1471_v35 = vadd.f32 %v1470_v22, %v1407_v17  ;;  %v1347_v40 = vadd.f32 %v1346_v25, %v1283_v24  ;;  %v5938_v15 = vld [vmem:[#allocation9 + $0x24c] sm:$0xf]  ;;  %v5340_v17 = vld [vmem:[#allocation9 + $0x348] sm:$0xf] }
 0x26f   : > { %4788 = vst [vmem:[%s6900_s9 + $0xd7] sm:$0xff] %v1709_v16  ;;  %v5214_v16 = vld [vmem:[#allocation9 + $0x258] sm:$0xf0]  ;;  %v5972_v22 = vld [vmem:[#allocation9 + $0x354] sm:$0xf0] }
 0x270   : > { %v1646_v50 = vrot.slane %v1471_v35, 1  ;;  %v5341_v24 = vor.u32 %v5972_v22, %v5340_v17  ;;  %v7177_v35 = vld [vmem:[%s6763_s5 + $0x40] sm:$0xff] }
 0x272   : > { %3121 = vmatpush.bf16.msrb.mxu1 %v5341_v24 }
 0x274   : > { %v1409_v10 = vpop.f32.mrf.mxu2  ;;  %v1286_v34 = vpop.f32.mrf.mxu0 }
 0x275   : > { %v1472_v11 = vpop.f32.mrf.mxu3  ;;  %v1349_v52 = vpop.f32.mrf.mxu1 }
 0x276   : > { %v1473_v33 = vadd.f32 %v1472_v11, %v1409_v10  ;;  %v1350_v3 = vadd.f32 %v1349_v52, %v1286_v34 }
 0x277   : > { %2879 = vmatmul.bf16.gmra.mxu0 %v7131_v43 }
 0x278   : > { %v1647_v53 = vrot.slane %v1473_v33, 1  ;;  %2927 = vmatmul.bf16.gmra.mxu1 %v7134_v8  ;;  %v5213_v33 = vor.u32 %v5940_v36, %v5212_v7 }
 0x279   : > { %2977 = vmatmul.bf16.gmra.mxu2 %v7131_v43 }
 0x27a   : > { %v1648_v55 = vsel %vm1500_vm0, %v1646_v50, %v1647_v53  ;;  %3031 = vmatmul.bf16.gmra.mxu3 %v7134_v8  ;;  %3067 = vmatpush.bf16.msrb.mxu0 %v5213_v33  ;;  %v5329_v50 = vor.u32 %v5966_v46, %v5326_v48  ;;  %v7204_v33 = vld [vmem:[%s6763_s5 + $0x44] sm:$0xff]  ;;  %v7207_v48 = vld [vmem:[%s6763_s5 + $0x50] sm:$0xff] }
 0x27b   : > { %v1690_v56 = vadd.f32 %v1648_v55, %v1345_v54  ;;  %v5198_v54 = vld [vmem:[#allocation9 + $0x238] sm:$0xf0]  ;;  %v5324_v55 = vld [vmem:[#allocation9 + $0x328] sm:$0xf] }
 0x27c   : > { %v1412_v18 = vpop.f32.mrf.mxu2  ;;  %v1288_v63 = vpop.f32.mrf.mxu0  ;;  %3230 = vmatpush.bf16.msrb.mxu3 %v5329_v50 }
 0x27d   : > { %v1711_v57 = vadd.f32 %v7033_v9, %v1690_v56  ;;  %v1475_v58 = vpop.f32.mrf.mxu3  ;;  %v1351_v37 = vpop.f32.mrf.mxu1 }
 0x27e   : > { %v1476_v62 = vadd.f32 %v1475_v58, %v1412_v18  ;;  %v7190_v58 = vld [vmem:[%s6763_s5 + $0x3c] sm:$0xff]  ;;  %v7193_v37 = vld [vmem:[%s6763_s5 + $0x48] sm:$0xff] }
 0x27f   : > { %4790 = vst [vmem:[%s6900_s9 + $0xdf] sm:$0xfe] %v1711_v57  ;;  %v5968_v57 = vld [vmem:[#allocation9 + $0x334] sm:$0xf0] }
 0x280   : > { %v1649_v29 = vrot.slane %v1476_v62, 1  ;;  %v5325_v18 = vor.u32 %v5968_v57, %v5324_v55 }
 0x282   : > { %v1650_v51 = vsel %vm1500_vm0, %v1647_v53, %v1649_v29  ;;  %v1692_v4 = vadd.f32 %v1649_v29, %v1350_v3  ;;  %v5934_v53 = vld [vmem:[#allocation9 + $0x22c] sm:$0xf]  ;;  %3122 = vmatpush.bf16.msrb.mxu1 %v5325_v18  ;;  %v5197_v3 = vor.u32 %v5936_v59, %v5196_v1  ;;  %v5310_v29 = vld [vmem:[#allocation9 + $0x318] sm:$0xf0] }
 0x283   : > { %v1691_v42 = vadd.f32 %v1650_v51, %v1347_v40  ;;  %v5201_v56 = vor.u32 %v5934_v53, %v5198_v54  ;;  %v5313_v60 = vor.u32 %v5962_v23, %v5310_v29  ;;  %v5930_v40 = vld [vmem:[#allocation9 + $0x20c] sm:$0xf]  ;;  %v5182_v51 = vld [vmem:[#allocation9 + $0x218] sm:$0xf0] }
 0x284   : > { %v1713_v44 = vadd.f32 %v7033_v9, %v1692_v4  ;;  %v1414_v13 = vpop.f32.mrf.mxu2  ;;  %v7154_v20 = vpop.f32.mrf.mxu0  ;;  %3068 = vmatpush.bf16.msrb.mxu0 %v5197_v3  ;;  %v5185_v4 = vor.u32 %v5930_v40, %v5182_v51  ;;  %v6060_v40 = vld [vmem:[#allocation9 + $0x3ec] sm:$0xf]  ;;  %v5592_v51 = vld [vmem:[#allocation9 + $0x3f8] sm:$0xf0] }
 0x285   : > { %v1712_v19 = vadd.f32 %v7033_v9, %v1691_v42  ;;  %v1477_v49 = vpop.f32.mrf.mxu3  ;;  %v7156_v14 = vpop.f32.mrf.mxu1  ;;  %v5217_v9 = vor.u32 %v5938_v15, %v5214_v16  ;;  %3231 = vmatpush.bf16.msrb.mxu3 %v5313_v60  ;;  %v5308_v16 = vld [vmem:[#allocation9 + $0x308] sm:$0xf] }
 0x286   : > { %4792 = vst [vmem:[%s6900_s9 + $0xef] sm:$0x1] %v1713_v44 }
 0x287   : > { %4791 = vst [vmem:[%s6900_s9 + $0xe7] sm:$0xff] %v1712_v19  ;;  %2884 = vmatmul.bf16.gmra.mxu0 %v7147_v12  ;;  %3175 = vmatpush.bf16.msrb.mxu2 %v5217_v9  ;;  %v5964_v9 = vld [vmem:[#allocation9 + $0x314] sm:$0xf0] }
 0x288   : > { %2932 = vmatmul.bf16.gmra.mxu1 %v7151_v47  ;;  %v5309_v24 = vor.u32 %v5964_v9, %v5308_v16  ;;  %v7236_v16 = vld [vmem:[%s6763_s5 + $0x4c] sm:$0xff] }
 0x289   : > { %2982 = vmatmul.bf16.gmra.mxu2 %v7147_v12 }
 0x28a   : > { %3036 = vmatmul.bf16.gmra.mxu3 %v7151_v47  ;;  %3123 = vmatpush.bf16.msrb.mxu1 %v5309_v24  ;;  %v7240_v24 = vld [vmem:[%s6763_s5 + $0x58] sm:$0xff] }
 0x28b   : > { %3176 = vmatpush.bf16.msrb.mxu2 %v5201_v56 }
 0x28c   : > { %v7163_v25 = vpop.f32.mrf.mxu2  ;;  %v7167_v5 = vpop.f32.mrf.mxu0 }
 0x28d   : > { %v7165_v28 = vpop.f32.mrf.mxu3  ;;  %v2006_v32 = vpop.f32.mrf.mxu1 }
 0x28f   : > { %3177 = vmatpush.bf16.msrb.mxu2 %v5185_v4 }
 0x294   : > { %v7172_v27 = vpop.f32.mrf.mxu2  ;;  %v1992_v10 = vpop.f32.mrf.mxu0 }
 0x295   : > { %v7174_v39 = vpop.f32.mrf.mxu3  ;;  %v7179_v11 = vpop.f32.mrf.mxu1 }
 0x297   : > { %2888 = vmatmul.bf16.gmra.mxu0 %v7170_v26 }
 0x298   : > { %2936 = vmatmul.bf16.gmra.mxu1 %v7177_v35 }
 0x299   : > { %2987 = vmatmul.bf16.gmra.mxu2 %v7170_v26 }
 0x29a   : > { %3041 = vmatmul.bf16.gmra.mxu3 %v7177_v35 }
 0x29c   : > { %v7185_v34 = vpop.f32.mrf.mxu2  ;;  %v1993_v41 = vpop.f32.mrf.mxu0 }
 0x29d   : > { %v7187_v52 = vpop.f32.mrf.mxu3  ;;  %v2011_v45 = vpop.f32.mrf.mxu1  ;;  %v5180_v41 = vld [vmem:[#allocation9 + $0x208] sm:$0xf] }
 0x29e   : > { %v5932_v45 = vld [vmem:[#allocation9 + $0x214] sm:$0xf0] }
 0x29f   : > { %v5181_v50 = vor.u32 %v5932_v45, %v5180_v41  ;;  %v5584_v41 = vld [vmem:[#allocation9 + $0x3f0] sm:$0xf0] }
 0x2a1   : > { %3069 = vmatpush.bf16.msrb.mxu0 %v5181_v50  ;;  %v6056_v50 = vld [vmem:[#allocation9 + $0x3cc] sm:$0xf] }
 0x2a4   : > { %v2029_v62 = vpop.f32.mrf.mxu2  ;;  %v2228_v6 = vpop.f32.mrf.mxu0 }
 0x2a5   : > { %v2047_v63 = vpop.f32.mrf.mxu3  ;;  %v2245_v2 = vpop.f32.mrf.mxu1  ;;  %v2229_v10 = vadd.f32 %v2228_v6, %v7154_v20  ;;  %v7212_v20 = vld [vmem:[%s7592_s17] ss:$0 sm:$0xff] }
 0x2a6   : > { %v2246_v42 = vadd.f32 %v2245_v2, %v7156_v14 }
 0x2a7   : > { %2892 = vmatmul.bf16.gmra.mxu0 %v7190_v58 }
 0x2a8   : > { %2940 = vmatmul.bf16.gmra.mxu1 %v7193_v37  ;;  %v2293_v17 = vrot.slane %v2246_v42, 1 }
 0x2a9   : > { %2992 = vmatmul.bf16.gmra.mxu2 %v7190_v58 }
 0x2aa   : > { %3046 = vmatmul.bf16.gmra.mxu3 %v7193_v37 }
 0x2ac   : > { %v2263_v44 = vpop.f32.mrf.mxu2  ;;  %v2230_v13 = vpop.f32.mrf.mxu0 }
 0x2ad   : > { %v2281_v19 = vpop.f32.mrf.mxu3  ;;  %v2247_v49 = vpop.f32.mrf.mxu1  ;;  %v2264_v62 = vadd.f32 %v2263_v44, %v7163_v25  ;;  %v2231_v6 = vadd.f32 %v2230_v13, %v7167_v5  ;;  %v5595_v44 = vor.u32 %v6060_v40, %v5592_v51 }
 0x2ae   : > { %v2248_v15 = vadd.f32 %v2247_v49, %v2006_v32  ;;  %v2282_v14 = vadd.f32 %v2281_v19, %v7165_v28 }
 0x2af   : > { %3821 = vmatpush.bf16.msra.mxu3 %v5595_v44 }
 0x2b0   : > { %v2294_v22 = vrot.slane %v2248_v15, 1  ;;  %v2310_v57 = vrot.slane %v2282_v14, 1 }
 0x2b2   : > { %v2295_v7 = vsel %vm1500_vm0, %v2293_v17, %v2294_v22 }
 0x2b3   : > { %v2300_v36 = vadd.f32 %v2295_v7, %v2229_v10  ;;  %v6062_v7 = vld [vmem:[#allocation9 + $0x3f4] sm:$0xf0] }
 0x2b4   : > { %v2265_v32 = vpop.f32.mrf.mxu2  ;;  %v2233_v54 = vpop.f32.mrf.mxu0 }
 0x2b5   : > { %v2283_v46 = vpop.f32.mrf.mxu3  ;;  %v2302_v53 = vadd.f32 %v7212_v20, %v2300_v36  ;;  %v2250_v55 = vpop.f32.mrf.mxu1  ;;  %v2266_v19 = vadd.f32 %v2265_v32, %v7172_v27  ;;  %v5590_v27 = vld [vmem:[#allocation9 + $0x3e8] sm:$0xf]  ;;  %v6059_v36 = vld [vmem:[#allocation9 + $0x3e4] sm:$0xf]  ;;  %v5582_v32 = vld [vmem:[#allocation9 + $0x3e0] sm:$0xf] }
 0x2b6   : > { %v2284_v28 = vadd.f32 %v2283_v46, %v7174_v39  ;;  %v2251_v56 = vadd.f32 %v2250_v55, %v7179_v11  ;;  %v5591_v14 = vor.u32 %v6062_v7, %v5590_v27  ;;  %v5587_v45 = vor.u32 %v6059_v36, %v5584_v41  ;;  %v6061_v46 = vld [vmem:[#allocation9 + $0x3ec] sm:$0xf0]  ;;  %v6054_v7 = vld [vmem:[#allocation9 + $0x3b4] sm:$0xf0] }
 0x2b7   : > { %5057 = vst [vmem:[%s6900_s9 + $0x70] sm:$0xff] %v2302_v53  ;;  %2897 = vmatmul.bf16.gmra.mxu0 %v7204_v33  ;;  %v5583_v53 = vor.u32 %v6061_v46, %v5582_v32 }
 0x2b8   : > { %v2311_v18 = vrot.slane %v2284_v28, 1  ;;  %v2296_v63 = vrot.slane %v2251_v56, 1  ;;  %2945 = vmatmul.bf16.gmra.mxu1 %v7207_v48  ;;  %3797 = vmatpush.bf16.msra.mxu2 %v5591_v14  ;;  %v5576_v28 = vld [vmem:[#allocation9 + $0x3d8] sm:$0xf0]  ;;  %v6051_v14 = vld [vmem:[#allocation9 + $0x3a4] sm:$0xf] }
 0x2b9   : > { %2997 = vmatmul.bf16.gmra.mxu2 %v7204_v33  ;;  %3773 = vmatpush.bf16.msra.mxu1 %v5587_v45  ;;  %v5579_v54 = vor.u32 %v6056_v50, %v5576_v28  ;;  %v5552_v45 = vld [vmem:[#allocation9 + $0x3b0] sm:$0xf0] }
 0x2ba   : > { %v2312_v39 = vsel %vm1500_vm0, %v2310_v57, %v2311_v18  ;;  %3051 = vmatmul.bf16.gmra.mxu3 %v7207_v48  ;;  %v2297_v2 = vsel %vm1500_vm0, %v2294_v22, %v2296_v63  ;;  %3751 = vmatpush.bf16.msra.mxu0 %v5583_v53  ;;  %v5555_v46 = vor.u32 %v6051_v14, %v5552_v45 }
 0x2bb   : > { %v2318_v11 = vadd.f32 %v2312_v39, %v2264_v62  ;;  %v2301_v1 = vadd.f32 %v2297_v2, %v2231_v6  ;;  %3822 = vmatpush.bf16.msra.mxu3 %v5579_v54 }
 0x2bc   : > { %v2268_v25 = vpop.f32.mrf.mxu2  ;;  %v2234_v5 = vpop.f32.mrf.mxu0 }
 0x2bd   : > { %v2321_v59 = vadd.f32 %v7212_v20, %v2318_v11  ;;  %v2286_v23 = vpop.f32.mrf.mxu3  ;;  %v2303_v3 = vadd.f32 %v7212_v20, %v2301_v1  ;;  %v2252_v60 = vpop.f32.mrf.mxu1  ;;  %v2269_v4 = vadd.f32 %v2268_v25, %v7185_v34  ;;  %v5574_v1 = vld [vmem:[#allocation9 + $0x3c8] sm:$0xf]  ;;  %v6055_v25 = vld [vmem:[#allocation9 + $0x3c4] sm:$0xf]  ;;  %v5568_v5 = vld [vmem:[#allocation9 + $0x3d0] sm:$0xf0] }
 0x2be   : > { %v2287_v29 = vadd.f32 %v2286_v23, %v7187_v52  ;;  %v5571_v40 = vor.u32 %v6055_v25, %v5568_v5  ;;  %v5550_v5 = vld [vmem:[#allocation9 + $0x3a0] sm:$0xf] }
 0x2bf   : > { %5059 = vst [vmem:[%s6900_s9 + $0xef] sm:$0xfe] %v2321_v59  ;;  %v6058_v59 = vld [vmem:[#allocation9 + $0x3d4] sm:$0xf0] }
 0x2c0   : > { %5058 = vst [vmem:[%s6900_s9 + $0x78] sm:$0xff] %v2303_v3  ;;  %v2313_v42 = vrot.slane %v2287_v29, 1  ;;  %v5575_v29 = vor.u32 %v6058_v59, %v5574_v1  ;;  %3774 = vmatpush.bf16.msra.mxu1 %v5571_v40 }
 0x2c2   : > { %v2314_v13 = vsel %vm1500_vm0, %v2311_v18, %v2313_v42  ;;  %v2320_v49 = vadd.f32 %v2313_v42, %v2269_v4  ;;  %3798 = vmatpush.bf16.msra.mxu2 %v5575_v29 }
 0x2c3   : > { %v2319_v52 = vadd.f32 %v2314_v13, %v2266_v19 }
 0x2c4   : > { %v2323_v15 = vadd.f32 %v7212_v20, %v2320_v49  ;;  %v2270_v17 = vpop.f32.mrf.mxu2  ;;  %v2867_v34 = vpop.f32.mrf.mxu0  ;;  %3775 = vmatpush.bf16.msra.mxu1 %v5555_v46  ;;  %v6049_v46 = vld [vmem:[#allocation9 + $0x38c] sm:$0xf0] }
 0x2c5   : > { %v2322_v9 = vadd.f32 %v7212_v20, %v2319_v52  ;;  %v2288_v22 = vpop.f32.mrf.mxu3  ;;  %v2915_v10 = vpop.f32.mrf.mxu1 }
 0x2c6   : > { %5061 = vst [vmem:[%s6900_s9 + $0xff] sm:$0x1] %v2323_v15  ;;  %v2916_v60 = vadd.f32 %v2915_v10, %v2867_v34  ;;  %v5566_v15 = vld [vmem:[#allocation9 + $0x3c0] sm:$0xf]  ;;  %v6052_v34 = vld [vmem:[#allocation9 + $0x3ac] sm:$0xf] }
 0x2c7   : > { %5060 = vst [vmem:[%s6900_s9 + $0xf7] sm:$0xff] %v2322_v9  ;;  %2901 = vmatmul.bf16.gmra.mxu0 %v7236_v16  ;;  %v6057_v9 = vld [vmem:[#allocation9 + $0x3cc] sm:$0xf0]  ;;  %v5560_v10 = vld [vmem:[#allocation9 + $0x3b8] sm:$0xf0] }
 0x2c8   : > { %2949 = vmatmul.bf16.gmra.mxu1 %v7240_v24  ;;  %v5567_v22 = vor.u32 %v6057_v9, %v5566_v15  ;;  %v5563_v27 = vor.u32 %v6052_v34, %v5560_v10 }
 0x2c9   : > { %3002 = vmatmul.bf16.gmra.mxu2 %v7236_v16 }
 0x2ca   : > { %3056 = vmatmul.bf16.gmra.mxu3 %v7240_v24  ;;  %3752 = vmatpush.bf16.msra.mxu0 %v5567_v22 }
 0x2cb   : > { %3823 = vmatpush.bf16.msra.mxu3 %v5563_v27 }
 0x2cc   : > { %v2963_v55 = vpop.f32.mrf.mxu2  ;;  %v2869_v57 = vpop.f32.mrf.mxu0 }
 0x2cd   : > { %v3017_v56 = vpop.f32.mrf.mxu3  ;;  %v2917_v18 = vpop.f32.mrf.mxu1 }
 0x2ce   : > { %v3018_v62 = vadd.f32 %v3017_v56, %v2963_v55 }
 0x2d0   : > { %v3296_v23 = vrot.slane %v3018_v62, 1 }
 0x2d4   : > { %v2965_v63 = vpop.f32.mrf.mxu2  ;;  %v2872_v11 = vpop.f32.mrf.mxu0 }
 0x2d5   : > { %v3019_v6 = vpop.f32.mrf.mxu3  ;;  %v2920_v2 = vpop.f32.mrf.mxu1 }
 0x2d6   : > { %v3020_v39 = vadd.f32 %v3019_v6, %v2965_v63 }
 0x2d7   : > { %3070 = vmatmul.bf16.vlgmr.msrb.gmra.mxu0 %v7083_v61 }
 0x2d8   : > { %v3297_v3 = vrot.slane %v3020_v39, 1  ;;  %3124 = vmatmul.bf16.vlgmr.msrb.gmra.mxu1 %v7086_v0 }
 0x2d9   : > { %3178 = vmatmul.bf16.vlgmr.msrb.gmra.mxu2 %v7083_v61  ;;  %v2918_v61 = vadd.f32 %v2917_v18, %v2869_v57 }
 0x2da   : > { %v3298_v51 = vsel %vm1500_vm0, %v3296_v23, %v3297_v3  ;;  %3232 = vmatmul.bf16.vlgmr.msrb.gmra.mxu3 %v7086_v0  ;;  %v5558_v0 = vld [vmem:[#allocation9 + $0x3a8] sm:$0xf] }
 0x2db   : > { %v3338_v4 = vadd.f32 %v3298_v51, %v2916_v60  ;;  %v5559_v41 = vor.u32 %v6054_v7, %v5558_v0  ;;  %v6053_v60 = vld [vmem:[#allocation9 + $0x3ac] sm:$0xf0] }
 0x2dc   : > { %v2968_v44 = vpop.f32.mrf.mxu2  ;;  %v2873_v49 = vpop.f32.mrf.mxu0  ;;  %v5551_v51 = vor.u32 %v6053_v60, %v5550_v5  ;;  %v6045_v5 = vld [vmem:[#allocation9 + $0x36c] sm:$0xf0]  ;;  %v6040_v60 = vld [vmem:[#allocation9 + $0x34c] sm:$0xf] }
 0x2dd   : > { %v3350_v42 = vadd.f32 %v7212_v20, %v3338_v4  ;;  %v3022_v19 = vpop.f32.mrf.mxu3  ;;  %v2921_v52 = vpop.f32.mrf.mxu1  ;;  %3799 = vmatpush.bf16.msra.mxu2 %v5559_v41  ;;  %v6048_v4 = vld [vmem:[#allocation9 + $0x38c] sm:$0xf] }
 0x2de   : > { %v3023_v13 = vadd.f32 %v3022_v19, %v2968_v44  ;;  %v2922_v2 = vadd.f32 %v2921_v52, %v2873_v49  ;;  %v6050_v49 = vld [vmem:[#allocation9 + $0x394] sm:$0xf0]  ;;  %v6047_v52 = vld [vmem:[#allocation9 + $0x384] sm:$0xf]  ;;  %3753 = vmatpush.bf16.msra.mxu0 %v5551_v51 }
 0x2df   : > { %5426 = vst [vmem:[%s6900_s9 + $0x100] sm:$0xff] %v3350_v42  ;;  %v5544_v42 = vld [vmem:[#allocation9 + $0x398] sm:$0xf0] }
 0x2e0   : > { %v3299_v17 = vrot.slane %v3023_v13, 1  ;;  %v5547_v19 = vor.u32 %v6048_v4, %v5544_v42  ;;  %v5542_v13 = vld [vmem:[#allocation9 + $0x388] sm:$0xf]  ;;  %v5512_v4 = vld [vmem:[#allocation9 + $0x358] sm:$0xf0] }
 0x2e1   : > { %v5543_v9 = vor.u32 %v6050_v49, %v5542_v13 }
 0x2e2   : > { %v3300_v36 = vsel %vm1500_vm0, %v3297_v3, %v3299_v17  ;;  %v5536_v17 = vld [vmem:[#allocation9 + $0x390] sm:$0xf0]  ;;  %3824 = vmatpush.bf16.msra.mxu3 %v5547_v19 }
 0x2e3   : > { %v3339_v32 = vadd.f32 %v3300_v36, %v2918_v61  ;;  %v5539_v34 = vor.u32 %v6047_v52, %v5536_v17  ;;  %3800 = vmatpush.bf16.msra.mxu2 %v5543_v9 }
 0x2e4   : > { %v2970_v53 = vpop.f32.mrf.mxu2  ;;  %v2876_v54 = vpop.f32.mrf.mxu0 }
 0x2e5   : > { %v3351_v50 = vadd.f32 %v7212_v20, %v3339_v32  ;;  %v3024_v28 = vpop.f32.mrf.mxu3  ;;  %v2924_v55 = vpop.f32.mrf.mxu1  ;;  %3776 = vmatpush.bf16.msra.mxu1 %v5539_v34  ;;  %v5534_v32 = vld [vmem:[#allocation9 + $0x380] sm:$0xf] }
 0x2e6   : > { %v3025_v56 = vadd.f32 %v3024_v28, %v2970_v53  ;;  %v2925_v44 = vadd.f32 %v2924_v55, %v2876_v54  ;;  %v5535_v54 = vor.u32 %v6049_v46, %v5534_v32  ;;  %v5528_v55 = vld [vmem:[#allocation9 + $0x378] sm:$0xf0] }
 0x2e7   : > { %5427 = vst [vmem:[%s6900_s9 + $0x108] sm:$0xff] %v3351_v50  ;;  %3075 = vmatmul.bf16.gmra.mxu0 %v7098_v31  ;;  %v6044_v50 = vld [vmem:[#allocation9 + $0x36c] sm:$0xf] }
 0x2e8   : > { %3129 = vmatmul.bf16.gmra.mxu1 %v7102_v38  ;;  %v3301_v39 = vrot.slane %v3025_v56, 1  ;;  %3754 = vmatpush.bf16.msra.mxu0 %v5535_v54 }
 0x2e9   : > { %3183 = vmatmul.bf16.gmra.mxu2 %v7098_v31 }
 0x2ea   : > { %3237 = vmatmul.bf16.gmra.mxu3 %v7102_v38 }
 0x2ec   : > { %v2973_v57 = vpop.f32.mrf.mxu2  ;;  %v2878_v63 = vpop.f32.mrf.mxu0 }
 0x2ed   : > { %v3027_v18 = vpop.f32.mrf.mxu3  ;;  %v2926_v6 = vpop.f32.mrf.mxu1 }
 0x2ee   : > { %v3028_v62 = vadd.f32 %v3027_v18, %v2973_v57  ;;  %v5531_v57 = vor.u32 %v6044_v50, %v5528_v55  ;;  %v5502_v55 = vld [vmem:[#allocation9 + $0x340] sm:$0xf] }
 0x2f0   : > { %v3302_v11 = vrot.slane %v3028_v62, 1  ;;  %3825 = vmatpush.bf16.msra.mxu3 %v5531_v57 }
 0x2f2   : > { %v3303_v1 = vsel %vm1500_vm0, %v3301_v39, %v3302_v11 }
 0x2f3   : > { %v3340_v59 = vadd.f32 %v3303_v1, %v2922_v2 }
 0x2f4   : > { %v2975_v23 = vpop.f32.mrf.mxu2  ;;  %v2880_v29 = vpop.f32.mrf.mxu0 }
 0x2f5   : > { %v3352_v25 = vadd.f32 %v7212_v20, %v3340_v59  ;;  %v3029_v3 = vpop.f32.mrf.mxu3  ;;  %v2928_v38 = vpop.f32.mrf.mxu1  ;;  %v5526_v59 = vld [vmem:[#allocation9 + $0x368] sm:$0xf] }
 0x2f6   : > { %v3030_v31 = vadd.f32 %v3029_v3, %v2975_v23  ;;  %v2929_v56 = vadd.f32 %v2928_v38, %v2880_v29  ;;  %v5520_v29 = vld [vmem:[#allocation9 + $0x370] sm:$0xf0] }
 0x2f7   : > { %5428 = vst [vmem:[%s6900_s9 + $0x110] sm:$0xff] %v3352_v25  ;;  %3080 = vmatmul.bf16.gmra.mxu0 %v7112_v21  ;;  %v6046_v25 = vld [vmem:[#allocation9 + $0x374] sm:$0xf0] }
 0x2f8   : > { %v3304_v40 = vrot.slane %v3030_v31, 1  ;;  %3134 = vmatmul.bf16.gmra.mxu1 %v7116_v30  ;;  %v5527_v3 = vor.u32 %v6046_v25, %v5526_v59  ;;  %v6043_v31 = vld [vmem:[#allocation9 + $0x364] sm:$0xf] }
 0x2f9   : > { %3188 = vmatmul.bf16.gmra.mxu2 %v7112_v21  ;;  %v5523_v38 = vor.u32 %v6043_v31, %v5520_v29  ;;  %v6035_v25 = vld [vmem:[#allocation9 + $0x324] sm:$0xf] }
 0x2fa   : > { %v3305_v15 = vsel %vm1500_vm0, %v3302_v11, %v3304_v40  ;;  %3242 = vmatmul.bf16.gmra.mxu3 %v7116_v30  ;;  %3801 = vmatpush.bf16.msra.mxu2 %v5527_v3 }
 0x2fb   : > { %v3341_v22 = vadd.f32 %v3305_v15, %v2925_v44  ;;  %3777 = vmatpush.bf16.msra.mxu1 %v5523_v38  ;;  %v5515_v44 = vor.u32 %v6040_v60, %v5512_v4 }
 0x2fc   : > { %v2978_v61 = vpop.f32.mrf.mxu2  ;;  %v2882_v0 = vpop.f32.mrf.mxu0 }
 0x2fd   : > { %v3353_v10 = vadd.f32 %v7212_v20, %v3341_v22  ;;  %v3032_v27 = vpop.f32.mrf.mxu3  ;;  %v2930_v7 = vpop.f32.mrf.mxu1  ;;  %3826 = vmatpush.bf16.msra.mxu3 %v5515_v44 }
 0x2fe   : > { %v3033_v14 = vadd.f32 %v3032_v27, %v2978_v61  ;;  %v5510_v27 = vld [vmem:[#allocation9 + $0x348] sm:$0xf] }
 0x2ff   : > { %5429 = vst [vmem:[%s6900_s9 + $0x118] sm:$0xff] %v3353_v10 }
 0x300   : > { %v3306_v53 = vrot.slane %v3033_v14, 1 }
 0x304   : > { %v2980_v36 = vpop.f32.mrf.mxu2  ;;  %v2885_v30 = vpop.f32.mrf.mxu0 }
 0x305   : > { %v3034_v21 = vpop.f32.mrf.mxu3  ;;  %v2933_v45 = vpop.f32.mrf.mxu1 }
 0x306   : > { %v3035_v41 = vadd.f32 %v3034_v21, %v2980_v36 }
 0x307   : > { %3085 = vmatmul.bf16.gmra.mxu0 %v7131_v43 }
 0x308   : > { %v3307_v28 = vrot.slane %v3035_v41, 1  ;;  %3139 = vmatmul.bf16.gmra.mxu1 %v7134_v8  ;;  %v5504_v41 = vld [vmem:[#allocation9 + $0x350] sm:$0xf0] }
 0x309   : > { %3193 = vmatmul.bf16.gmra.mxu2 %v7131_v43  ;;  %v2931_v43 = vadd.f32 %v2930_v7, %v2882_v0  ;;  %v6042_v0 = vld [vmem:[#allocation9 + $0x354] sm:$0xf0]  ;;  %v6039_v7 = vld [vmem:[#allocation9 + $0x344] sm:$0xf] }
 0x30a   : > { %v3308_v18 = vsel %vm1500_vm0, %v3306_v53, %v3307_v28  ;;  %3247 = vmatmul.bf16.gmra.mxu3 %v7134_v8  ;;  %v5518_v8 = vld [vmem:[#allocation9 + $0x360] sm:$0xf]  ;;  %v5511_v21 = vor.u32 %v6042_v0, %v5510_v27  ;;  %v5507_v45 = vor.u32 %v6039_v7, %v5504_v41  ;;  %v6032_v7 = vld [vmem:[#allocation9 + $0x30c] sm:$0xf]  ;;  %v6034_v41 = vld [vmem:[#allocation9 + $0x314] sm:$0xf0] }
 0x30b   : > { %v3342_v62 = vadd.f32 %v3308_v18, %v2929_v56  ;;  %v5519_v51 = vor.u32 %v6045_v5, %v5518_v8  ;;  %v6041_v56 = vld [vmem:[#allocation9 + $0x34c] sm:$0xf0] }
 0x30c   : > { %v2983_v6 = vpop.f32.mrf.mxu2  ;;  %v2886_v2 = vpop.f32.mrf.mxu0  ;;  %3802 = vmatpush.bf16.msra.mxu2 %v5511_v21  ;;  %3778 = vmatpush.bf16.msra.mxu1 %v5507_v45  ;;  %v5503_v18 = vor.u32 %v6041_v56, %v5502_v55 }
 0x30d   : > { %v3354_v63 = vadd.f32 %v7212_v20, %v3342_v62  ;;  %v3037_v39 = vpop.f32.mrf.mxu3  ;;  %v2934_v1 = vpop.f32.mrf.mxu1  ;;  %3755 = vmatpush.bf16.msra.mxu0 %v5519_v51  ;;  %v6036_v62 = vld [vmem:[#allocation9 + $0x32c] sm:$0xf] }
 0x30e   : > { %v3038_v11 = vadd.f32 %v3037_v39, %v2983_v6  ;;  %v2935_v30 = vadd.f32 %v2934_v1, %v2886_v2  ;;  %v6038_v2 = vld [vmem:[#allocation9 + $0x334] sm:$0xf0] }
 0x30f   : > { %5430 = vst [vmem:[%s6900_s9 + $0x120] sm:$0xff] %v3354_v63  ;;  %v5496_v63 = vld [vmem:[#allocation9 + $0x338] sm:$0xf0] }
 0x310   : > { %v3309_v23 = vrot.slane %v3038_v11, 1  ;;  %v5499_v39 = vor.u32 %v6036_v62, %v5496_v63  ;;  %v5494_v11 = vld [vmem:[#allocation9 + $0x328] sm:$0xf] }
 0x311   : > { %v5495_v59 = vor.u32 %v6038_v2, %v5494_v11  ;;  %3756 = vmatpush.bf16.msra.mxu0 %v5503_v18  ;;  %v6028_v2 = vld [vmem:[#allocation9 + $0x2ec] sm:$0xf] }
 0x312   : > { %v3310_v40 = vsel %vm1500_vm0, %v3307_v28, %v3309_v23  ;;  %v5488_v23 = vld [vmem:[#allocation9 + $0x330] sm:$0xf0]  ;;  %3827 = vmatpush.bf16.msra.mxu3 %v5499_v39 }
 0x313   : > { %v3343_v42 = vadd.f32 %v3310_v40, %v2931_v43  ;;  %v5491_v31 = vor.u32 %v6035_v25, %v5488_v23  ;;  %3803 = vmatpush.bf16.msra.mxu2 %v5495_v59 }
 0x314   : > { %v2985_v13 = vpop.f32.mrf.mxu2  ;;  %v2889_v52 = vpop.f32.mrf.mxu0 }
 0x315   : > { %v3355_v19 = vadd.f32 %v7212_v20, %v3343_v42  ;;  %v3039_v49 = vpop.f32.mrf.mxu3  ;;  %v2937_v15 = vpop.f32.mrf.mxu1  ;;  %3779 = vmatpush.bf16.msra.mxu1 %v5491_v31 }
 0x316   : > { %v3040_v9 = vadd.f32 %v3039_v49, %v2985_v13  ;;  %v2938_v6 = vadd.f32 %v2937_v15, %v2889_v52 }
 0x317   : > { %5431 = vst [vmem:[%s6900_s9 + $0x128] sm:$0xff] %v3355_v19  ;;  %3090 = vmatmul.bf16.gmra.mxu0 %v7147_v12 }
 0x318   : > { %3144 = vmatmul.bf16.gmra.mxu1 %v7151_v47  ;;  %v3311_v14 = vrot.slane %v3040_v9, 1 }
 0x319   : > { %3198 = vmatmul.bf16.gmra.mxu2 %v7147_v12 }
 0x31a   : > { %3252 = vmatmul.bf16.gmra.mxu3 %v7151_v47 }
 0x31c   : > { %v2988_v17 = vpop.f32.mrf.mxu2  ;;  %v2891_v10 = vpop.f32.mrf.mxu0 }
 0x31d   : > { %v3042_v22 = vpop.f32.mrf.mxu3  ;;  %v2939_v61 = vpop.f32.mrf.mxu1  ;;  %v5486_v10 = vld [vmem:[#allocation9 + $0x320] sm:$0xf] }
 0x31e   : > { %v3043_v34 = vadd.f32 %v3042_v22, %v2988_v17  ;;  %v6037_v61 = vld [vmem:[#allocation9 + $0x32c] sm:$0xf0] }
 0x31f   : > { %v5487_v0 = vor.u32 %v6037_v61, %v5486_v10 }
 0x320   : > { %v3312_v36 = vrot.slane %v3043_v34, 1 }
 0x321   : > { %3757 = vmatpush.bf16.msra.mxu0 %v5487_v0  ;;  %v6020_v0 = vld [vmem:[#allocation9 + $0x2ac] sm:$0xf] }
 0x322   : > { %v3313_v12 = vsel %vm1500_vm0, %v3311_v14, %v3312_v36  ;;  %v5480_v14 = vld [vmem:[#allocation9 + $0x318] sm:$0xf0] }
 0x323   : > { %v3344_v47 = vadd.f32 %v3313_v12, %v2935_v30  ;;  %v5483_v21 = vor.u32 %v6032_v7, %v5480_v14  ;;  %v5472_v12 = vld [vmem:[#allocation9 + $0x310] sm:$0xf0]  ;;  %v5700_v7 = vld [vmem:[#allocation9 + $0x2b8] sm:$0xf0]  ;;  %v5698_v14 = vld [vmem:[#allocation9 + $0x2a8] sm:$0xf] }
 0x324   : > { %v2990_v46 = vpop.f32.mrf.mxu2  ;;  %v2893_v28 = vpop.f32.mrf.mxu0 }
 0x325   : > { %v3356_v32 = vadd.f32 %v7212_v20, %v3344_v47  ;;  %v3044_v50 = vpop.f32.mrf.mxu3  ;;  %v2941_v54 = vpop.f32.mrf.mxu1  ;;  %3828 = vmatpush.bf16.msra.mxu3 %v5483_v21  ;;  %v6022_v21 = vld [vmem:[#allocation9 + $0x2b4] sm:$0xf0] }
 0x326   : > { %v3045_v53 = vadd.f32 %v3044_v50, %v2990_v46  ;;  %v2942_v19 = vadd.f32 %v2941_v54, %v2893_v28  ;;  %v5470_v46 = vld [vmem:[#allocation9 + $0x300] sm:$0xf]  ;;  %v6033_v50 = vld [vmem:[#allocation9 + $0x30c] sm:$0xf0] }
 0x327   : > { %5432 = vst [vmem:[%s6900_s9 + $0x130] sm:$0xff] %v3356_v32  ;;  %3095 = vmatmul.bf16.gmra.mxu0 %v7170_v26  ;;  %v5471_v55 = vor.u32 %v6033_v50, %v5470_v46  ;;  %v5684_v50 = vld [vmem:[#allocation9 + $0x298] sm:$0xf0] }
 0x328   : > { %v3314_v57 = vrot.slane %v3045_v53, 1  ;;  %3149 = vmatmul.bf16.gmra.mxu1 %v7177_v35 }
 0x329   : > { %3203 = vmatmul.bf16.gmra.mxu2 %v7170_v26  ;;  %3758 = vmatpush.bf16.msra.mxu0 %v5471_v55 }
 0x32a   : > { %v3315_v1 = vsel %vm1500_vm0, %v3312_v36, %v3314_v57  ;;  %3257 = vmatmul.bf16.gmra.mxu3 %v7177_v35 }
 0x32b   : > { %v3345_v3 = vadd.f32 %v3315_v1, %v2938_v6  ;;  %v5732_v1 = vld [vmem:[#allocation9 + $0x2f8] sm:$0xf0] }
 0x32c   : > { %v2993_v43 = vpop.f32.mrf.mxu2  ;;  %v2895_v8 = vpop.f32.mrf.mxu0  ;;  %v5735_v23 = vor.u32 %v6028_v2, %v5732_v1  ;;  %v6018_v2 = vld [vmem:[#allocation9 + $0x294] sm:$0xf0]  ;;  %v6015_v1 = vld [vmem:[#allocation9 + $0x284] sm:$0xf] }
 0x32d   : > { %v3357_v29 = vadd.f32 %v7212_v20, %v3345_v3  ;;  %v3047_v38 = vpop.f32.mrf.mxu3  ;;  %v2943_v5 = vpop.f32.mrf.mxu1  ;;  %v426_v3 = vld [vmem:[%s351_s2] sm:$0xff]  }
 0x32e   : > { %v3048_v26 = vadd.f32 %v3047_v38, %v2993_v43  ;;  %v2944_v36 = vadd.f32 %v2943_v5, %v2895_v8  ;;  %430 = vst [vmem:[#allocation2 + $0x24] sm:$0xff] %v426_v3   ;;  %4093 = vmatpush.bf16.msrb.mxu3 %v5735_v23  ;;  %v5676_v3 = vld [vmem:[#allocation9 + $0x290] sm:$0xf0] }
 0x32f   : > { %5433 = vst [vmem:[%s6900_s9 + $0x138] sm:$0xff] %v3357_v29 }
 0x330   : > { %v3316_v42 = vrot.slane %v3048_v26, 1 }
 0x334   : > { %v2995_v60 = vpop.f32.mrf.mxu2  ;;  %v2898_v51 = vpop.f32.mrf.mxu0 }
 0x335   : > { %v3049_v40 = vpop.f32.mrf.mxu3  ;;  %v2946_v4 = vpop.f32.mrf.mxu1 }
 0x336   : > { %v3050_v35 = vadd.f32 %v3049_v40, %v2995_v60  ;;  %v5730_v60 = vld [vmem:[#allocation9 + $0x2e8] sm:$0xf]  ;;  %v6030_v40 = vld [vmem:[#allocation9 + $0x2f4] sm:$0xf0]  ;;  %v6027_v4 = vld [vmem:[#allocation9 + $0x2e4] sm:$0xf] }
 0x337   : > { %3100 = vmatmul.bf16.gmra.mxu0 %v7190_v58  ;;  %v5731_v51 = vor.u32 %v6030_v40, %v5730_v60  ;;  %v6012_v60 = vld [vmem:[#allocation9 + $0x26c] sm:$0xf]  ;;  %v5668_v40 = vld [vmem:[#allocation9 + $0x278] sm:$0xf0] }
 0x338   : > { %v3317_v44 = vrot.slane %v3050_v35, 1  ;;  %3154 = vmatmul.bf16.gmra.mxu1 %v7193_v37 }
 0x339   : > { %3208 = vmatmul.bf16.gmra.mxu2 %v7190_v58  ;;  %v5478_v58 = vld [vmem:[#allocation9 + $0x308] sm:$0xf] }
 0x33a   : > { %v3318_v13 = vsel %vm1500_vm0, %v3316_v42, %v3317_v44  ;;  %3262 = vmatmul.bf16.gmra.mxu3 %v7193_v37  ;;  %v6031_v37 = vld [vmem:[#allocation9 + $0x304] sm:$0xf]  ;;  %v5479_v45 = vor.u32 %v6034_v41, %v5478_v58  ;;  %v5724_v42 = vld [vmem:[#allocation9 + $0x2f0] sm:$0xf0]  ;;  %v5722_v58 = vld [vmem:[#allocation9 + $0x2e0] sm:$0xf] }
 0x33b   : > { %v3346_v49 = vadd.f32 %v3318_v13, %v2942_v19  ;;  %v5475_v32 = vor.u32 %v6031_v37, %v5472_v12  ;;  %v5727_v19 = vor.u32 %v6027_v4, %v5724_v42  ;;  %v6024_v13 = vld [vmem:[#allocation9 + $0x2cc] sm:$0xf]  ;;  %v5692_v12 = vld [vmem:[#allocation9 + $0x2b0] sm:$0xf0]  ;;  %v5671_v4 = vor.u32 %v6012_v60, %v5668_v40  ;;  %v5666_v42 = vld [vmem:[#allocation9 + $0x268] sm:$0xf] }
 0x33c   : > { %v2998_v15 = vpop.f32.mrf.mxu2  ;;  %v2899_v22 = vpop.f32.mrf.mxu0  ;;  %3804 = vmatpush.bf16.msra.mxu2 %v5479_v45  ;;  %v6019_v45 = vld [vmem:[#allocation9 + $0x2a4] sm:$0xf]  ;;  %v5612_v60 = vld [vmem:[#allocation9 + $0x210] sm:$0xf0]  ;;  %v5618_v40 = vld [vmem:[#allocation9 + $0x208] sm:$0xf] }
 0x33d   : > { %v3358_v52 = vadd.f32 %v7212_v20, %v3346_v49  ;;  %v3052_v9 = vpop.f32.mrf.mxu3  ;;  %v2947_v34 = vpop.f32.mrf.mxu1  ;;  %3780 = vmatpush.bf16.msra.mxu1 %v5475_v32  ;;  %v5716_v49 = vld [vmem:[#allocation9 + $0x2d8] sm:$0xf0]  ;;  %v5695_v55 = vor.u32 %v6019_v45, %v5692_v12  ;;  %v5642_v12 = vld [vmem:[#allocation9 + $0x240] sm:$0xf] }
 0x33e   : > { %v3053_v17 = vadd.f32 %v3052_v9, %v2998_v15  ;;  %v2948_v31 = vadd.f32 %v2947_v34, %v2899_v22  ;;  %v5719_v9 = vor.u32 %v6024_v13, %v5716_v49  ;;  %v6023_v22 = vld [vmem:[#allocation9 + $0x2c4] sm:$0xf]  ;;  %v5708_v34 = vld [vmem:[#allocation9 + $0x2d0] sm:$0xf0] }
 0x33f   : > { %5434 = vst [vmem:[%s6900_s9 + $0x140] sm:$0xff] %v3358_v52  ;;  %v5714_v52 = vld [vmem:[#allocation9 + $0x2c8] sm:$0xf] }
 0x340   : > { %v3319_v27 = vrot.slane %v3053_v17, 1  ;;  %v6026_v17 = vld [vmem:[#allocation9 + $0x2d4] sm:$0xf0]  ;;  %4069 = vmatpush.bf16.msrb.mxu2 %v5731_v51  ;;  %4094 = vmatpush.bf16.msrb.mxu3 %v5719_v9 }
 0x341   : > { %4045 = vmatpush.bf16.msrb.mxu1 %v5727_v19  ;;  %v5715_v61 = vor.u32 %v6026_v17, %v5714_v52  ;;  %v6011_v52 = vld [vmem:[#allocation9 + $0x264] sm:$0xf] }
 0x342   : > { %v3320_v30 = vsel %vm1500_vm0, %v3317_v44, %v3319_v27  ;;  %v5711_v27 = vor.u32 %v6023_v22, %v5708_v34  ;;  %v5658_v22 = vld [vmem:[#allocation9 + $0x260] sm:$0xf]  ;;  %v6013_v34 = vld [vmem:[#allocation9 + $0x26c] sm:$0xf0] }
 0x343   : > { %v3347_v47 = vadd.f32 %v3320_v30, %v2944_v36  ;;  %v5703_v36 = vor.u32 %v6020_v0, %v5700_v7 }
 0x344   : > { %v3000_v28 = vpop.f32.mrf.mxu2  ;;  %v2902_v56 = vpop.f32.mrf.mxu0  ;;  %4070 = vmatpush.bf16.msrb.mxu2 %v5715_v61  ;;  %v6008_v61 = vld [vmem:[#allocation9 + $0x24c] sm:$0xf] }
 0x345   : > { %v3359_v53 = vadd.f32 %v7212_v20, %v3347_v47  ;;  %v3054_v54 = vpop.f32.mrf.mxu3  ;;  %v2950_v57 = vpop.f32.mrf.mxu1  ;;  %v6016_v47 = vld [vmem:[#allocation9 + $0x28c] sm:$0xf]  ;;  %4046 = vmatpush.bf16.msrb.mxu1 %v5711_v27  ;;  %4095 = vmatpush.bf16.msrb.mxu3 %v5703_v36  ;;  %v5652_v27 = vld [vmem:[#allocation9 + $0x258] sm:$0xf0]  ;;  %v5659_v36 = vor.u32 %v6013_v34, %v5658_v22 }
 0x346   : > { %v3055_v18 = vadd.f32 %v3054_v54, %v3000_v28  ;;  %v2951_v44 = vadd.f32 %v2950_v57, %v2902_v56  ;;  %v6025_v28 = vld [vmem:[#allocation9 + $0x2cc] sm:$0xf0]  ;;  %v5699_v54 = vor.u32 %v6022_v21, %v5698_v14  ;;  %v5687_v56 = vor.u32 %v6016_v47, %v5684_v50  ;;  %v6010_v21 = vld [vmem:[#allocation9 + $0x254] sm:$0xf0] }
 0x347   : > { %5435 = vst [vmem:[%s6900_s9 + $0x148] sm:$0xff] %v3359_v53  ;;  %3105 = vmatmul.bf16.gmra.mxu0 %v7204_v33  ;;  %v5706_v53 = vld [vmem:[#allocation9 + $0x2c0] sm:$0xf]  ;;  %v5655_v14 = vor.u32 %v6008_v61, %v5652_v27  ;;  %v6009_v47 = vld [vmem:[#allocation9 + $0x24c] sm:$0xf0] }
 0x348   : > { %3159 = vmatmul.bf16.gmra.mxu1 %v7207_v48  ;;  %v3321_v59 = vrot.slane %v3055_v18, 1  ;;  %v5707_v57 = vor.u32 %v6025_v28, %v5706_v53  ;;  %v428_v18 = vld [vmem:[%s351_s2 + $0x8] sm:$0xf]  ;;  %4071 = vmatpush.bf16.msrb.mxu2 %v5699_v54  ;;  %v6004_v53 = vld [vmem:[#allocation9 + $0x22c] sm:$0xf] }
 0x349   : > { %3213 = vmatmul.bf16.gmra.mxu2 %v7204_v33  ;;  %432 = vst [vmem:[#allocation2 + $0x2c] sm:$0xf] %v428_v18  ;;  %4047 = vmatpush.bf16.msrb.mxu1 %v5695_v55  ;;  %v5636_v28 = vld [vmem:[#allocation9 + $0x238] sm:$0xf0]  ;;  %v6006_v18 = vld [vmem:[#allocation9 + $0x234] sm:$0xf0] }
 0x34a   : > { %3267 = vmatmul.bf16.gmra.mxu3 %v7207_v48  ;;  %v5639_v55 = vor.u32 %v6004_v53, %v5636_v28 }
 0x34b   : > { %4096 = vmatpush.bf16.msrb.mxu3 %v5687_v56  ;;  %v5643_v56 = vor.u32 %v6009_v47, %v5642_v12 }
 0x34c   : > { %v3003_v62 = vpop.f32.mrf.mxu2  ;;  %v2904_v39 = vpop.f32.mrf.mxu0 }
 0x34d   : > { %v3057_v63 = vpop.f32.mrf.mxu3  ;;  %v2952_v11 = vpop.f32.mrf.mxu1 }
 0x34e   : > { %v3058_v6 = vadd.f32 %v3057_v63, %v3003_v62  ;;  %v5690_v62 = vld [vmem:[#allocation9 + $0x2a0] sm:$0xf]  ;;  %v6021_v63 = vld [vmem:[#allocation9 + $0x2ac] sm:$0xf0]  ;;  %v5682_v11 = vld [vmem:[#allocation9 + $0x288] sm:$0xf] }
 0x34f   : > { %v5683_v23 = vor.u32 %v6018_v2, %v5682_v11  ;;  %4097 = vmatpush.bf16.msrb.mxu3 %v5671_v4  ;;  %v6005_v11 = vld [vmem:[#allocation9 + $0x22c] sm:$0xf0]  ;;  %v6003_v2 = vld [vmem:[#allocation9 + $0x224] sm:$0xf] }
 0x350   : > { %v3322_v25 = vrot.slane %v3058_v6, 1  ;;  %v5996_v6 = vld [vmem:[#allocation2 + $0x18] sm:$0xff] }
 0x351   : > { %4072 = vmatpush.bf16.msrb.mxu2 %v5683_v23  ;;  %v6000_v23 = vld [vmem:[#allocation9 + $0x20c] sm:$0xf] }
 0x352   : > { %v3323_v33 = vsel %vm1500_vm0, %v3321_v59, %v3322_v25 }
 0x353   : > { %v3348_v48 = vadd.f32 %v3323_v33, %v2948_v31  ;;  %v5691_v31 = vor.u32 %v6021_v63, %v5690_v62  ;;  %4098 = vmatpush.bf16.msrb.mxu3 %v5655_v14  ;;  %v5626_v62 = vld [vmem:[#allocation9 + $0x220] sm:$0xf] }
 0x354   : > { %v3005_v43 = vpop.f32.mrf.mxu2  ;;  %v7314_v5 = vpop.f32.mrf.mxu0 }
 0x355   : > { %v3360_v29 = vadd.f32 %v7212_v20, %v3348_v48  ;;  %v3059_v38 = vpop.f32.mrf.mxu3  ;;  %v7316_v26 = vpop.f32.mrf.mxu1 }
 0x356   : > { %v3060_v8 = vadd.f32 %v3059_v38, %v3005_v43  ;;  %v5679_v43 = vor.u32 %v6015_v1, %v5676_v3  ;;  %v5674_v38 = vld [vmem:[#allocation9 + $0x280] sm:$0xf]  ;;  %v3126_v19 = vadd.f32 %v7316_v26, %v7314_v5  ;;  %v5650_v5 = vld [vmem:[#allocation9 + $0x248] sm:$0xf]  ;;  %v5628_v1 = vld [vmem:[#allocation9 + $0x230] sm:$0xf0] }
 0x357   : > { %5436 = vst [vmem:[%s6900_s9 + $0x150] sm:$0xff] %v3360_v29  ;;  %3110 = vmatmul.bf16.gmra.mxu0 %v7236_v16  ;;  %4099 = vmatpush.bf16.msrb.mxu3 %v5639_v55  ;;  %v5620_v3 = vld [vmem:[#allocation9 + $0x218] sm:$0xf0] }
 0x358   : > { %v3324_v35 = vrot.slane %v3060_v8, 1  ;;  %3164 = vmatmul.bf16.gmra.mxu1 %v7240_v24  ;;  %v6017_v8 = vld [vmem:[#allocation9 + $0x28c] sm:$0xf0] }
 0x359   : > { %3218 = vmatmul.bf16.gmra.mxu2 %v7236_v16  ;;  %v6029_v16 = vld [vmem:[#allocation9 + $0x2ec] sm:$0xf0]  ;;  %4048 = vmatpush.bf16.msrb.mxu1 %v5679_v43  ;;  %v5675_v49 = vor.u32 %v6017_v8, %v5674_v38  ;;  %v5627_v8 = vor.u32 %v6005_v11, %v5626_v62 }
 0x35a   : > { %v3325_v15 = vsel %vm1500_vm0, %v3322_v25, %v3324_v35  ;;  %3272 = vmatmul.bf16.gmra.mxu3 %v7240_v24  ;;  %v5723_v30 = vor.u32 %v6029_v16, %v5722_v58  ;;  %v6007_v58 = vld [vmem:[#allocation9 + $0x244] sm:$0xf]  ;;  %v5644_v16 = vld [vmem:[#allocation9 + $0x250] sm:$0xf0] }
 0x35b   : > { %v3349_v10 = vadd.f32 %v3325_v15, %v2951_v44  ;;  %v6014_v44 = vld [vmem:[#allocation9 + $0x274] sm:$0xf0]  ;;  %v5660_v15 = vld [vmem:[#allocation9 + $0x270] sm:$0xf0]  ;;  %v5647_v45 = vor.u32 %v6007_v58, %v5644_v16 }
 0x35c   : > { %v3179_v41 = vpop.f32.mrf.mxu2  ;;  %v7325_v32 = vpop.f32.mrf.mxu0  ;;  %4023 = vmatpush.bf16.msrb.mxu0 %v5723_v30  ;;  %v5667_v13 = vor.u32 %v6014_v44, %v5666_v42  ;;  %v5663_v17 = vor.u32 %v6011_v52, %v5660_v15  ;;  %v5651_v30 = vor.u32 %v6010_v21, %v5650_v5  ;;  %v5610_v42 = vld [vmem:[#allocation9 + $0x200] sm:$0xf]  ;;  %v6001_v44 = vld [vmem:[#allocation9 + $0x20c] sm:$0xf0] }
 0x35d   : > { %v3361_v24 = vadd.f32 %v7212_v20, %v3349_v10  ;;  %v3233_v37 = vpop.f32.mrf.mxu3  ;;  %v7327_v46 = vpop.f32.mrf.mxu1 }
 0x35e   : > { %v3234_v39 = vadd.f32 %v3233_v37, %v3179_v41  ;;  %4073 = vmatpush.bf16.msrb.mxu2 %v5667_v13  ;;  %4049 = vmatpush.bf16.msrb.mxu1 %v5663_v17  ;;  %v3128_v54 = vadd.f32 %v7327_v46, %v7325_v32  ;;  %v7350_v32 = vld [vmem:[%s7592_s17] ss:$0 sm:$0xff] }
 0x35f   : > { %5437 = vst [vmem:[%s6900_s9 + $0x158] sm:$0xff] %v3361_v24 }
 0x360   : > { %4024 = vmatpush.bf16.msrb.mxu0 %v5707_v57  ;;  %v3393_v35 = vrot.slane %v3234_v39, 1  ;;  %v5634_v57 = vld [vmem:[#allocation9 + $0x228] sm:$0xf] }
 0x361   : > { %v5635_v39 = vor.u32 %v6006_v18, %v5634_v57 }
 0x362   : > { %4074 = vmatpush.bf16.msrb.mxu2 %v5651_v30  ;;  %4050 = vmatpush.bf16.msrb.mxu1 %v5647_v45 }
 0x364   : > { %v3181_v59 = vpop.f32.mrf.mxu2  ;;  %v3076_v48 = vpop.f32.mrf.mxu0  ;;  %4025 = vmatpush.bf16.msrb.mxu0 %v5691_v31  ;;  %v5997_v31 = vld [vmem:[#allocation2 + $0x20] sm:$0xff] }
 0x365   : > { %v3235_v25 = vpop.f32.mrf.mxu3  ;;  %v3130_v29 = vpop.f32.mrf.mxu1 }
 0x366   : > { %v7332_v33 = vadd.f32 %v3235_v25, %v3181_v59  ;;  %v5631_v25 = vor.u32 %v6003_v2, %v5628_v1  ;;  %4075 = vmatpush.bf16.msrb.mxu2 %v5635_v39 }
 0x367   : > { %3759 = vmatmul.bf16.vlgmr.msra.gmra.mxu0 %v5996_v6 }
 0x368   : > { %v3394_v51 = vrot.slane %v7332_v33, 1  ;;  %3781 = vmatmul.bf16.vlgmr.msra.gmra.mxu1 %v5996_v6  ;;  %4026 = vmatpush.bf16.msrb.mxu0 %v5675_v49  ;;  %v5623_v33 = vor.u32 %v6000_v23, %v5620_v3  ;;  %v5611_v49 = vor.u32 %v6001_v44, %v5610_v42 }
 0x369   : > { %3805 = vmatmul.bf16.vlgmr.msra.gmra.mxu2 %v5996_v6  ;;  %4051 = vmatpush.bf16.msrb.mxu1 %v5631_v25 }
 0x36a   : > { %v3395_v9 = vsel %vm1500_vm0, %v3393_v35, %v3394_v51  ;;  %3829 = vmatmul.bf16.vlgmr.msra.gmra.mxu3 %v5996_v6  ;;  %v6002_v35 = vld [vmem:[#allocation9 + $0x214] sm:$0xf0] }
 0x36b   : > { %v3441_v10 = vadd.f32 %v3395_v9, %v3126_v19  ;;  %v5619_v19 = vor.u32 %v6002_v35, %v5618_v40  ;;  %4100 = vmatpush.bf16.msrb.mxu3 %v5623_v33  ;;  %v5994_v35 = vld [vmem:[#allocation2 + $0x14] sm:$0xff] }
 0x36c   : > { %v3184_v0 = vpop.f32.mrf.mxu2  ;;  %v7339_v41 = vpop.f32.mrf.mxu0  ;;  %4027 = vmatpush.bf16.msrb.mxu0 %v5659_v36 }
 0x36d   : > { %v3459_v26 = vadd.f32 %v7212_v20, %v3441_v10  ;;  %v3238_v7 = vpop.f32.mrf.mxu3  ;;  %v7341_v37 = vpop.f32.mrf.mxu1  ;;  %v3131_v20 = vadd.f32 %v3130_v29, %v3076_v48  ;;  %v5999_v48 = vld [vmem:[#allocation9 + $0x204] sm:$0xf]  ;;  %4076 = vmatpush.bf16.msrb.mxu2 %v5619_v19 }
 0x36e   : > { %v3239_v24 = vadd.f32 %v3238_v7, %v3184_v0  ;;  %v5615_v13 = vor.u32 %v5999_v48, %v5612_v60  ;;  %v3133_v27 = vadd.f32 %v7341_v37, %v7339_v41  ;;  %v5998_v0 = vld [vmem:[#allocation2 + $0x28] sm:$0xff] }
 0x36f   : > { %5438 = vst [vmem:[%s6900_s9 + $0x17f] sm:$0xfe] %v3459_v26 }
 0x370   : > { %v3396_v50 = vrot.slane %v3239_v24, 1  ;;  %4028 = vmatpush.bf16.msrb.mxu0 %v5643_v56  ;;  %4052 = vmatpush.bf16.msrb.mxu1 %v5615_v13  ;;  %v5993_v56 = vld [vmem:[#allocation2 + $0xc] sm:$0xff] }
 0x372   : > { %v3397_v63 = vsel %vm1500_vm0, %v3394_v51, %v3396_v50  ;;  %v3443_v6 = vadd.f32 %v3396_v50, %v3131_v20 }
 0x373   : > { %v3442_v59 = vadd.f32 %v3397_v63, %v3128_v54 }
 0x374   : > { %v3461_v46 = vadd.f32 %v7350_v32, %v3443_v6  ;;  %v3186_v43 = vpop.f32.mrf.mxu2  ;;  %v3081_v51 = vpop.f32.mrf.mxu0  ;;  %4029 = vmatpush.bf16.msrb.mxu0 %v5627_v8 }
 0x375   : > { %v3460_v29 = vadd.f32 %v7350_v32, %v3442_v59  ;;  %v3240_v38 = vpop.f32.mrf.mxu3  ;;  %v3135_v4 = vpop.f32.mrf.mxu1 }
 0x376   : > { %5440 = vst [vmem:[%s6900_s9 + $0x18f] sm:$0x1] %v3461_v46  ;;  %v3241_v52 = vadd.f32 %v3240_v38, %v3186_v43  ;;  %v3136_v45 = vadd.f32 %v3135_v4, %v3081_v51 }
 0x377   : > { %5439 = vst [vmem:[%s6900_s9 + $0x187] sm:$0xff] %v3460_v29  ;;  %3764 = vmatmul.bf16.gmra.mxu0 %v5997_v31 }
 0x378   : > { %3786 = vmatmul.bf16.gmra.mxu1 %v5997_v31  ;;  %4030 = vmatpush.bf16.msrb.mxu0 %v5611_v49  ;;  %v3398_v10 = vrot.slane %v3241_v52, 1 }
 0x379   : > { %3810 = vmatmul.bf16.gmra.mxu2 %v5997_v31 }
 0x37a   : > { %3834 = vmatmul.bf16.gmra.mxu3 %v5997_v31 }
 0x37c   : > { %v3189_v15 = vpop.f32.mrf.mxu2  ;;  %v3083_v22 = vpop.f32.mrf.mxu0 }
 0x37d   : > { %v3243_v9 = vpop.f32.mrf.mxu3  ;;  %v3137_v34 = vpop.f32.mrf.mxu1 }
 0x37e   : > { %v3244_v17 = vadd.f32 %v3243_v9, %v3189_v15  ;;  %v3138_v24 = vadd.f32 %v3137_v34, %v3083_v22 }
 0x380   : > { %v3399_v61 = vrot.slane %v3244_v17, 1 }
 0x382   : > { %v3400_v5 = vsel %vm1500_vm0, %v3398_v10, %v3399_v61 }
 0x383   : > { %v3444_v26 = vadd.f32 %v3400_v5, %v3133_v27  ;;  %v5995_v5 = vld [vmem:[#allocation2 + $0x1c] sm:$0xff] }
 0x384   : > { %v3191_v14 = vpop.f32.mrf.mxu2  ;;  %v3086_v58 = vpop.f32.mrf.mxu0 }
 0x385   : > { %v3462_v7 = vadd.f32 %v7350_v32, %v3444_v26  ;;  %v3245_v36 = vpop.f32.mrf.mxu3  ;;  %v3140_v16 = vpop.f32.mrf.mxu1 }
 0x386   : > { %v3246_v21 = vadd.f32 %v3245_v36, %v3191_v14  ;;  %v3141_v2 = vadd.f32 %v3140_v16, %v3086_v58 }
 0x387   : > { %5441 = vst [vmem:[%s6900_s9 + $0x18f] sm:$0xfe] %v3462_v7  ;;  %3768 = vmatmul.bf16.gmra.mxu0 %v5998_v0 }
 0x388   : > { %v3401_v30 = vrot.slane %v3246_v21, 1  ;;  %3791 = vmatmul.bf16.gmra.mxu1 %v5998_v0 }
 0x389   : > { %3815 = vmatmul.bf16.gmra.mxu2 %v5998_v0 }
 0x38a   : > { %v3402_v41 = vsel %vm1500_vm0, %v3399_v61, %v3401_v30  ;;  %v3446_v37 = vadd.f32 %v3401_v30, %v3138_v24  ;;  %3839 = vmatmul.bf16.gmra.mxu3 %v5998_v0 }
 0x38b   : > { %v3445_v12 = vadd.f32 %v3402_v41, %v3136_v45 }
 0x38c   : > { %v3464_v47 = vadd.f32 %v7350_v32, %v3446_v37  ;;  %v3194_v50 = vpop.f32.mrf.mxu2  ;;  %v3088_v28 = vpop.f32.mrf.mxu0 }
 0x38d   : > { %v3463_v20 = vadd.f32 %v7350_v32, %v3445_v12  ;;  %v3248_v53 = vpop.f32.mrf.mxu3  ;;  %v3142_v54 = vpop.f32.mrf.mxu1 }
 0x38e   : > { %5443 = vst [vmem:[%s6900_s9 + $0x19f] sm:$0x1] %v3464_v47  ;;  %v3249_v55 = vadd.f32 %v3248_v53, %v3194_v50  ;;  %v3143_v43 = vadd.f32 %v3142_v54, %v3088_v28 }
 0x38f   : > { %5442 = vst [vmem:[%s6900_s9 + $0x197] sm:$0xff] %v3463_v20 }
 0x390   : > { %v3403_v39 = vrot.slane %v3249_v55, 1 }
 0x394   : > { %v3196_v57 = vpop.f32.mrf.mxu2  ;;  %v3091_v63 = vpop.f32.mrf.mxu0 }
 0x395   : > { %v3250_v18 = vpop.f32.mrf.mxu3  ;;  %v3145_v6 = vpop.f32.mrf.mxu1 }
 0x396   : > { %v3251_v62 = vadd.f32 %v3250_v18, %v3196_v57  ;;  %v3146_v48 = vadd.f32 %v3145_v6, %v3091_v63 }
 0x397   : > { %4031 = vmatmul.bf16.vlgmr.msrb.gmra.mxu0 %v5993_v56 }
 0x398   : > { %v3404_v11 = vrot.slane %v3251_v62, 1  ;;  %4053 = vmatmul.bf16.vlgmr.msrb.gmra.mxu1 %v5993_v56 }
 0x399   : > { %4077 = vmatmul.bf16.vlgmr.msrb.gmra.mxu2 %v5993_v56 }
 0x39a   : > { %v3405_v1 = vsel %vm1500_vm0, %v3403_v39, %v3404_v11  ;;  %4101 = vmatmul.bf16.vlgmr.msrb.gmra.mxu3 %v5993_v56 }
 0x39b   : > { %v3447_v59 = vadd.f32 %v3405_v1, %v3141_v2 }
 0x39c   : > { %v3199_v23 = vpop.f32.mrf.mxu2  ;;  %v3093_v31 = vpop.f32.mrf.mxu0 }
 0x39d   : > { %v3465_v25 = vadd.f32 %v7350_v32, %v3447_v59  ;;  %v3253_v3 = vpop.f32.mrf.mxu3  ;;  %v3147_v33 = vpop.f32.mrf.mxu1 }
 0x39e   : > { %v3254_v46 = vadd.f32 %v3253_v3, %v3199_v23  ;;  %v3148_v10 = vadd.f32 %v3147_v33, %v3093_v31 }
 0x39f   : > { %5444 = vst [vmem:[%s6900_s9 + $0x19f] sm:$0xfe] %v3465_v25 }
 0x3a0   : > { %v3406_v29 = vrot.slane %v3254_v46, 1 }
 0x3a2   : > { %v3407_v38 = vsel %vm1500_vm0, %v3404_v11, %v3406_v29  ;;  %v3449_v8 = vadd.f32 %v3406_v29, %v3146_v48 }
 0x3a3   : > { %v3448_v60 = vadd.f32 %v3407_v38, %v3143_v43 }
 0x3a4   : > { %v3467_v40 = vadd.f32 %v7350_v32, %v3449_v8  ;;  %v3201_v4 = vpop.f32.mrf.mxu2  ;;  %v3096_v44 = vpop.f32.mrf.mxu0 }
 0x3a5   : > { %v3466_v51 = vadd.f32 %v7350_v32, %v3448_v60  ;;  %v3255_v42 = vpop.f32.mrf.mxu3  ;;  %v3150_v19 = vpop.f32.mrf.mxu1 }
 0x3a6   : > { %5446 = vst [vmem:[%s6900_s9 + $0x1af] sm:$0x1] %v3467_v40  ;;  %v3256_v13 = vadd.f32 %v3255_v42, %v3201_v4  ;;  %v3151_v24 = vadd.f32 %v3150_v19, %v3096_v44 }
 0x3a7   : > { %5445 = vst [vmem:[%s6900_s9 + $0x1a7] sm:$0xff] %v3466_v51  ;;  %4036 = vmatmul.bf16.gmra.mxu0 %v5994_v35 }
 0x3a8   : > { %4058 = vmatmul.bf16.gmra.mxu1 %v5994_v35  ;;  %v3408_v22 = vrot.slane %v3256_v13, 1 }
 0x3a9   : > { %4082 = vmatmul.bf16.gmra.mxu2 %v5994_v35 }
 0x3aa   : > { %4106 = vmatmul.bf16.gmra.mxu3 %v5994_v35 }
 0x3ac   : > { %v3204_v49 = vpop.f32.mrf.mxu2  ;;  %v3098_v9 = vpop.f32.mrf.mxu0 }
 0x3ad   : > { %v3258_v52 = vpop.f32.mrf.mxu3  ;;  %v3152_v17 = vpop.f32.mrf.mxu1 }
 0x3ae   : > { %v3259_v15 = vadd.f32 %v3258_v52, %v3204_v49  ;;  %v3153_v58 = vadd.f32 %v3152_v17, %v3098_v9 }
 0x3b0   : > { %v3409_v34 = vrot.slane %v3259_v15, 1 }
 0x3b2   : > { %v3410_v61 = vsel %vm1500_vm0, %v3408_v22, %v3409_v34 }
 0x3b3   : > { %v3450_v27 = vadd.f32 %v3410_v61, %v3148_v10 }
 0x3b4   : > { %v3206_v0 = vpop.f32.mrf.mxu2  ;;  %v3101_v36 = vpop.f32.mrf.mxu0 }
 0x3b5   : > { %v3468_v26 = vadd.f32 %v7350_v32, %v3450_v27  ;;  %v3260_v7 = vpop.f32.mrf.mxu3  ;;  %v3155_v21 = vpop.f32.mrf.mxu1 }
 0x3b6   : > { %v3261_v14 = vadd.f32 %v3260_v7, %v3206_v0  ;;  %v3156_v6 = vadd.f32 %v3155_v21, %v3101_v36 }
 0x3b7   : > { %5447 = vst [vmem:[%s6900_s9 + $0x1af] sm:$0xfe] %v3468_v26  ;;  %4040 = vmatmul.bf16.gmra.mxu0 %v5995_v5 }
 0x3b8   : > { %v3411_v16 = vrot.slane %v3261_v14, 1  ;;  %4063 = vmatmul.bf16.gmra.mxu1 %v5995_v5 }
 0x3b9   : > { %4087 = vmatmul.bf16.gmra.mxu2 %v5995_v5 }
 0x3ba   : > { %v3412_v30 = vsel %vm1500_vm0, %v3409_v34, %v3411_v16  ;;  %v3452_v45 = vadd.f32 %v3411_v16, %v3153_v58  ;;  %4111 = vmatmul.bf16.gmra.mxu3 %v5995_v5 }
 0x3bb   : > { %v3451_v41 = vadd.f32 %v3412_v30, %v3151_v24 }
 0x3bc   : > { %v3470_v37 = vadd.f32 %v7350_v32, %v3452_v45  ;;  %v3209_v47 = vpop.f32.mrf.mxu2  ;;  %v3103_v50 = vpop.f32.mrf.mxu0 }
 0x3bd   : > { %v3469_v12 = vadd.f32 %v7350_v32, %v3451_v41  ;;  %v3263_v20 = vpop.f32.mrf.mxu3  ;;  %v3157_v53 = vpop.f32.mrf.mxu1 }
 0x3be   : > { %5449 = vst [vmem:[%s6900_s9 + $0x1bf] sm:$0x1] %v3470_v37  ;;  %v3264_v28 = vadd.f32 %v3263_v20, %v3209_v47  ;;  %v3158_v33 = vadd.f32 %v3157_v53, %v3103_v50 }
 0x3bf   : > { %5448 = vst [vmem:[%s6900_s9 + $0x1b7] sm:$0xff] %v3469_v12 }
 0x3c0   : > { %v3413_v62 = vrot.slane %v3264_v28, 1 }
 0x3c4   : > { %v3211_v54 = vpop.f32.mrf.mxu2  ;;  %v3106_v57 = vpop.f32.mrf.mxu0 }
 0x3c5   : > { %v3265_v55 = vpop.f32.mrf.mxu3  ;;  %v3160_v18 = vpop.f32.mrf.mxu1 }
 0x3c6   : > { %v3266_v56 = vadd.f32 %v3265_v55, %v3211_v54  ;;  %v3161_v46 = vadd.f32 %v3160_v18, %v3106_v57 }
 0x3c8   : > { %v3414_v63 = vrot.slane %v3266_v56, 1 }
 0x3ca   : > { %v3415_v39 = vsel %vm1500_vm0, %v3413_v62, %v3414_v63 }
 0x3cb   : > { %v3453_v11 = vadd.f32 %v3415_v39, %v3156_v6 }
 0x3cc   : > { %v3214_v1 = vpop.f32.mrf.mxu2  ;;  %v3108_v23 = vpop.f32.mrf.mxu0 }
 0x3cd   : > { %v3471_v2 = vadd.f32 %v7350_v32, %v3453_v11  ;;  %v3268_v59 = vpop.f32.mrf.mxu3  ;;  %v3162_v3 = vpop.f32.mrf.mxu1 }
 0x3ce   : > { %v3269_v25 = vadd.f32 %v3268_v59, %v3214_v1  ;;  %v3163_v9 = vadd.f32 %v3162_v3, %v3108_v23 }
 0x3cf   : > { %5450 = vst [vmem:[%s6900_s9 + $0x1bf] sm:$0xfe] %v3471_v2 }
 0x3d0   : > { %v3416_v31 = vrot.slane %v3269_v25, 1 }
 0x3d2   : > { %v3417_v48 = vsel %vm1500_vm0, %v3414_v63, %v3416_v31  ;;  %v3455_v29 = vadd.f32 %v3416_v31, %v3161_v46 }
 0x3d3   : > { %v3454_v43 = vadd.f32 %v3417_v48, %v3158_v33 }
 0x3d4   : > { %v3473_v38 = vadd.f32 %v7350_v32, %v3455_v29  ;;  %v3216_v60 = vpop.f32.mrf.mxu2  ;;  %v3111_v35 = vpop.f32.mrf.mxu0 }
 0x3d5   : > { %v3472_v8 = vadd.f32 %v7350_v32, %v3454_v43  ;;  %v3270_v40 = vpop.f32.mrf.mxu3  ;;  %v3165_v51 = vpop.f32.mrf.mxu1 }
 0x3d6   : > { %5452 = vst [vmem:[%s6900_s9 + $0x1cf] sm:$0x1] %v3473_v38  ;;  %v3271_v4 = vadd.f32 %v3270_v40, %v3216_v60  ;;  %v3166_v14 = vadd.f32 %v3165_v51, %v3111_v35 }
 0x3d7   : > { %5451 = vst [vmem:[%s6900_s9 + $0x1c7] sm:$0xff] %v3472_v8 }
 0x3d8   : > { %v3418_v52 = vrot.slane %v3271_v4, 1 }
 0x3dc   : > { %v3219_v42 = vpop.f32.mrf.mxu2  ;;  %v3113_v13 = vpop.f32.mrf.mxu0 }
 0x3dd   : > { %v3273_v44 = vpop.f32.mrf.mxu3  ;;  %v3167_v49 = vpop.f32.mrf.mxu1 }
 0x3de   : > { %v3274_v19 = vadd.f32 %v3273_v44, %v3219_v42  ;;  %v3168_v0 = vadd.f32 %v3167_v49, %v3113_v13 }
 0x3e0   : > { %v3419_v15 = vrot.slane %v3274_v19, 1 }
 0x3e2   : > { %v3420_v17 = vsel %vm1500_vm0, %v3418_v52, %v3419_v15 }
 0x3e3   : > { %v3456_v22 = vadd.f32 %v3420_v17, %v3163_v9 }
 0x3e4   : > { %v3221_v10 = vpop.f32.mrf.mxu2  ;;  %v3760_v5 = vpop.f32.mrf.mxu0 }
 0x3e5   : > { %v3474_v34 = vadd.f32 %v7350_v32, %v3456_v22  ;;  %v3275_v61 = vpop.f32.mrf.mxu3  ;;  %v3782_v26 = vpop.f32.mrf.mxu1 }
 0x3e6   : > { %v3276_v27 = vadd.f32 %v3275_v61, %v3221_v10 }
 0x3e7   : > { %5453 = vst [vmem:[%s6900_s9 + $0x1cf] sm:$0xfe] %v3474_v34 }
 0x3e8   : > { %v3421_v7 = vrot.slane %v3276_v27, 1 }
 0x3ea   : > { %v3422_v36 = vsel %vm1500_vm0, %v3419_v15, %v3421_v7  ;;  %v3458_v21 = vadd.f32 %v3421_v7, %v3168_v0 }
 0x3eb   : > { %v3457_v58 = vadd.f32 %v3422_v36, %v3166_v14 }
 0x3ec   : > { %v3476_v16 = vadd.f32 %v7350_v32, %v3458_v21  ;;  %v3806_v30 = vpop.f32.mrf.mxu2  ;;  %v3762_v41 = vpop.f32.mrf.mxu0 }
 0x3ed   : > { %v3475_v24 = vadd.f32 %v7350_v32, %v3457_v58  ;;  %v3830_v45 = vpop.f32.mrf.mxu3  ;;  %v3784_v37 = vpop.f32.mrf.mxu1 }
 0x3ee   : > { %5455 = vst [vmem:[%s6900_s9 + $0x1df] sm:$0x1] %v3476_v16 }
 0x3ef   : > { %5454 = vst [vmem:[%s6900_s9 + $0x1d7] sm:$0xff] %v3475_v24 }
 0x3f4   : > { %v3808_v12 = vpop.f32.mrf.mxu2  ;;  %v3765_v20 = vpop.f32.mrf.mxu0 }
 0x3f5   : > { %v3832_v47 = vpop.f32.mrf.mxu3  ;;  %v3787_v50 = vpop.f32.mrf.mxu1 }
 0x3fc   : > { %v3811_v53 = vpop.f32.mrf.mxu2  ;;  %v7398_v54 = vpop.f32.mrf.mxu0 }
 0x3fd   : > { %v3835_v28 = vpop.f32.mrf.mxu3  ;;  %v3789_v55 = vpop.f32.mrf.mxu1 }
 0x404   : > { %v7400_v56 = vpop.f32.mrf.mxu2  ;;  %v7404_v18 = vpop.f32.mrf.mxu0 }
 0x405   : > { %v7402_v57 = vpop.f32.mrf.mxu3  ;;  %v3792_v62 = vpop.f32.mrf.mxu1 }
 0x40c   : > { %v7406_v63 = vpop.f32.mrf.mxu2  ;;  %v3771_v39 = vpop.f32.mrf.mxu0 }
 0x40d   : > { %v7408_v6 = vpop.f32.mrf.mxu3  ;;  %v7410_v11 = vpop.f32.mrf.mxu1 }
 0x414   : > { %v7412_v2 = vpop.f32.mrf.mxu2  ;;  %v4032_v59 = vpop.f32.mrf.mxu0 }
 0x415   : > { %v7414_v1 = vpop.f32.mrf.mxu3  ;;  %v4054_v25 = vpop.f32.mrf.mxu1  ;;  %v4033_v38 = vadd.f32 %v4032_v59, %v3760_v5 }
 0x416   : > { %v4055_v23 = vadd.f32 %v4054_v25, %v3782_v26 }
 0x418   : > { %v4123_v29 = vrot.slane %v4055_v23, 1 }
 0x41c   : > { %v4078_v3 = vpop.f32.mrf.mxu2  ;;  %v4034_v31 = vpop.f32.mrf.mxu0 }
 0x41d   : > { %v4102_v46 = vpop.f32.mrf.mxu3  ;;  %v4056_v33 = vpop.f32.mrf.mxu1  ;;  %v4079_v15 = vadd.f32 %v4078_v3, %v3806_v30  ;;  %v4035_v17 = vadd.f32 %v4034_v31, %v3762_v41 }
 0x41e   : > { %v4057_v48 = vadd.f32 %v4056_v33, %v3784_v37  ;;  %v4103_v60 = vadd.f32 %v4102_v46, %v3830_v45 }
 0x420   : > { %v4124_v43 = vrot.slane %v4057_v48, 1  ;;  %v4156_v49 = vrot.slane %v4103_v60, 1 }
 0x422   : > { %v4125_v8 = vsel %vm1500_vm0, %v4123_v29, %v4124_v43 }
 0x423   : > { %v4137_v40 = vadd.f32 %v4125_v8, %v4033_v38 }
 0x424   : > { %v4080_v35 = vpop.f32.mrf.mxu2  ;;  %v4037_v44 = vpop.f32.mrf.mxu0 }
 0x425   : > { %v4104_v51 = vpop.f32.mrf.mxu3  ;;  %v4141_v4 = vadd.f32 %v7350_v32, %v4137_v40  ;;  %v4059_v19 = vpop.f32.mrf.mxu1  ;;  %v4081_v16 = vadd.f32 %v4080_v35, %v3808_v12 }
 0x426   : > { %v4105_v42 = vadd.f32 %v4104_v51, %v3832_v47  ;;  %v4060_v13 = vadd.f32 %v4059_v19, %v3787_v50 }
 0x427   : > { %5736 = vst [vmem:[%s6900_s9 + $0x160] sm:$0xff] %v4141_v4 }
 0x428   : > { %v4157_v52 = vrot.slane %v4105_v42, 1  ;;  %v4126_v9 = vrot.slane %v4060_v13, 1 }
 0x42a   : > { %v4158_v22 = vsel %vm1500_vm0, %v4156_v49, %v4157_v52  ;;  %v4127_v10 = vsel %vm1500_vm0, %v4124_v43, %v4126_v9 }
 0x42b   : > { %v4172_v34 = vadd.f32 %v4158_v22, %v4079_v15  ;;  %v4138_v61 = vadd.f32 %v4127_v10, %v4035_v17 }
 0x42c   : > { %v4083_v5 = vpop.f32.mrf.mxu2  ;;  %v4038_v14 = vpop.f32.mrf.mxu0 }
 0x42d   : > { %v4178_v27 = vadd.f32 %v7350_v32, %v4172_v34  ;;  %v4107_v26 = vpop.f32.mrf.mxu3  ;;  %v4142_v0 = vadd.f32 %v7350_v32, %v4138_v61  ;;  %v4061_v36 = vpop.f32.mrf.mxu1  ;;  %v4084_v21 = vadd.f32 %v4083_v5, %v3811_v53  ;;  %v4039_v12 = vadd.f32 %v4038_v14, %v7398_v54 }
 0x42e   : > { %v4108_v7 = vadd.f32 %v4107_v26, %v3835_v28  ;;  %v4062_v47 = vadd.f32 %v4061_v36, %v3789_v55 }
 0x42f   : > { %5740 = vst [vmem:[%s6900_s9 + $0x1df] sm:$0xfe] %v4178_v27 }
 0x430   : > { %5737 = vst [vmem:[%s6900_s9 + $0x168] sm:$0xff] %v4142_v0  ;;  %v4159_v58 = vrot.slane %v4108_v7, 1  ;;  %v4128_v53 = vrot.slane %v4062_v47, 1 }
 0x432   : > { %v4160_v24 = vsel %vm1500_vm0, %v4157_v52, %v4159_v58  ;;  %v4174_v30 = vadd.f32 %v4159_v58, %v4084_v21 }
 0x433   : > { %v4173_v45 = vadd.f32 %v4160_v24, %v4081_v16 }
 0x434   : > { %v4180_v41 = vadd.f32 %v7350_v32, %v4174_v30  ;;  %v4085_v20 = vpop.f32.mrf.mxu2  ;;  %v4041_v28 = vpop.f32.mrf.mxu0 }
 0x435   : > { %v4179_v37 = vadd.f32 %v7350_v32, %v4173_v45  ;;  %v4109_v50 = vpop.f32.mrf.mxu3  ;;  %v4064_v39 = vpop.f32.mrf.mxu1  ;;  %v4086_v8 = vadd.f32 %v4085_v20, %v7400_v56 }
 0x436   : > { %5742 = vst [vmem:[%s6900_s9 + $0x1ef] sm:$0x1] %v4180_v41  ;;  %v4065_v59 = vadd.f32 %v4064_v39, %v3792_v62  ;;  %v4110_v3 = vadd.f32 %v4109_v50, %v7402_v57  ;;  %v4042_v57 = vadd.f32 %v4041_v28, %v7404_v18 }
 0x437   : > { %5741 = vst [vmem:[%s6900_s9 + $0x1e7] sm:$0xff] %v4179_v37 }
 0x438   : > { %v4129_v25 = vrot.slane %v4065_v59, 1  ;;  %v4161_v62 = vrot.slane %v4110_v3, 1 }
 0x43a   : > { %v4130_v23 = vsel %vm1500_vm0, %v4128_v53, %v4129_v25 }
 0x43b   : > { %v4139_v46 = vadd.f32 %v4130_v23, %v4039_v12 }
 0x43c   : > { %v4088_v31 = vpop.f32.mrf.mxu2  ;;  %v4043_v43 = vpop.f32.mrf.mxu0 }
 0x43d   : > { %v4112_v33 = vpop.f32.mrf.mxu3  ;;  %v4143_v55 = vadd.f32 %v7350_v32, %v4139_v46  ;;  %v4066_v29 = vpop.f32.mrf.mxu1  ;;  %v4089_v13 = vadd.f32 %v4088_v31, %v7406_v63 }
 0x43e   : > { %v4113_v48 = vadd.f32 %v4112_v33, %v7408_v6  ;;  %v4067_v38 = vadd.f32 %v4066_v29, %v7410_v11 }
 0x43f   : > { %5738 = vst [vmem:[%s6900_s9 + $0x170] sm:$0xff] %v4143_v55 }
 0x440   : > { %v4162_v54 = vrot.slane %v4113_v48, 1  ;;  %v4131_v60 = vrot.slane %v4067_v38, 1 }
 0x442   : > { %v4163_v40 = vsel %vm1500_vm0, %v4161_v62, %v4162_v54  ;;  %v4132_v51 = vsel %vm1500_vm0, %v4129_v25, %v4131_v60 }
 0x443   : > { %v4175_v35 = vadd.f32 %v4163_v40, %v4086_v8  ;;  %v4140_v6 = vadd.f32 %v4132_v51, %v4042_v57 }
 0x444   : > { %v4090_v11 = vpop.f32.mrf.mxu2 }
 0x445   : > { %v4181_v4 = vadd.f32 %v7350_v32, %v4175_v35  ;;  %v4114_v42 = vpop.f32.mrf.mxu3  ;;  %v4144_v44 = vadd.f32 %v7350_v32, %v4140_v6  ;;  %v4091_v18 = vadd.f32 %v4090_v11, %v7412_v2 }
 0x446   : > { %v4115_v56 = vadd.f32 %v4114_v42, %v7414_v1 }
 0x447   : > { %5743 = vst [vmem:[%s6900_s9 + $0x1ef] sm:$0xfe] %v4181_v4 }
 0x448   : > { %5739 = vst [vmem:[%s6900_s9 + $0x178] sm:$0xff] %v4144_v44  ;;  %v4164_v19 = vrot.slane %v4115_v56, 1 }
 0x44a   : > { %v4165_v49 = vsel %vm1500_vm0, %v4162_v54, %v4164_v19  ;;  %v4177_v52 = vadd.f32 %v4164_v19, %v4091_v18 }
 0x44b   : > { %v4176_v15 = vadd.f32 %v4165_v49, %v4089_v13 }
 0x44c   : > { %v4183_v9 = vadd.f32 %v7350_v32, %v4177_v52 }
 0x44d   : > { %v4182_v17 = vadd.f32 %v7350_v32, %v4176_v15 }
 0x44e   : > { %5745 = vst [vmem:[%s6900_s9 + $0x1ff] sm:$0x1] %v4183_v9 }
 0x44f   : > { %5744 = vst [vmem:[%s6900_s9 + $0x1f7] sm:$0xff] %v4182_v17 }
 0x450   : > { %s7593_s1 = sld [smem:[#allocation22_spill]]  ;;  %s4217_s14 = sshll.u32 %s6900_s9, 4  ;;  %s4218_s14 = int_to_ptr.vmem [resolvable:$true] %s4217_s14 }
 0x451   : > { %s7594_s23 = sld [smem:[#allocation23_spill]]  ;;  %s6497_s2 = smov 2048  }
 0x452   : > { %s7596_s12 = sld [smem:[#allocation40_spill]]  ;;  %s6498_s7 = smov 4096  }
 0x453   : > { %6081 = sst [smem:[#allocation13]] (%p6693_p5), %s6497_s2  ;;  %s6499_s4 = smov 16  }
 0x454   : > { %6082 = sst [smem:[#allocation13 + $0x1]] (%p6693_p5), %s6498_s7  ;;  %s6500_s3 = smov 128  }
 0x455   : > { %6083 = sst [smem:[#allocation13 + $0x2]] (%p6693_p5), %s6499_s4  ;;  %s6501_s24 = smov 8  }
 0x456   : > { %s6063_s5 = sshll.u32 %s7593_s1, 4  ;;  %6084 = sst [smem:[#allocation13 + $0x3]] (%p6693_p5), %s6500_s3 }
 0x457   : > { %s5749_s29 = sshll.u32 %s7594_s23, 7  ;;  %6085 = sst [smem:[#allocation13 + $0x4]] (%p6693_p5), %s6500_s3 }
 0x458   : > { %s4204_s30 = sadd.s32 %s6063_s5, %s5749_s29  ;;  %6086 = sst [smem:[#allocation13 + $0x5]] (%p6693_p5), %s6501_s24 }
 0x459   : > { %s5750_s8 = sshll.u32 %s4204_s30, 3  ;;  %s6502_s9 = smov [#allocation12]  }
 0x45a   : > { %s4206_s15 = scalar_lea.hbm %s7596_s12, %s5750_s8  ;;  %s6503_s28 = smov 0  }
 0x45b   : > { %s4219_s0 = sshll.u32 %s4206_s15, 4  ;;  %s4220_s0 = int_to_ptr.hbm [resolvable:$true] %s4219_s0 }
 0x45c   : > { %6087 = dma.general (%p6693_p5), %s4218_s14, 8192, %s4220_s0, %s4192_s10, %s6502_s9, [#allocation13], %s6503_s28, 0  }
 0x45d PF: > { %s7597_s16 = sld [smem:[#allocation26_spill]] }
 0x45e   : > { %s7598_s11 = sld [smem:[#allocation20_spill]] }
 0x463   : > { %p6099_p6 = scmp.ge.s32.totalorder %s7597_s16, 2 }
 0x464   : > { %s4247_s18 = sand.u32 1, %s7598_s11  }
 0x465   : > { %p6094_p10 = pnand %p6099_p6, %p6704_p9  ;;  %s4248_s13 = scalar_lea.sflag [#allocation5], %s4247_s18 }
 0x467   : > { %p6095_p13 = pneg %p6094_p10 }
 0x469   : > { %6428 = dma.done.wait (%p6095_p13), %s4248_s13, 8192  }
 0x46a   : > { %6430 = vsyncadd (%p6095_p13), %s4248_s13, 4294959104  ;;  %s25_s6 = sadd.s32 1, %s7597_s16   ;;  %s7601_s10 = sld [smem:[#allocation32_spill]] }
 0x46b   : > { %p7479_p3 = scmp.ge.s32.totalorder %s25_s6, 6   ;;  %s7602_s23 = sld [smem:[#allocation19_spill]] }
 0x46c   : > { %s7603_s5 = sld [smem:[#allocation30_spill]]  ;;  %s7610_s18 = smov %s6439_s19 }
 0x46d   : > { %s7604_s29 = sld [smem:[#allocation21_spill]]  ;;  %s7611_s19 = smov %s6443_s20 }
 0x46e   : > { %s7605_s26 = sld [smem:[#allocation29_spill]]  ;;  %s7613_s21 = smov %s6451_s22 }
 0x46f   : > { %s7606_s27 = sld [smem:[#allocation24_spill]]  ;;  %s7616_s24 = smov %s6463_s25 }
 0x470   : > { %s7607_s28 = sld [smem:[#allocation25_spill]]  ;;  %s7612_s20 = smov %s7601_s10 }
 0x471   : > { %s7608_s30 = sld [smem:[#allocation27_spill]]  ;;  %s7614_s22 = smov %s7602_s23 }
 0x472   : > { %s7609_s14 = sld [smem:[#allocation28_spill]]  ;;  %s7615_s23 = smov %s7603_s5 }
 0x473   : > { %s7617_s25 = smov %s7604_s29 }
 0x474   :  { %24 = sbr.rel (!%p7479_p3) target bundleno = 20 (0x14), region = 134 }
 0x477   : > { %s7618_s29 = smov %s7608_s30 }
 0x478   : > { %s7619_s30 = smov %s7609_s14 }
 0x479   :  { %4254 = vsyncpa [#allocation4], 1 }
 0x47a   :  { %4256 = vsyncpa [#allocation4 + $0x1], 1 }
 0x47b   :  { %4257 = vsyncpa [#allocation7], 1 }
 0x47c   :  { %4259 = vsyncpa [#allocation7 + $0x1], 1 }
 0x47d   :  { %4260 = vsyncpa [#allocation10], 1 }
 0x47e   :  { %4261 = vsyncpa [#allocation5], 1 }
 0x47f   :  { %4263 = vsyncpa [#allocation5 + $0x1], 1 }

</bundles_post_ra>
